<compile_context>
chip_gen: v6e
topology: v6e:2x2x1
jax: 0.10.0
libtpu: 0.0.40
codegen_flags: <defaults>
</compile_context>

<pallas_src>
import jax
import jax.numpy as jnp
from jax import lax
from jax.experimental import pallas as pl
from jax.experimental.pallas import tpu as pltpu

EPS = 1e-5


# --------------------------- Pallas kernel bodies --------------------------- #
def _up_matmul_bias_relu_kernel(x_ref, w_ref, b_ref, o_ref):
    """o = relu(x @ w + shift) for one row tile (BN scale pre-folded into w)."""
    acc = jnp.dot(x_ref[...], w_ref[...], preferred_element_type=jnp.float32)
    o_ref[...] = jnp.maximum(acc + b_ref[...], 0.0)


def _make_fused_convs_kernel(Hp, Wp, C):
    """Two chained 3x3 convs (+ folded BN + ReLU) on one (Hp, Wp, C) image."""

    def _conv3x3(pad_ref, w_ref, b_ref):
        img = pad_ref[...]                                   # (Hp+2, Wp+2, C)
        # im2col: 9 static whole-image taps, channel-minor column order
        # (ky, kx, ci) -> matches the (9*C, C) weight layout built in the wrapper.
        taps = [img[ky:ky + Hp, kx:kx + Wp, :]               # (Hp, Wp, C) each
                for ky in range(3) for kx in range(3)]
        a = jnp.concatenate(taps, axis=-1)                   # (Hp, Wp, 9*C)
        a = a.reshape(Hp * Wp, 9 * C)                        # sublane-aligned merge
        acc = jnp.dot(a, w_ref[...], preferred_element_type=jnp.float32)
        return jnp.maximum(acc + b_ref[...], 0.0)            # (Hp*Wp, C)

    def kernel(up_ref, w1_ref, b1_ref, w2_ref, b2_ref, o_ref, pad_ref):
        # Zero the padded scratch once per image; only its interior is
        # rewritten below, so the 1-pixel zero border stays valid for both convs.
        pad_ref[...] = jnp.zeros_like(pad_ref)
        pad_ref[1:1 + Hp, 1:1 + Wp, :] = up_ref[0]
        h1 = _conv3x3(pad_ref, w1_ref, b1_ref)               # conv1 + BN + ReLU
        pad_ref[1:1 + Hp, 1:1 + Wp, :] = h1.reshape(Hp, Wp, C)   # single bulk store
        o_ref[0] = _conv3x3(pad_ref, w2_ref, b2_ref)         # conv2 + BN + ReLU

    return kernel


# ------------------------------ Pallas wrappers ------------------------------ #
def _row_tile(m):
    tm = min(512, m)
    if m // tm < 2:                      # keep >=2 programs when possible (v7x: 2 TCs)
        tm = max(8, (((m + 1) // 2) + 7) // 8 * 8)
    return tm


def up_matmul_bias_relu(x2d, w, shift):
    """x2d: (M, Cin), w: (Cin, K) (BN-scaled), shift: (1, K) -> (M, K)."""
    M, Cin = x2d.shape
    K = w.shape[1]
    tm = _row_tile(M)
    return pl.pallas_call(
        _up_matmul_bias_relu_kernel,
        out_shape=jax.ShapeDtypeStruct((M, K), jnp.float32),
        grid=(pl.cdiv(M, tm),),
        in_specs=[
            pl.BlockSpec((tm, Cin), lambda i: (i, 0)),
            pl.BlockSpec((Cin, K), lambda i: (0, 0)),
            pl.BlockSpec((1, K), lambda i: (0, 0)),
        ],
        out_specs=pl.BlockSpec((tm, K), lambda i: (i, 0)),
        compiler_params=pltpu.CompilerParams(
            dimension_semantics=("parallel",),
            vmem_limit_bytes=32 * 1024 * 1024),
    )(x2d, w, shift)


def fused_convs_bn_relu(up_nhwc, w1, b1, w2, b2):
    """up_nhwc: (N, Hp, Wp, C); w*: (9C, C) (BN-scaled); b*: (1, C) -> (N, Hp*Wp, C)."""
    N, Hp, Wp, C = up_nhwc.shape
    kernel = _make_fused_convs_kernel(Hp, Wp, C)

    def full(shape):
        return pl.BlockSpec(shape, lambda n: (0,) * len(shape))

    return pl.pallas_call(
        kernel,
        out_shape=jax.ShapeDtypeStruct((N, Hp * Wp, C), jnp.float32),
        grid=(N,),
        in_specs=[
            pl.BlockSpec((1, Hp, Wp, C), lambda n: (n, 0, 0, 0)),
            full((9 * C, C)), full((1, C)),
            full((9 * C, C)), full((1, C)),
        ],
        out_specs=pl.BlockSpec((1, Hp * Wp, C), lambda n: (n, 0, 0)),
        scratch_shapes=[pltpu.VMEM((Hp + 2, Wp + 2, C), jnp.float32)],
        compiler_params=pltpu.CompilerParams(
            dimension_semantics=("parallel",),
            vmem_limit_bytes=32 * 1024 * 1024),
    )(up_nhwc, w1, b1, w2, b2)


# ------------------------------ glue (JAX) ----------------------------------- #
def _bn_fold(gamma, beta, mean, var, conv_bias, eps=EPS):
    s = gamma / jnp.sqrt(var + eps)
    return s, (conv_bias - mean) * s + beta


def ynet_au_de_block_forward(x_nhwc, p):
    """x_nhwc: (N, H, W, Cin) -> (N, 2H, 2W, Cout).  Activation = ReLU."""
    N, H, W, Cin = x_nhwc.shape
    Cout = p["w_up"].shape[1]

    # ---- up = ConvTranspose2d(k=2, s=2, p=0): one matmul per input pixel ----
    # flattened weight column order: (ky, kx, cout); BN scale folded into columns.
    s_up, sh_up = _bn_fold(p["g_up"], p["beta_up"], p["m_up"], p["v_up"], p["b_up"])
    w_up_flat = (jnp.transpose(p["w_up"], (0, 2, 3, 1)) * s_up).reshape(Cin, 4 * Cout)
    up_flat = up_matmul_bias_relu(
        x_nhwc.reshape(N * H * W, Cin), w_up_flat, jnp.tile(sh_up, 4)[None, :])
    # pixel-shuffle (ky, kx) into the spatial dims (small XLA transpose)
    up = (up_flat.reshape(N, H, W, 2, 2, Cout)
                 .transpose(0, 1, 3, 2, 4, 5)
                 .reshape(N, 2 * H, 2 * W, Cout))

    # ---- conv(3x3, pad=1) + BN + ReLU, twice, fused in ONE Pallas kernel ----
    s1, b1 = _bn_fold(p["g1"], p["beta1"], p["m1"], p["v1"], p["b1"])
    s2, b2 = _bn_fold(p["g2"], p["beta2"], p["m2"], p["v2"], p["b2"])
    w1 = (jnp.transpose(p["w1"], (2, 3, 1, 0)) * s1).reshape(9 * Cout, Cout)
    w2 = (jnp.transpose(p["w2"], (2, 3, 1, 0)) * s2).reshape(9 * Cout, Cout)
    out_flat = fused_convs_bn_relu(up, w1, b1[None, :], w2, b2[None, :])
    return out_flat.reshape(N, 2 * H, 2 * W, Cout)


# ------------------------------ reference (NCHW) ----------------------------- #
def _bn_eval(x, gamma, beta, mean, var, eps=EPS):
    b = lambda v: v[None, :, None, None]
    return (x - b(mean)) / jnp.sqrt(b(var) + eps) * b(gamma) + b(beta)


def ref_forward_nchw(x, p):
    relu = lambda t: jnp.maximum(t, 0.0)
    dn = ("NCHW", "OIHW", "NCHW")
    hi = lax.Precision.HIGHEST
    # ConvTranspose2d(k=2, s=2, p=0) == conv(lhs_dilation=2, pad=1, flipped swapped kernel)
    w_eq = jnp.flip(jnp.transpose(p["w_up"], (1, 0, 2, 3)), axis=(2, 3))
    up = lax.conv_general_dilated(x, w_eq, (1, 1), ((1, 1), (1, 1)),
                                  lhs_dilation=(2, 2), dimension_numbers=dn,
                                  precision=hi)
    up = up + p["b_up"][None, :, None, None]
    up = relu(_bn_eval(up, p["g_up"], p["beta_up"], p["m_up"], p["v_up"]))
    out = lax.conv_general_dilated(up, p["w1"], (1, 1), ((1, 1), (1, 1)),
                                   dimension_numbers=dn, precision=hi)
    out = relu(_bn_eval(out + p["b1"][None, :, None, None],
                        p["g1"], p["beta1"], p["m1"], p["v1"]))
    out = lax.conv_general_dilated(out, p["w2"], (1, 1), ((1, 1), (1, 1)),
                                   dimension_numbers=dn, precision=hi)
    out = relu(_bn_eval(out + p["b2"][None, :, None, None],
                        p["g2"], p["beta2"], p["m2"], p["v2"]))
    return out


# ------------------------------------ main ----------------------------------- #
if __name__ == "__main__":
    key = jax.random.PRNGKey(0)
    in_size, out_size = 16, 8
    N, H, W = 2, 8, 8
    ks = iter(jax.random.split(key, 24))

    def nrm(shape, scale):
        return jax.random.normal(next(ks), shape, jnp.float32) * scale

    p = dict(
        w_up=nrm((in_size, out_size, 2, 2), 0.2),      b_up=nrm((out_size,), 0.1),
        g_up=1.0 + nrm((out_size,), 0.1),              beta_up=nrm((out_size,), 0.1),
        m_up=nrm((out_size,), 0.1),                    v_up=0.9 + jnp.abs(nrm((out_size,), 0.1)),
        w1=nrm((out_size, out_size, 3, 3), 0.15),      b1=nrm((out_size,), 0.1),
        g1=1.0 + nrm((out_size,), 0.1),                beta1=nrm((out_size,), 0.1),
        m1=nrm((out_size,), 0.1),                      v1=0.9 + jnp.abs(nrm((out_size,), 0.1)),
        w2=nrm((out_size, out_size, 3, 3), 0.15),      b2=nrm((out_size,), 0.1),
        g2=1.0 + nrm((out_size,), 0.1),                beta2=nrm((out_size,), 0.1),
        m2=nrm((out_size,), 0.1),                      v2=0.9 + jnp.abs(nrm((out_size,), 0.1)),
    )

    x_nchw = jax.random.normal(next(ks), (N, in_size, H, W), jnp.float32)
    x_nhwc = jnp.transpose(x_nchw, (0, 2, 3, 1))

    out_nhwc = jax.jit(ynet_au_de_block_forward)(x_nhwc, p)
    out_nhwc = jax.block_until_ready(out_nhwc)
    out_nchw = jnp.transpose(out_nhwc, (0, 3, 1, 2))

    ref = ref_forward_nchw(x_nchw, p)
    assert out_nchw.shape == ref.shape == (N, out_size, 2 * H, 2 * W)
    max_err = float(jnp.max(jnp.abs(out_nchw - ref)))
    # All-f32 path (typically ~1e-5); headroom only covers MXU pass selection.
    assert max_err < 2e-2, f"max abs err {max_err}"
    print("KERNEL_OK")
</pallas_src>

<mosaic_0001>
module attributes {stable_mosaic.version = 11 : i64} {
  func.func @_up_matmul_bias_relu_kernel(%arg0: i32, %arg1: memref<64x16xf32, #tpu.memory_space<vmem>>, %arg2: memref<16x32xf32, #tpu.memory_space<vmem>>, %arg3: memref<1x32xf32, #tpu.memory_space<vmem>>, %arg4: memref<64x32xf32, #tpu.memory_space<vmem>>) attributes {dimension_semantics = [#tpu.dimension_semantics<parallel>], iteration_bounds = array<i64: 2>, scalar_prefetch = 0 : i64, scratch_operands = 0 : i64, tpu.core_type = #tpu.core_type<tc>, window_params = [{transform_indices = @transform_0, window_bounds = array<i64: 64, 16>}, {pipeline_mode = #tpu.pipeline_mode<synchronous>, transform_indices = @transform_1, window_bounds = array<i64: 16, 32>}, {pipeline_mode = #tpu.pipeline_mode<synchronous>, transform_indices = @transform_2, window_bounds = array<i64: 1, 32>}, {transform_indices = @transform_3, window_bounds = array<i64: 64, 32>}]} {
    %c0 = arith.constant 0 : index
    %c0_0 = arith.constant 0 : index
    %0 = vector.load %arg1[%c0, %c0_0] : memref<64x16xf32, #tpu.memory_space<vmem>>, vector<64x16xf32>
    %c0_1 = arith.constant 0 : index
    %c0_2 = arith.constant 0 : index
    %1 = vector.load %arg2[%c0_1, %c0_2] : memref<16x32xf32, #tpu.memory_space<vmem>>, vector<16x32xf32>
    %cst = arith.constant dense<0.000000e+00> : vector<64x32xf32>
    %2 = tpu.matmul %0, %1, %cst {dimension_numbers = #tpu.dot_dimension_numbers<[1], [0], [0], [1], [0, 0, 1, 1], [], []>} : vector<64x16xf32>, vector<16x32xf32>, vector<64x32xf32> -> vector<64x32xf32>
    %c0_3 = arith.constant 0 : index
    %c0_4 = arith.constant 0 : index
    %3 = vector.load %arg3[%c0_3, %c0_4] : memref<1x32xf32, #tpu.memory_space<vmem>>, vector<1x32xf32>
    %4 = vector.broadcast %3 : vector<1x32xf32> to vector<64x32xf32>
    %5 = arith.addf %2, %4 : vector<64x32xf32>
    %cst_5 = arith.constant 0.000000e+00 : f32
    %6 = vector.broadcast %cst_5 : f32 to vector<64x32xf32>
    %7 = arith.maximumf %5, %6 : vector<64x32xf32>
    %c0_6 = arith.constant 0 : index
    %c0_7 = arith.constant 0 : index
    %8 = vector.load %arg4[%c0_6, %c0_7] : memref<64x32xf32, #tpu.memory_space<vmem>>, vector<64x32xf32>
    tpu.vector_store %arg4[%c0_6, %c0_7], %7 {strides = array<i32>} : memref<64x32xf32, #tpu.memory_space<vmem>>, vector<64x32xf32>,
    return
  }
  func.func @transform_0(%arg0: i32) -> (i32, i32) {
    %c0_i32 = arith.constant 0 : i32
    %c0_i32_0 = arith.constant 0 : i32
    return %arg0, %c0_i32 : i32, i32
  }
  func.func @transform_1(%arg0: i32) -> (i32, i32) {
    %c0_i32 = arith.constant 0 : i32
    %c0_i32_0 = arith.constant 0 : i32
    %c0_i32_1 = arith.constant 0 : i32
    return %c0_i32, %c0_i32_0 : i32, i32
  }
  func.func @transform_2(%arg0: i32) -> (i32, i32) {
    %c0_i32 = arith.constant 0 : i32
    %c0_i32_0 = arith.constant 0 : i32
    %c0_i32_1 = arith.constant 0 : i32
    return %c0_i32, %c0_i32_0 : i32, i32
  }
  func.func @transform_3(%arg0: i32) -> (i32, i32) {
    %c0_i32 = arith.constant 0 : i32
    %c0_i32_0 = arith.constant 0 : i32
    return %arg0, %c0_i32 : i32, i32
  }
}

module attributes {stable_mosaic.version = 11 : i64} {
  func.func @kernel(%arg0: i32, %arg1: memref<1x16x16x8xf32, #tpu.memory_space<vmem>>, %arg2: memref<72x8xf32, #tpu.memory_space<vmem>>, %arg3: memref<1x8xf32, #tpu.memory_space<vmem>>, %arg4: memref<72x8xf32, #tpu.memory_space<vmem>>, %arg5: memref<1x8xf32, #tpu.memory_space<vmem>>, %arg6: memref<1x256x8xf32, #tpu.memory_space<vmem>>, %arg7: memref<18x18x8xf32, #tpu.memory_space<vmem>>) attributes {dimension_semantics = [#tpu.dimension_semantics<parallel>], iteration_bounds = array<i64: 2>, scalar_prefetch = 0 : i64, scratch_operands = 1 : i64, tpu.core_type = #tpu.core_type<tc>, window_params = [{transform_indices = @transform_0, window_bounds = array<i64: 1, 16, 16, 8>}, {pipeline_mode = #tpu.pipeline_mode<synchronous>, transform_indices = @transform_1, window_bounds = array<i64: 72, 8>}, {pipeline_mode = #tpu.pipeline_mode<synchronous>, transform_indices = @transform_2, window_bounds = array<i64: 1, 8>}, {pipeline_mode = #tpu.pipeline_mode<synchronous>, transform_indices = @transform_3, window_bounds = array<i64: 72, 8>}, {pipeline_mode = #tpu.pipeline_mode<synchronous>, transform_indices = @transform_4, window_bounds = array<i64: 1, 8>}, {transform_indices = @transform_5, window_bounds = array<i64: 1, 256, 8>}]} {
    %cst = arith.constant 0.000000e+00 : f32
    %0 = vector.broadcast %cst : f32 to vector<18x18x8xf32>
    %c0 = arith.constant 0 : index
    %c0_0 = arith.constant 0 : index
    %c0_1 = arith.constant 0 : index
    %1 = vector.load %arg7[%c0, %c0_0, %c0_1] : memref<18x18x8xf32, #tpu.memory_space<vmem>>, vector<18x18x8xf32>
    tpu.vector_store %arg7[%c0, %c0_0, %c0_1], %0 {strides = array<i32>} : memref<18x18x8xf32, #tpu.memory_space<vmem>>, vector<18x18x8xf32>,
    %c0_2 = arith.constant 0 : index
    %c0_3 = arith.constant 0 : index
    %c0_4 = arith.constant 0 : index
    %c0_5 = arith.constant 0 : index
    %2 = vector.load %arg1[%c0_2, %c0_3, %c0_4, %c0_5] : memref<1x16x16x8xf32, #tpu.memory_space<vmem>>, vector<1x16x16x8xf32>
    %3 = vector.shape_cast %2 : vector<1x16x16x8xf32> to vector<16x16x8xf32>
    %c1 = arith.constant 1 : index
    %c1_6 = arith.constant 1 : index
    %c0_7 = arith.constant 0 : index
    %4 = vector.load %arg7[%c1, %c1_6, %c0_7] : memref<18x18x8xf32, #tpu.memory_space<vmem>>, vector<16x16x8xf32>
    tpu.vector_store %arg7[%c1, %c1_6, %c0_7], %3 {strides = array<i32>} : memref<18x18x8xf32, #tpu.memory_space<vmem>>, vector<16x16x8xf32>,
    %c0_8 = arith.constant 0 : index
    %c0_9 = arith.constant 0 : index
    %c0_10 = arith.constant 0 : index
    %5 = vector.load %arg7[%c0_8, %c0_9, %c0_10] : memref<18x18x8xf32, #tpu.memory_space<vmem>>, vector<18x18x8xf32>
    %6 = vector.extract_strided_slice %5 {offsets = [0, 0, 0], sizes = [16, 16, 8], strides = [1, 1, 1]} : vector<18x18x8xf32> to vector<16x16x8xf32>
    %7 = vector.extract_strided_slice %5 {offsets = [0, 1, 0], sizes = [16, 16, 8], strides = [1, 1, 1]} : vector<18x18x8xf32> to vector<16x16x8xf32>
    %8 = vector.extract_strided_slice %5 {offsets = [0, 2, 0], sizes = [16, 16, 8], strides = [1, 1, 1]} : vector<18x18x8xf32> to vector<16x16x8xf32>
    %9 = vector.extract_strided_slice %5 {offsets = [1, 0, 0], sizes = [16, 16, 8], strides = [1, 1, 1]} : vector<18x18x8xf32> to vector<16x16x8xf32>
    %10 = vector.extract_strided_slice %5 {offsets = [1, 1, 0], sizes = [16, 16, 8], strides = [1, 1, 1]} : vector<18x18x8xf32> to vector<16x16x8xf32>
    %11 = vector.extract_strided_slice %5 {offsets = [1, 2, 0], sizes = [16, 16, 8], strides = [1, 1, 1]} : vector<18x18x8xf32> to vector<16x16x8xf32>
    %12 = vector.extract_strided_slice %5 {offsets = [2, 0, 0], sizes = [16, 16, 8], strides = [1, 1, 1]} : vector<18x18x8xf32> to vector<16x16x8xf32>
    %13 = vector.extract_strided_slice %5 {offsets = [2, 1, 0], sizes = [16, 16, 8], strides = [1, 1, 1]} : vector<18x18x8xf32> to vector<16x16x8xf32>
    %14 = vector.extract_strided_slice %5 {offsets = [2, 2, 0], sizes = [16, 16, 8], strides = [1, 1, 1]} : vector<18x18x8xf32> to vector<16x16x8xf32>
    %15 = tpu.concatenate %6, %7, %8, %9, %10, %11, %12, %13, %14 in 2 : vector<16x16x8xf32>, vector<16x16x8xf32>, vector<16x16x8xf32>, vector<16x16x8xf32>, vector<16x16x8xf32>, vector<16x16x8xf32>, vector<16x16x8xf32>, vector<16x16x8xf32>, vector<16x16x8xf32> -> vector<16x16x72xf32>
    %16 = vector.shape_cast %15 : vector<16x16x72xf32> to vector<256x72xf32>
    %c0_11 = arith.constant 0 : index
    %c0_12 = arith.constant 0 : index
    %17 = vector.load %arg2[%c0_11, %c0_12] : memref<72x8xf32, #tpu.memory_space<vmem>>, vector<72x8xf32>
    %cst_13 = arith.constant dense<0.000000e+00> : vector<256x8xf32>
    %18 = tpu.matmul %16, %17, %cst_13 {dimension_numbers = #tpu.dot_dimension_numbers<[1], [0], [0], [1], [0, 0, 1, 1], [], []>} : vector<256x72xf32>, vector<72x8xf32>, vector<256x8xf32> -> vector<256x8xf32>
    %c0_14 = arith.constant 0 : index
    %c0_15 = arith.constant 0 : index
    %19 = vector.load %arg3[%c0_14, %c0_15] : memref<1x8xf32, #tpu.memory_space<vmem>>, vector<1x8xf32>
    %20 = vector.broadcast %19 : vector<1x8xf32> to vector<256x8xf32>
    %21 = arith.addf %18, %20 : vector<256x8xf32>
    %cst_16 = arith.constant 0.000000e+00 : f32
    %22 = vector.broadcast %cst_16 : f32 to vector<256x8xf32>
    %23 = arith.maximumf %21, %22 : vector<256x8xf32>
    %24 = vector.shape_cast %23 : vector<256x8xf32> to vector<16x16x8xf32>
    %c1_17 = arith.constant 1 : index
    %c1_18 = arith.constant 1 : index
    %c0_19 = arith.constant 0 : index
    %25 = vector.load %arg7[%c1_17, %c1_18, %c0_19] : memref<18x18x8xf32, #tpu.memory_space<vmem>>, vector<16x16x8xf32>
    tpu.vector_store %arg7[%c1_17, %c1_18, %c0_19], %24 {strides = array<i32>} : memref<18x18x8xf32, #tpu.memory_space<vmem>>, vector<16x16x8xf32>,
    %c0_20 = arith.constant 0 : index
    %c0_21 = arith.constant 0 : index
    %c0_22 = arith.constant 0 : index
    %26 = vector.load %arg7[%c0_20, %c0_21, %c0_22] : memref<18x18x8xf32, #tpu.memory_space<vmem>>, vector<18x18x8xf32>
    %27 = vector.extract_strided_slice %26 {offsets = [0, 0, 0], sizes = [16, 16, 8], strides = [1, 1, 1]} : vector<18x18x8xf32> to vector<16x16x8xf32>
    %28 = vector.extract_strided_slice %26 {offsets = [0, 1, 0], sizes = [16, 16, 8], strides = [1, 1, 1]} : vector<18x18x8xf32> to vector<16x16x8xf32>
    %29 = vector.extract_strided_slice %26 {offsets = [0, 2, 0], sizes = [16, 16, 8], strides = [1, 1, 1]} : vector<18x18x8xf32> to vector<16x16x8xf32>
    %30 = vector.extract_strided_slice %26 {offsets = [1, 0, 0], sizes = [16, 16, 8], strides = [1, 1, 1]} : vector<18x18x8xf32> to vector<16x16x8xf32>
    %31 = vector.extract_strided_slice %26 {offsets = [1, 1, 0], sizes = [16, 16, 8], strides = [1, 1, 1]} : vector<18x18x8xf32> to vector<16x16x8xf32>
    %32 = vector.extract_strided_slice %26 {offsets = [1, 2, 0], sizes = [16, 16, 8], strides = [1, 1, 1]} : vector<18x18x8xf32> to vector<16x16x8xf32>
    %33 = vector.extract_strided_slice %26 {offsets = [2, 0, 0], sizes = [16, 16, 8], strides = [1, 1, 1]} : vector<18x18x8xf32> to vector<16x16x8xf32>
    %34 = vector.extract_strided_slice %26 {offsets = [2, 1, 0], sizes = [16, 16, 8], strides = [1, 1, 1]} : vector<18x18x8xf32> to vector<16x16x8xf32>
    %35 = vector.extract_strided_slice %26 {offsets = [2, 2, 0], sizes = [16, 16, 8], strides = [1, 1, 1]} : vector<18x18x8xf32> to vector<16x16x8xf32>
    %36 = tpu.concatenate %27, %28, %29, %30, %31, %32, %33, %34, %35 in 2 : vector<16x16x8xf32>, vector<16x16x8xf32>, vector<16x16x8xf32>, vector<16x16x8xf32>, vector<16x16x8xf32>, vector<16x16x8xf32>, vector<16x16x8xf32>, vector<16x16x8xf32>, vector<16x16x8xf32> -> vector<16x16x72xf32>
    %37 = vector.shape_cast %36 : vector<16x16x72xf32> to vector<256x72xf32>
    %c0_23 = arith.constant 0 : index
    %c0_24 = arith.constant 0 : index
    %38 = vector.load %arg4[%c0_23, %c0_24] : memref<72x8xf32, #tpu.memory_space<vmem>>, vector<72x8xf32>
    %cst_25 = arith.constant dense<0.000000e+00> : vector<256x8xf32>
    %39 = tpu.matmul %37, %38, %cst_25 {dimension_numbers = #tpu.dot_dimension_numbers<[1], [0], [0], [1], [0, 0, 1, 1], [], []>} : vector<256x72xf32>, vector<72x8xf32>, vector<256x8xf32> -> vector<256x8xf32>
    %c0_26 = arith.constant 0 : index
    %c0_27 = arith.constant 0 : index
    %40 = vector.load %arg5[%c0_26, %c0_27] : memref<1x8xf32, #tpu.memory_space<vmem>>, vector<1x8xf32>
    %41 = vector.broadcast %40 : vector<1x8xf32> to vector<256x8xf32>
    %42 = arith.addf %39, %41 : vector<256x8xf32>
    %cst_28 = arith.constant 0.000000e+00 : f32
    %43 = vector.broadcast %cst_28 : f32 to vector<256x8xf32>
    %44 = arith.maximumf %42, %43 : vector<256x8xf32>
    %c0_29 = arith.constant 0 : index
    %c0_30 = arith.constant 0 : index
    %c0_31 = arith.constant 0 : index
    %45 = vector.load %arg6[%c0_29, %c0_30, %c0_31] : memref<1x256x8xf32, #tpu.memory_space<vmem>>, vector<1x256x8xf32>
    %46 = vector.shape_cast %45 : vector<1x256x8xf32> to vector<256x8xf32>
    %47 = vector.shape_cast %44 : vector<256x8xf32> to vector<1x256x8xf32>
    tpu.vector_store %arg6[%c0_29, %c0_30, %c0_31], %47 {strides = array<i32>} : memref<1x256x8xf32, #tpu.memory_space<vmem>>, vector<1x256x8xf32>,
    return
  }
  func.func @transform_0(%arg0: i32) -> (i32, i32, i32, i32) {
    %c0_i32 = arith.constant 0 : i32
    %c0_i32_0 = arith.constant 0 : i32
    %c0_i32_1 = arith.constant 0 : i32
    %c0_i32_2 = arith.constant 0 : i32
    return %arg0, %c0_i32, %c0_i32_0, %c0_i32_1 : i32, i32, i32, i32
  }
  func.func @transform_1(%arg0: i32) -> (i32, i32) {
    %c0_i32 = arith.constant 0 : i32
    %c0_i32_0 = arith.constant 0 : i32
    %c0_i32_1 = arith.constant 0 : i32
    return %c0_i32, %c0_i32_0 : i32, i32
  }
  func.func @transform_2(%arg0: i32) -> (i32, i32) {
    %c0_i32 = arith.constant 0 : i32
    %c0_i32_0 = arith.constant 0 : i32
    %c0_i32_1 = arith.constant 0 : i32
    return %c0_i32, %c0_i32_0 : i32, i32
  }
  func.func @transform_3(%arg0: i32) -> (i32, i32) {
    %c0_i32 = arith.constant 0 : i32
    %c0_i32_0 = arith.constant 0 : i32
    %c0_i32_1 = arith.constant 0 : i32
    return %c0_i32, %c0_i32_0 : i32, i32
  }
  func.func @transform_4(%arg0: i32) -> (i32, i32) {
    %c0_i32 = arith.constant 0 : i32
    %c0_i32_0 = arith.constant 0 : i32
    %c0_i32_1 = arith.constant 0 : i32
    return %c0_i32, %c0_i32_0 : i32, i32
  }
  func.func @transform_5(%arg0: i32) -> (i32, i32, i32) {
    %c0_i32 = arith.constant 0 : i32
    %c0_i32_0 = arith.constant 0 : i32
    %c0_i32_1 = arith.constant 0 : i32
    return %arg0, %c0_i32, %c0_i32_0 : i32, i32, i32
  }
}

</mosaic_0001>

<bundles_post_ra>
// kernel: tile.8
= control target key start
LH: loop header
LB: loop body
LE: loop exit
PB: predicated region body
PF: predicated region fallthrough
CT: control target
= control target key end

     0   :  { %s22_s0 = inlined_call_operand.vmem [shape: f32[8], index: 0, kind: input, shape index: {}]   ;;  %s23_s1 = inlined_call_operand.vmem [shape: f32[4,8], index: 1, kind: output, shape index: {}]  }
   0x1   :  { %v4_v0 = vld [vmem:[%s22_s0] ss:$0 sm:$0xff] }
   0x2   :  { %5 = vst [vmem:[%s23_s1] sm:$0xf] %v4_v0 }

// kernel: tile.9
= control target key start
LH: loop header
LB: loop body
LE: loop exit
PB: predicated region body
PF: predicated region fallthrough
CT: control target
= control target key end

     0   :  { %vm8_vm0 = vcmask 64512   ;;  %s40_s8 = smov 8   ;;  %s41_s9 = smov 16   ;;  %vm14_vm1 = vcmask 261312   ;;  %vm20_vm2 = vcmask 195712   ;;  %vm26_vm3 = vcmask 130112   ;;  %s58_s0 = inlined_call_operand.vmem [shape: f32[4,8], index: 0, kind: input, shape index: {}]   ;;  %s59_s1 = inlined_call_operand.vmem [shape: f32[1,32], index: 1, kind: output, shape index: {}]  }
   0x1   :  { %v5_v0 = vld [vmem:[%s58_s0] sm:$0xf]  ;;  %s39_s0 = smov 24  }
   0x2   :  { %6 = vst [vmem:[#allocation1] sm:$0xf] %v5_v0 }
   0x9   :  { %v11_v1 = vld [vmem:[#allocation1 + $0x3] sm:$0x1]   ;;  %v23_v2 = vld [vmem:[#allocation1 + $0x1] sm:$0x1]   ;;  %v7_v3 = vld [vmem:[#allocation1] sm:$0x1]  }
   0xa   :  { %12 = vrot.lane.b32.xlu0 %v11_v1, %s39_s0  ;;  %24 = vrot.lane.b32.xlu1 %v23_v2, %s40_s8  ;;  %v17_v4 = vld [vmem:[#allocation1 + $0x2] sm:$0x1]   ;;  %9 = vst.msk [vmem:[#allocation0] sm:$0x1] %vm8_vm0, %v7_v3  }
   0xe   :  { %18 = vrot.lane.b32.xlu0 %v17_v4, %s41_s9 }
  0x7c   :  { %v13_v5 = vpop.permute.xlu0 %12   ;;  %v25_v6 = vpop.permute.xlu1 %24  }
  0x7d   :  { %15 = vst.msk [vmem:[#allocation0] sm:$0x1] %vm14_vm1, %v13_v5  }
  0x80   :  { %v19_v7 = vpop.permute.xlu0 %18  }
  0x81   :  { %21 = vst.msk [vmem:[#allocation0] sm:$0x1] %vm20_vm2, %v19_v7  }
  0x82   :  { %27 = vst.msk [vmem:[#allocation0] sm:$0x1] %vm26_vm3, %v25_v6  }
  0x89   :  { %v32_v8 = vld [vmem:[#allocation0] sm:$0x1] }
  0x8a   :  { %35 = vst [vmem:[%s59_s1] sm:$0x1] %v32_v8 }

// kernel: ynet_au_de_block_forward.2
= control target key start
LH: loop header
LB: loop body
LE: loop exit
PB: predicated region body
PF: predicated region fallthrough
CT: control target
= control target key end

     0   :  { %s480_s12 = smov 0   ;;  %s522_s0 = inlined_call_operand.vmem [shape: f32[128,16], index: 0, kind: input, shape index: {}]   ;;  %s523_s1 = inlined_call_operand.vmem [shape: f32[16,32], index: 1, kind: input, shape index: {}]   ;;  %s524_s2 = inlined_call_operand.vmem [shape: f32[1,32], index: 2, kind: input, shape index: {}]   ;;  %s525_s3 = inlined_call_operand.vmem [shape: f32[128,32], index: 3, kind: output, shape index: {}]  }
   0x1 LB: > { %s394_s13 = sadd.s32 4294967295, %s458_s12   ;;  %p398_p0 = scmp.ge.s32.totalorder %s458_s12, 1  ;;  %s458_s12 = sphi %s480_s12, %s13_s12  }
   0x2   : > { %p138_p1 = scmp.lt.s32.totalorder %s458_s12, 3 }
   0x4   : > { %p139_p2 = pnand %p398_p0, %p138_p1 }
   0x5   : > { %s399_s18 = sshll.u32 (!%p139_p2), %s394_s13, 3 }
   0x6   : > { %142 = sbr.rel (%p139_p2) target bundleno = 221 (0xdd), region = 32  ;;  %p163_p3 = scmp.lt.s32.totalorder (!%p139_p2), %s399_s18, 15 }
   0xb   : > { %v183_v0 = vld [vmem:[%s523_s1 + $0x8] sm:$0xff]  ;;  %v182_v1 = vld [vmem:[%s523_s1] sm:$0xff]  ;;  %s527_s18 = smov (!%p163_p3, %s399_s18), 15  ;;  %vm191_vm0 = vcmask 130048   ;;  %vm329_vm1 = vcmask 261120  }
   0xc   : > { %424 = vmatprep.subr.mxu0 %v183_v0  ;;  %440 = vmatprep.subr.mxu1 %v183_v0  ;;  %s400_s19 = sshll.u32 %s527_s18, 3  ;;  %v403_v10 = vld [vmem:[%s524_s2] ss:$0 sm:$0xff] }
   0xd   : > { %425 = vmatpush3.msra.mxu0 %v183_v0  ;;  %442 = vmatpush3.msra.mxu1 %v183_v0  ;;  %s166_s22 = scalar_lea.vmem %s522_s0, %s400_s19  ;;  %s172_s27 = scalar_lea.vmem %s525_s3, %s400_s19 }
   0xe   : > { %426 = vmatprep.subr.mxu0 %v182_v1  ;;  %441 = vmatprep.subr.mxu1 %v182_v1  ;;  %v174_v2 = vld [vmem:[%s166_s22] sm:$0xff]  ;;  %v175_v4 = vld [vmem:[%s166_s22 + $0x8] sm:$0xff]  ;;  %v176_v6 = vld [vmem:[%s166_s22 + $0x10] sm:$0xff] }
   0xf   : > { %427 = vmatpush3.msra.mxu0 %v182_v1  ;;  %443 = vmatpush3.msra.mxu1 %v182_v1  ;;  %v178_v3 = vld [vmem:[%s166_s22 + $0x20] sm:$0xff]  ;;  %v179_v5 = vld [vmem:[%s166_s22 + $0x28] sm:$0xff]  ;;  %v180_v7 = vld [vmem:[%s166_s22 + $0x30] sm:$0xff] }
  0x10   : > { %428 = vmatprep.mubr.msk.f32.mxu0 %vm191_vm0, %v174_v2  ;;  %434 = vmatprep.mubr.msk.f32.mxu1 %vm191_vm0, %v178_v3  ;;  %v177_v8 = vld [vmem:[%s166_s22 + $0x18] sm:$0xff] }
  0x11   : > { %429 = vmatmul.mubr.msk.f32.vlgmr.msra.gmra.mxu0 %vm191_vm0, %v175_v4  ;;  %435 = vmatmul.mubr.msk.f32.vlgmr.msra.gmra.mxu1 %vm191_vm0, %v179_v5  ;;  %v181_v9 = vld [vmem:[%s166_s22 + $0x38] sm:$0xff] }
  0x12   : > { %431 = vmatprep.mubr.msk.f32.mxu0 %vm191_vm0, %v176_v6  ;;  %437 = vmatprep.mubr.msk.f32.mxu1 %vm191_vm0, %v180_v7 }
  0x15   : > { %432 = vmatmul.mubr.msk.f32.gmra.mxu0 %vm191_vm0, %v177_v8  ;;  %438 = vmatmul.mubr.msk.f32.gmra.mxu1 %vm191_vm0, %v181_v9 }
  0xd1   : > { %v430_v11 = vpop.f32.mrf.mxu0  ;;  %v436_v12 = vpop.f32.mrf.mxu1 }
  0xd2   : > { %v288_v13 = vadd.f32 %v430_v11, %v403_v10  ;;  %v308_v14 = vadd.f32 %v436_v12, %v403_v10 }
  0xd3   : > { %v282_v15 = vpop.f32.mrf.mxu0  ;;  %v302_v16 = vpop.f32.mrf.mxu1 }
  0xd4   : > { %v322_v17 = vmax.f32 %v288_v13, 0.0  ;;  %v326_v18 = vmax.f32 %v308_v14, 0.0  ;;  %v283_v19 = vadd.f32 %v403_v10, %v282_v15  ;;  %v303_v20 = vadd.f32 %v403_v10, %v302_v16 }
  0xd5   : > { %v433_v21 = vpop.f32.mrf.mxu0  ;;  %v439_v22 = vpop.f32.mrf.mxu1 }
  0xd6   : > { %331 = vst.msk [vmem:[%s172_s27 + $0x8] sm:$0xff] %vm329_vm1, %v322_v17  ;;  %335 = vst.msk [vmem:[%s172_s27 + $0x28] sm:$0xff] %vm329_vm1, %v326_v18  ;;  %v321_v23 = vmax.f32 %v283_v19, 0.0  ;;  %v325_v24 = vmax.f32 %v303_v20, 0.0  ;;  %v298_v25 = vadd.f32 %v433_v21, %v403_v10  ;;  %v318_v26 = vadd.f32 %v439_v22, %v403_v10 }
  0xd7   : > { %v292_v27 = vpop.f32.mrf.mxu0  ;;  %v312_v28 = vpop.f32.mrf.mxu1 }
  0xd8   : > { %330 = vst.msk [vmem:[%s172_s27] sm:$0xff] %vm329_vm1, %v321_v23  ;;  %334 = vst.msk [vmem:[%s172_s27 + $0x20] sm:$0xff] %vm329_vm1, %v325_v24  ;;  %v324_v29 = vmax.f32 %v298_v25, 0.0  ;;  %v328_v30 = vmax.f32 %v318_v26, 0.0  ;;  %v293_v31 = vadd.f32 %v403_v10, %v292_v27  ;;  %v313_v32 = vadd.f32 %v403_v10, %v312_v28 }
  0xda   : > { %333 = vst.msk [vmem:[%s172_s27 + $0x18] sm:$0xff] %vm329_vm1, %v324_v29  ;;  %337 = vst.msk [vmem:[%s172_s27 + $0x38] sm:$0xff] %vm329_vm1, %v328_v30  ;;  %v323_v33 = vmax.f32 %v293_v31, 0.0  ;;  %v327_v34 = vmax.f32 %v313_v32, 0.0 }
  0xdc   : > { %332 = vst.msk [vmem:[%s172_s27 + $0x10] sm:$0xff] %vm329_vm1, %v323_v33  ;;  %336 = vst.msk [vmem:[%s172_s27 + $0x30] sm:$0xff] %vm329_vm1, %v327_v34 }
  0xdd PF: > { %s13_s12 = sadd.s32 1, %s458_s12  }
  0xde   : > { %p10_p4 = scmp.ge.s32.totalorder %s13_s12, 4  }
  0xe0   :  { %12 = sbr.rel (!%p10_p4) target bundleno = 1 (0x1), region = 62 }

// kernel: ynet_au_de_block_forward.3
= control target key start
LH: loop header
LB: loop body
LE: loop exit
PB: predicated region body
PF: predicated region fallthrough
CT: control target
= control target key end

     0   :  { %s4258_s18 = smov 0   ;;  %s7973_s0 = inlined_call_operand.vmem [shape: f32[2,16,16,8], index: 0, kind: input, shape index: {}]   ;;  %s7974_s1 = inlined_call_operand.vmem [shape: f32[72,8], index: 1, kind: input, shape index: {}]   ;;  %s7975_s2 = inlined_call_operand.vmem [shape: f32[1,8], index: 2, kind: input, shape index: {}]   ;;  %s7976_s3 = inlined_call_operand.vmem [shape: f32[72,8], index: 3, kind: input, shape index: {}]   ;;  %s7977_s4 = inlined_call_operand.vmem [shape: f32[1,8], index: 4, kind: input, shape index: {}]   ;;  %s7978_s5 = inlined_call_operand.vmem [shape: f32[2,256,8], index: 5, kind: output, shape index: {}]  }
   0x1 LB: > { %s3837_s19 = sadd.s32 4294967295, %s4217_s18   ;;  %p3841_p0 = scmp.ge.s32.totalorder %s4217_s18, 1  ;;  %s4217_s18 = sphi %s4258_s18, %s15_s18  }
   0x2   : > { %p187_p1 = scmp.lt.s32.totalorder %s4217_s18, 3 }
   0x4   : > { %p188_p2 = pnand %p3841_p0, %p187_p1 }
   0x6   : > { %191 = sbr.rel (%p188_p2) target bundleno = 1641 (0x669), region = 40 }
   0xb   : > { %vm225_vm0 = vcmask 64512   ;;  %vm228_vm1 = vcmask 58368   ;;  %p4268_p3 = scmp.lt.s32.totalorder %s3837_s19, 1  ;;  %v4219_v0 = vmov 0.0   ;;  %vm448_vm2 = vcmask 1046528   ;;  %s4220_s25 = smov 8  }
   0xc   : > { %226 = vst.msk [vmem:[#allocation2] sm:$0xff] %vm225_vm0, %v4219_v0  ;;  %227 = vst.msk [vmem:[#allocation2 + $0x8] sm:$0xff] %vm225_vm0, %v4219_v0  ;;  %vm625_vm3 = vcmask 1045504   ;;  %s4221_s26 = smov 16   ;;  %s4222_s27 = smov 24   ;;  %vm1436_vm4 = vcmask 130048  }
   0xd   : > { %230 = vst.msk [vmem:[#allocation2 + $0x18] sm:$0xff] %vm225_vm0, %v4219_v0  ;;  %231 = vst.msk [vmem:[#allocation2 + $0x20] sm:$0xff] %vm225_vm0, %v4219_v0  ;;  %s8794_s19 = smov (!%p4268_p3, %s3837_s19), 1  ;;  %s4223_s28 = smov 32   ;;  %vm1469_vm5 = vcmask 195584   ;;  %vm1502_vm6 = vcmask 261120  }
   0xe   : > { %233 = vst.msk [vmem:[#allocation2 + $0x30] sm:$0xff] %vm225_vm0, %v4219_v0  ;;  %234 = vst.msk [vmem:[#allocation2 + $0x38] sm:$0xff] %vm225_vm0, %v4219_v0  ;;  %s3914_s21 = sshll.u32 %s8794_s19, 8  ;;  %s4224_s29 = smov 40   ;;  %vm1535_vm7 = vcmask 326656   ;;  %vm1568_vm8 = vcmask 392192  }
   0xf   : > { %236 = vst.msk [vmem:[#allocation2 + $0x48] sm:$0xff] %vm225_vm0, %v4219_v0  ;;  %237 = vst.msk [vmem:[#allocation2 + $0x50] sm:$0xff] %vm225_vm0, %v4219_v0  ;;  %s4338_s24 = scalar_lea.vmem %s7973_s0, %s3914_s21  ;;  %s4225_s30 = smov 48   ;;  %vm1601_vm9 = vcmask 457728   ;;  %vm1634_vm10 = vcmask 523264   ;;  %vm1683_vm11 = vcmask 588800  }
  0x10   : > { %239 = vst.msk [vmem:[#allocation2 + $0x60] sm:$0xff] %vm225_vm0, %v4219_v0  ;;  %240 = vst.msk [vmem:[#allocation2 + $0x68] sm:$0xff] %vm225_vm0, %v4219_v0  ;;  %v281_v1 = vld [vmem:[%s4338_s24] sm:$0xff]  ;;  %v282_v2 = vld [vmem:[%s4338_s24 + $0x8] sm:$0xff]  ;;  %s4226_s6 = smov 56   ;;  %s4227_s10 = smov 64  }
  0x11   : > { %242 = vst.msk [vmem:[#allocation2 + $0x78] sm:$0xff] %vm225_vm0, %v4219_v0  ;;  %243 = vst.msk [vmem:[#allocation2 + $0x80] sm:$0xff] %vm225_vm0, %v4219_v0  ;;  %v283_v3 = vld [vmem:[%s4338_s24 + $0x10] sm:$0xff]  ;;  %v284_v4 = vld [vmem:[%s4338_s24 + $0x18] sm:$0xff] }
  0x12   : > { %245 = vst.msk [vmem:[#allocation2 + $0x90] sm:$0xff] %vm225_vm0, %v4219_v0  ;;  %246 = vst.msk [vmem:[#allocation2 + $0x98] sm:$0xff] %vm225_vm0, %v4219_v0  ;;  %v285_v5 = vld [vmem:[%s4338_s24 + $0x20] sm:$0xff]  ;;  %v286_v6 = vld [vmem:[%s4338_s24 + $0x28] sm:$0xff] }
  0x13   : > { %248 = vst.msk [vmem:[#allocation2 + $0xa8] sm:$0xff] %vm225_vm0, %v4219_v0  ;;  %249 = vst.msk [vmem:[#allocation2 + $0xb0] sm:$0xff] %vm225_vm0, %v4219_v0  ;;  %v4349_v7 = vld [vmem:[#allocation2] sm:$0xff]  ;;  %v4351_v8 = vld [vmem:[#allocation2 + $0x8] sm:$0xff] }
  0x14   : > { %251 = vst.msk [vmem:[#allocation2 + $0xc0] sm:$0xff] %vm225_vm0, %v4219_v0  ;;  %252 = vst.msk [vmem:[#allocation2 + $0xc8] sm:$0xff] %vm225_vm0, %v4219_v0  ;;  %v449_v10 = vrot.slane %v4349_v7, 1  ;;  %v450_v11 = vrot.slane %v4351_v8, 1  ;;  %v287_v13 = vld [vmem:[%s4338_s24 + $0x30] sm:$0xff]  ;;  %v288_v14 = vld [vmem:[%s4338_s24 + $0x38] sm:$0xff] }
  0x15   : > { %254 = vst.msk [vmem:[#allocation2 + $0xd8] sm:$0xff] %vm225_vm0, %v4219_v0  ;;  %255 = vst.msk [vmem:[#allocation2 + $0xe0] sm:$0xff] %vm225_vm0, %v4219_v0  ;;  %v289_v15 = vld [vmem:[%s4338_s24 + $0x40] sm:$0xff]  ;;  %v290_v16 = vld [vmem:[%s4338_s24 + $0x48] sm:$0xff] }
  0x16   : > { %257 = vst.msk [vmem:[#allocation2 + $0xf0] sm:$0xff] %vm225_vm0, %v4219_v0  ;;  %258 = vst.msk [vmem:[#allocation2 + $0xf8] sm:$0xff] %vm225_vm0, %v4219_v0  ;;  %v291_v17 = vld [vmem:[%s4338_s24 + $0x50] sm:$0xff]  ;;  %v292_v18 = vld [vmem:[%s4338_s24 + $0x58] sm:$0xff]  ;;  %v451_v19 = vsel %vm448_vm2, %v449_v10, %v450_v11 }
  0x17   : > { %260 = vst.msk [vmem:[#allocation2 + $0x108] sm:$0xff] %vm225_vm0, %v4219_v0  ;;  %261 = vst.msk [vmem:[#allocation2 + $0x110] sm:$0xff] %vm225_vm0, %v4219_v0  ;;  %v293_v20 = vld [vmem:[%s4338_s24 + $0x60] sm:$0xff]  ;;  %v294_v21 = vld [vmem:[%s4338_s24 + $0x68] sm:$0xff]  ;;  %529 = vrot.lane.b32.xlu0 %v451_v19, %s4220_s25 }
  0x18   : > { %263 = vst.msk [vmem:[#allocation2 + $0x120] sm:$0xff] %vm225_vm0, %v4219_v0  ;;  %264 = vst.msk [vmem:[#allocation2 + $0x128] sm:$0xff] %vm225_vm0, %v4219_v0  ;;  %v295_v22 = vld [vmem:[%s4338_s24 + $0x70] sm:$0xff]  ;;  %v296_v23 = vld [vmem:[%s4338_s24 + $0x78] sm:$0xff] }
  0x19   : > { %266 = vst.msk [vmem:[#allocation2 + $0x138] sm:$0xff] %vm225_vm0, %v4219_v0  ;;  %267 = vst.msk [vmem:[#allocation2 + $0x140] sm:$0xff] %vm225_vm0, %v4219_v0  ;;  %v297_v24 = vld [vmem:[%s4338_s24 + $0x80] sm:$0xff]  ;;  %v298_v25 = vld [vmem:[%s4338_s24 + $0x88] sm:$0xff] }
  0x1a   : > { %269 = vst.msk [vmem:[#allocation2 + $0x150] sm:$0xff] %vm225_vm0, %v4219_v0  ;;  %270 = vst.msk [vmem:[#allocation2 + $0x158] sm:$0xff] %vm225_vm0, %v4219_v0  ;;  %v299_v27 = vld [vmem:[%s4338_s24 + $0x90] sm:$0xff]  ;;  %v300_v28 = vld [vmem:[%s4338_s24 + $0x98] sm:$0xff] }
  0x1b   : > { %272 = vst.msk [vmem:[#allocation2 + $0x168] sm:$0xff] %vm225_vm0, %v4219_v0  ;;  %273 = vst.msk [vmem:[#allocation2 + $0x170] sm:$0xff] %vm225_vm0, %v4219_v0  ;;  %v301_v29 = vld [vmem:[%s4338_s24 + $0xa0] sm:$0xff]  ;;  %v302_v60 = vld [vmem:[%s4338_s24 + $0xa8] sm:$0xff] }
  0x1c   : > { %275 = vst.msk [vmem:[#allocation2 + $0x180] sm:$0xff] %vm225_vm0, %v4219_v0  ;;  %276 = vst.msk [vmem:[#allocation2 + $0x188] sm:$0xff] %vm225_vm0, %v4219_v0  ;;  %v306_v10 = vld [vmem:[%s4338_s24 + $0xc8] sm:$0xff] }
  0x1d   : > { %278 = vst.msk [vmem:[#allocation2 + $0x198] sm:$0xff] %vm225_vm0, %v4219_v0  ;;  %279 = vst.msk [vmem:[#allocation2 + $0x1a0] sm:$0xff] %vm225_vm0, %v4219_v0 }
  0x1e   : > { %229 = vst.msk [vmem:[#allocation2 + $0x10] sm:$0x3] %vm228_vm1, %v4219_v0  ;;  %232 = vst.msk [vmem:[#allocation2 + $0x28] sm:$0x3] %vm228_vm1, %v4219_v0 }
  0x1f   : > { %235 = vst.msk [vmem:[#allocation2 + $0x40] sm:$0x3] %vm228_vm1, %v4219_v0  ;;  %238 = vst.msk [vmem:[#allocation2 + $0x58] sm:$0x3] %vm228_vm1, %v4219_v0 }
  0x20   : > { %241 = vst.msk [vmem:[#allocation2 + $0x70] sm:$0x3] %vm228_vm1, %v4219_v0  ;;  %244 = vst.msk [vmem:[#allocation2 + $0x88] sm:$0x3] %vm228_vm1, %v4219_v0 }
  0x21   : > { %247 = vst.msk [vmem:[#allocation2 + $0xa0] sm:$0x3] %vm228_vm1, %v4219_v0  ;;  %250 = vst.msk [vmem:[#allocation2 + $0xb8] sm:$0x3] %vm228_vm1, %v4219_v0 }
  0x22   : > { %253 = vst.msk [vmem:[#allocation2 + $0xd0] sm:$0x3] %vm228_vm1, %v4219_v0  ;;  %256 = vst.msk [vmem:[#allocation2 + $0xe8] sm:$0x3] %vm228_vm1, %v4219_v0 }
  0x23   : > { %259 = vst.msk [vmem:[#allocation2 + $0x100] sm:$0x3] %vm228_vm1, %v4219_v0  ;;  %262 = vst.msk [vmem:[#allocation2 + $0x118] sm:$0x3] %vm228_vm1, %v4219_v0 }
  0x24   : > { %265 = vst.msk [vmem:[#allocation2 + $0x130] sm:$0x3] %vm228_vm1, %v4219_v0  ;;  %268 = vst.msk [vmem:[#allocation2 + $0x148] sm:$0x3] %vm228_vm1, %v4219_v0 }
  0x25   : > { %271 = vst.msk [vmem:[#allocation2 + $0x160] sm:$0x3] %vm228_vm1, %v4219_v0  ;;  %274 = vst.msk [vmem:[#allocation2 + $0x178] sm:$0x3] %vm228_vm1, %v4219_v0  ;;  %v4353_v9 = vld [vmem:[#allocation2 + $0x10] sm:$0x3] }
  0x26   : > { %277 = vst.msk [vmem:[#allocation2 + $0x190] sm:$0x3] %vm228_vm1, %v4219_v0  ;;  %280 = vst.msk [vmem:[#allocation2 + $0x1a8] sm:$0x3] %vm228_vm1, %v4219_v0  ;;  %v452_v12 = vrot.slane %v4353_v9, 1 }
  0x27   : > { %314 = vst.msk [vmem:[#allocation2 + $0x19] sm:$0xff] %vm225_vm0, %v281_v1  ;;  %315 = vst.msk [vmem:[#allocation2 + $0x21] sm:$0xff] %vm225_vm0, %v282_v2  ;;  %v303_v2 = vld [vmem:[%s4338_s24 + $0xb0] sm:$0xff] }
  0x28   : > { %316 = vst.msk [vmem:[#allocation2 + $0x31] sm:$0xff] %vm225_vm0, %v283_v3  ;;  %317 = vst.msk [vmem:[#allocation2 + $0x39] sm:$0xff] %vm225_vm0, %v284_v4  ;;  %v453_v26 = vsel %vm448_vm2, %v450_v11, %v452_v12  ;;  %v304_v3 = vld [vmem:[%s4338_s24 + $0xb8] sm:$0xff]  ;;  %v305_v4 = vld [vmem:[%s4338_s24 + $0xc0] sm:$0xff] }
  0x29   : > { %318 = vst.msk [vmem:[#allocation2 + $0x49] sm:$0xff] %vm225_vm0, %v285_v5  ;;  %319 = vst.msk [vmem:[#allocation2 + $0x51] sm:$0xff] %vm225_vm0, %v286_v6  ;;  %531 = vrot.lane.b32.xlu0 %v453_v26, %s4220_s25  ;;  %v307_v11 = vld [vmem:[%s4338_s24 + $0xd0] sm:$0xff]  ;;  %v308_v12 = vld [vmem:[%s4338_s24 + $0xd8] sm:$0xff] }
  0x2a   : > { %320 = vst.msk [vmem:[#allocation2 + $0x61] sm:$0xff] %vm225_vm0, %v287_v13  ;;  %321 = vst.msk [vmem:[#allocation2 + $0x69] sm:$0xff] %vm225_vm0, %v288_v14  ;;  %v309_v14 = vld [vmem:[%s4338_s24 + $0xe0] sm:$0xff] }
  0x2b   : > { %322 = vst.msk [vmem:[#allocation2 + $0x79] sm:$0xff] %vm225_vm0, %v289_v15  ;;  %323 = vst.msk [vmem:[#allocation2 + $0x81] sm:$0xff] %vm225_vm0, %v290_v16  ;;  %v310_v15 = vld [vmem:[%s4338_s24 + $0xe8] sm:$0xff] }
  0x2c   : > { %324 = vst.msk [vmem:[#allocation2 + $0x91] sm:$0xff] %vm225_vm0, %v291_v17  ;;  %325 = vst.msk [vmem:[#allocation2 + $0x99] sm:$0xff] %vm225_vm0, %v292_v18 }
  0x2d   : > { %326 = vst.msk [vmem:[#allocation2 + $0xa9] sm:$0xff] %vm225_vm0, %v293_v20  ;;  %327 = vst.msk [vmem:[#allocation2 + $0xb1] sm:$0xff] %vm225_vm0, %v294_v21 }
  0x2e   : > { %328 = vst.msk [vmem:[#allocation2 + $0xc1] sm:$0xff] %vm225_vm0, %v295_v22  ;;  %329 = vst.msk [vmem:[#allocation2 + $0xc9] sm:$0xff] %vm225_vm0, %v296_v23  ;;  %v4391_v30 = vld [vmem:[#allocation2 + $0x18] sm:$0xff]  ;;  %v4393_v31 = vld [vmem:[#allocation2 + $0x20] sm:$0xff] }
  0x2f   : > { %330 = vst.msk [vmem:[#allocation2 + $0xd9] sm:$0xff] %vm225_vm0, %v297_v24  ;;  %331 = vst.msk [vmem:[#allocation2 + $0xe1] sm:$0xff] %vm225_vm0, %v298_v25  ;;  %v4395_v32 = vld [vmem:[#allocation2 + $0x30] sm:$0xff]  ;;  %v454_v33 = vrot.slane %v4391_v30, 1  ;;  %v455_v34 = vrot.slane %v4393_v31, 1  ;;  %v4402_v35 = vld [vmem:[#allocation2 + $0x38] sm:$0xff] }
  0x30   : > { %332 = vst.msk [vmem:[#allocation2 + $0xf1] sm:$0xff] %vm225_vm0, %v299_v27  ;;  %333 = vst.msk [vmem:[#allocation2 + $0xf9] sm:$0xff] %vm225_vm0, %v300_v28  ;;  %v459_v36 = vrot.slane %v4395_v32, 1  ;;  %v4405_v37 = vld [vmem:[#allocation2 + $0x28] sm:$0x3]  ;;  %v460_v38 = vrot.slane %v4402_v35, 1 }
  0x31   : > { %334 = vst.msk [vmem:[#allocation2 + $0x109] sm:$0xff] %vm225_vm0, %v301_v29  ;;  %v457_v39 = vrot.slane %v4405_v37, 1  ;;  %v4410_v40 = vld [vmem:[#allocation2 + $0x48] sm:$0xff]  ;;  %v4412_v41 = vld [vmem:[#allocation2 + $0x50] sm:$0xff]  ;;  %v4414_v42 = vld [vmem:[#allocation2 + $0x40] sm:$0x3]  ;;  %v4417_v43 = vsel %vm448_vm2, %v454_v33, %v455_v34 }
  0x32   : > { %v464_v44 = vrot.slane %v4410_v40, 1  ;;  %v465_v45 = vrot.slane %v4412_v41, 1  ;;  %533 = vrot.lane.b32.xlu1 %v4417_v43, %s4220_s25  ;;  %v4424_v46 = vsel %vm448_vm2, %v459_v36, %v460_v38  ;;  %v4426_v47 = vld [vmem:[#allocation2 + $0x60] sm:$0xff]  ;;  %v4428_v48 = vld [vmem:[#allocation2 + $0x68] sm:$0xff]  ;;  %v462_v50 = vrot.slane %v4414_v42, 1  ;;  %v4445_v55 = vld [vmem:[#allocation2 + $0x78] sm:$0xff] }
  0x33   : > { %v4431_v49 = vsel %vm448_vm2, %v455_v34, %v457_v39  ;;  %537 = vrot.lane.b32.xlu0 %v4424_v46, %s4220_s25  ;;  %v4436_v51 = vld [vmem:[#allocation2 + $0x58] sm:$0x3]  ;;  %v469_v53 = vrot.slane %v4426_v47, 1  ;;  %v470_v54 = vrot.slane %v4428_v48, 1  ;;  %v4447_v56 = vld [vmem:[#allocation2 + $0x80] sm:$0xff]  ;;  %v474_v62 = vrot.slane %v4445_v55, 1 }
  0x34   : > { %v4439_v52 = vsel %vm448_vm2, %v464_v44, %v465_v45  ;;  %v4450_v57 = vsel %vm448_vm2, %v460_v38, %v462_v50  ;;  %v467_v58 = vrot.slane %v4436_v51, 1  ;;  %v4455_v59 = vld [vmem:[#allocation2 + $0x70] sm:$0x3]  ;;  %v475_v63 = vrot.slane %v4447_v56, 1  ;;  %v4465_v1 = vld [vmem:[#allocation2 + $0x98] sm:$0xff]  ;;  %335 = vst.msk [vmem:[#allocation2 + $0x111] sm:$0xff] %vm225_vm0, %v302_v60 }
  0x35   : > { %8147 = vst [vmem:[#allocation3_spill] sm:$0xff] %v4439_v52  ;;  %8148 = vst [vmem:[#allocation4_spill] sm:$0xff] %v4450_v57  ;;  %v4459_v61 = vsel %vm448_vm2, %v469_v53, %v470_v54  ;;  %v4463_v0 = vld [vmem:[#allocation2 + $0x90] sm:$0xff]  ;;  %v472_v6 = vrot.slane %v4455_v59, 1  ;;  %v4485_v13 = vld [vmem:[#allocation2 + $0x88] sm:$0x3] }
  0x36   : > { %535 = vrot.lane.b32.xlu1 %v4431_v49, %s4220_s25  ;;  %8149 = vst [vmem:[#allocation5_spill] sm:$0xff] %v4459_v61  ;;  %v4474_v5 = vsel %vm448_vm2, %v465_v45, %v467_v58  ;;  %336 = vst.msk [vmem:[#allocation2 + $0x121] sm:$0xff] %vm225_vm0, %v303_v2  ;;  %v4493_v16 = vsel %vm448_vm2, %v474_v62, %v475_v63  ;;  %v479_v17 = vrot.slane %v4463_v0, 1  ;;  %v480_v18 = vrot.slane %v4465_v1, 1  ;;  %v4501_v19 = vld [vmem:[#allocation2 + $0xa8] sm:$0xff]  ;;  %v4503_v20 = vld [vmem:[#allocation2 + $0xb0] sm:$0xff] }
  0x37   : > { %541 = vrot.lane.b32.xlu0 %v4439_v52, %s4220_s25  ;;  %8150 = vst [vmem:[#allocation6_spill] sm:$0xff] %v4474_v5  ;;  %337 = vst.msk [vmem:[#allocation2 + $0x129] sm:$0xff] %vm225_vm0, %v304_v3  ;;  %v4506_v21 = vsel %vm448_vm2, %v470_v54, %v472_v6  ;;  %v477_v22 = vrot.slane %v4485_v13, 1  ;;  %v4511_v23 = vld [vmem:[#allocation2 + $0xa0] sm:$0x3]  ;;  %v484_v25 = vrot.slane %v4501_v19, 1 }
  0x38   : > { %338 = vst.msk [vmem:[#allocation2 + $0x139] sm:$0xff] %vm225_vm0, %v305_v4  ;;  %339 = vst.msk [vmem:[#allocation2 + $0x141] sm:$0xff] %vm225_vm0, %v306_v10  ;;  %v4514_v24 = vsel %vm448_vm2, %v479_v17, %v480_v18  ;;  %v485_v26 = vrot.slane %v4503_v20, 1  ;;  %v4520_v27 = vld [vmem:[#allocation2 + $0xc0] sm:$0xff]  ;;  %v4522_v28 = vld [vmem:[#allocation2 + $0xc8] sm:$0xff]  ;;  %v482_v33 = vrot.slane %v4511_v23, 1 }
  0x39   : > { %340 = vst.msk [vmem:[#allocation2 + $0x151] sm:$0xff] %vm225_vm0, %v307_v11  ;;  %341 = vst.msk [vmem:[#allocation2 + $0x159] sm:$0xff] %vm225_vm0, %v308_v12  ;;  %v4525_v29 = vsel %vm448_vm2, %v475_v63, %v477_v22  ;;  %v4530_v34 = vld [vmem:[#allocation2 + $0xb8] sm:$0x3]  ;;  %v489_v38 = vrot.slane %v4520_v27, 1  ;;  %v490_v39 = vrot.slane %v4522_v28, 1 }
  0x3a   : > { %539 = vrot.lane.b32.xlu1 %v4450_v57, %s4220_s25  ;;  %8151 = vst [vmem:[#allocation7_spill] sm:$0xff] %v4493_v16  ;;  %342 = vst.msk [vmem:[#allocation2 + $0x169] sm:$0xff] %vm225_vm0, %v309_v14  ;;  %v4533_v36 = vsel %vm448_vm2, %v484_v25, %v485_v26  ;;  %v4539_v44 = vld [vmem:[#allocation2 + $0xd8] sm:$0xff]  ;;  %v4541_v45 = vld [vmem:[#allocation2 + $0xe0] sm:$0xff]  ;;  %v4544_v50 = vsel %vm448_vm2, %v480_v18, %v482_v33  ;;  %v487_v53 = vrot.slane %v4530_v34, 1  ;;  %v627_v57 = vrot.slane %v4351_v8, 2 }
  0x3b   : > { %545 = vrot.lane.b32.xlu0 %v4459_v61, %s4220_s25  ;;  %343 = vst.msk [vmem:[#allocation2 + $0x171] sm:$0xff] %vm225_vm0, %v310_v15  ;;  %8152 = vst [vmem:[#allocation8_spill] sm:$0xff] %v4506_v21  ;;  %v4549_v54 = vld [vmem:[#allocation2 + $0xd0] sm:$0x3]  ;;  %v4552_v58 = vsel %vm448_vm2, %v489_v38, %v490_v39  ;;  %v494_v60 = vrot.slane %v4539_v44, 1  ;;  %v495_v62 = vrot.slane %v4541_v45, 1 }
  0x3c   : > { %8153 = vst [vmem:[#allocation9_spill] sm:$0xff] %v4514_v24  ;;  %8154 = vst [vmem:[#allocation10_spill] sm:$0xff] %v4525_v29  ;;  %v4558_v63 = vld [vmem:[#allocation2 + $0xf0] sm:$0xff]  ;;  %v4560_v2 = vld [vmem:[#allocation2 + $0xf8] sm:$0xff]  ;;  %v4563_v3 = vsel %vm448_vm2, %v485_v26, %v487_v53  ;;  %v492_v4 = vrot.slane %v4549_v54, 1  ;;  %v632_v8 = vrot.slane %v4393_v31, 2 }
  0x3d   : > { %8155 = vst [vmem:[#allocation11_spill] sm:$0xff] %v4533_v36  ;;  %8156 = vst [vmem:[#allocation12_spill] sm:$0xff] %v4544_v50  ;;  %v4568_v6 = vld [vmem:[#allocation2 + $0xe8] sm:$0x3]  ;;  %v4571_v10 = vsel %vm448_vm2, %v494_v60, %v495_v62  ;;  %v499_v11 = vrot.slane %v4558_v63, 1  ;;  %v500_v12 = vrot.slane %v4560_v2, 1 }
  0x3e   : > { %543 = vrot.lane.b32.xlu1 %v4474_v5, %s4220_s25  ;;  %8157 = vst [vmem:[#allocation13_spill] sm:$0xff] %v4552_v58  ;;  %8158 = vst [vmem:[#allocation14_spill] sm:$0xff] %v4563_v3  ;;  %v4577_v14 = vld [vmem:[#allocation2 + $0x108] sm:$0xff]  ;;  %v4579_v15 = vld [vmem:[#allocation2 + $0x110] sm:$0xff]  ;;  %v4582_v17 = vsel %vm448_vm2, %v490_v39, %v492_v4  ;;  %v497_v18 = vrot.slane %v4568_v6, 1 }
  0x3f   : > { %549 = vrot.lane.b32.xlu0 %v4493_v16, %s4220_s25  ;;  %8159 = vst [vmem:[#allocation15_spill] sm:$0xff] %v4571_v10  ;;  %8160 = vst [vmem:[#allocation16_spill] sm:$0xff] %v4582_v17  ;;  %v4587_v22 = vld [vmem:[#allocation2 + $0x100] sm:$0x3]  ;;  %v4590_v25 = vsel %vm448_vm2, %v499_v11, %v500_v12  ;;  %v504_v26 = vrot.slane %v4577_v14, 1  ;;  %v505_v33 = vrot.slane %v4579_v15, 1 }
  0x40   : > { %8161 = vst [vmem:[#allocation17_spill] sm:$0xff] %v4590_v25  ;;  %v4596_v38 = vld [vmem:[#allocation2 + $0x120] sm:$0xff]  ;;  %v4598_v39 = vld [vmem:[#allocation2 + $0x128] sm:$0xff]  ;;  %v4601_v53 = vsel %vm448_vm2, %v495_v62, %v497_v18  ;;  %v502_v60 = vrot.slane %v4587_v22, 1  ;;  %v4606_v4 = vld [vmem:[#allocation2 + $0x118] sm:$0x3] }
  0x41   : > { %8162 = vst [vmem:[#allocation18_spill] sm:$0xff] %v4601_v53  ;;  %v4609_v11 = vsel %vm448_vm2, %v504_v26, %v505_v33  ;;  %v4617_v62 = vld [vmem:[#allocation2 + $0x140] sm:$0xff]  ;;  %v4625_v26 = vld [vmem:[#allocation2 + $0x130] sm:$0x3]  ;;  %v312_v52 = vld [vmem:[%s4338_s24 + $0xf8] sm:$0xff] }
  0x42   : > { %547 = vrot.lane.b32.xlu1 %v4506_v21, %s4220_s25  ;;  %8163 = vst [vmem:[#allocation19_spill] sm:$0xff] %v4609_v11  ;;  %v4620_v18 = vsel %vm448_vm2, %v500_v12, %v502_v60  ;;  %v4634_v12 = vld [vmem:[#allocation2 + $0x150] sm:$0xff]  ;;  %v4636_v60 = vld [vmem:[#allocation2 + $0x158] sm:$0xff]  ;;  %v4653_v21 = vld [vmem:[#allocation2 + $0x168] sm:$0xff] }
  0x43   : > { %553 = vrot.lane.b32.xlu0 %v4514_v24, %s4220_s25  ;;  %8164 = vst [vmem:[#allocation20_spill] sm:$0xff] %v4620_v18  ;;  %v519_v24 = vrot.slane %v4634_v12, 1  ;;  %v311_v16 = vld [vmem:[%s4338_s24 + $0xf0] sm:$0xff]  ;;  %v524_v5 = vrot.slane %v4653_v21, 1  ;;  %345 = vst.msk [vmem:[#allocation2 + $0x189] sm:$0xff] %vm225_vm0, %v312_v52  ;;  %v629_v52 = vrot.slane %v4353_v9, 2 }
  0x44   : > { %344 = vst.msk [vmem:[#allocation2 + $0x181] sm:$0xff] %vm225_vm0, %v311_v16 }
  0x46   : > { %551 = vrot.lane.b32.xlu1 %v4525_v29, %s4220_s25 }
  0x47   : > { %557 = vrot.lane.b32.xlu0 %v4533_v36, %s4220_s25 }
  0x4a   : > { %555 = vrot.lane.b32.xlu1 %v4544_v50, %s4220_s25 }
  0x4b   : > { %561 = vrot.lane.b32.xlu0 %v4552_v58, %s4220_s25 }
  0x4e   : > { %559 = vrot.lane.b32.xlu1 %v4563_v3, %s4220_s25  ;;  %v4615_v3 = vld [vmem:[#allocation2 + $0x138] sm:$0xff] }
  0x4f   : > { %565 = vrot.lane.b32.xlu0 %v4571_v10, %s4220_s25  ;;  %v509_v10 = vrot.slane %v4596_v38, 1  ;;  %v514_v50 = vrot.slane %v4615_v3, 1 }
  0x52   : > { %563 = vrot.lane.b32.xlu1 %v4582_v17, %s4220_s25  ;;  %v510_v17 = vrot.slane %v4598_v39, 1 }
  0x53   : > { %569 = vrot.lane.b32.xlu0 %v4590_v25, %s4220_s25  ;;  %v507_v25 = vrot.slane %v4606_v4, 1 }
  0x54   : > { %v4628_v58 = vsel %vm448_vm2, %v509_v10, %v510_v17  ;;  %v4644_v10 = vld [vmem:[#allocation2 + $0x148] sm:$0x3] }
  0x55   : > { %8165 = vst [vmem:[#allocation21_spill] sm:$0xff] %v4628_v58  ;;  %v4639_v36 = vsel %vm448_vm2, %v505_v33, %v507_v25  ;;  %v4655_v25 = vld [vmem:[#allocation2 + $0x170] sm:$0xff] }
  0x56   : > { %567 = vrot.lane.b32.xlu1 %v4601_v53, %s4220_s25  ;;  %v515_v53 = vrot.slane %v4617_v62, 1  ;;  %8166 = vst [vmem:[#allocation22_spill] sm:$0xff] %v4639_v36  ;;  %v525_v61 = vrot.slane %v4655_v25, 1 }
  0x57   : > { %573 = vrot.lane.b32.xlu0 %v4609_v11, %s4220_s25  ;;  %v512_v11 = vrot.slane %v4625_v26, 1 }
  0x58   : > { %v4647_v29 = vsel %vm448_vm2, %v514_v50, %v515_v53  ;;  %v4664_v50 = vld [vmem:[#allocation2 + $0x160] sm:$0x3]  ;;  %v4683_v16 = vsel %vm448_vm2, %v524_v5, %v525_v61 }
  0x59   : > { %8167 = vst [vmem:[#allocation23_spill] sm:$0xff] %v4647_v29  ;;  %v4658_v33 = vsel %vm448_vm2, %v510_v17, %v512_v11  ;;  %v522_v11 = vrot.slane %v4664_v50, 1  ;;  %8171 = vst [vmem:[#allocation27_spill] sm:$0xff] %v4683_v16 }
  0x5a   : > { %571 = vrot.lane.b32.xlu1 %v4620_v18, %s4220_s25  ;;  %v520_v18 = vrot.slane %v4636_v60, 1  ;;  %8168 = vst [vmem:[#allocation24_spill] sm:$0xff] %v4658_v33 }
  0x5b   : > { %577 = vrot.lane.b32.xlu0 %v4628_v58, %s4220_s25  ;;  %v517_v58 = vrot.slane %v4644_v10, 1 }
  0x5d   : > { %v4675_v17 = vsel %vm448_vm2, %v515_v53, %v517_v58  ;;  %v4692_v58 = vsel %vm448_vm2, %v520_v18, %v522_v11  ;;  %v636_v11 = vrot.slane %v4395_v32, 2 }
  0x5e   : > { %575 = vrot.lane.b32.xlu1 %v4639_v36, %s4220_s25  ;;  %v4668_v36 = vsel %vm448_vm2, %v519_v24, %v520_v18  ;;  %8170 = vst [vmem:[#allocation26_spill] sm:$0xff] %v4675_v17  ;;  %v626_v24 = vrot.slane %v4349_v7, 2  ;;  %8172 = vst [vmem:[#allocation28_spill] sm:$0xff] %v4692_v58  ;;  %v631_v7 = vrot.slane %v4391_v30, 2 }
  0x5f   : > { %581 = vrot.lane.b32.xlu0 %v4647_v29, %s4220_s25  ;;  %8169 = vst [vmem:[#allocation25_spill] sm:$0xff] %v4668_v36  ;;  %v4680_v29 = vld [vmem:[#allocation2 + $0x178] sm:$0x3] }
  0x60   : > { %v527_v53 = vrot.slane %v4680_v29, 1  ;;  %v628_v5 = vsel %vm625_vm3, %v626_v24, %v627_v57  ;;  %v4708_v18 = vsel %vm625_vm3, %v631_v7, %v632_v8  ;;  %v637_v24 = vrot.slane %v4402_v35, 2 }
  0x62   : > { %579 = vrot.lane.b32.xlu1 %v4658_v33, %s4220_s25  ;;  %v4719_v9 = vsel %vm625_vm3, %v636_v11, %v637_v24  ;;  %v651_v11 = vrot.slane %v4445_v55, 2 }
  0x63   : > { %585 = vrot.lane.b32.xlu0 %v4668_v36, %s4220_s25 }
  0x66   : > { %583 = vrot.lane.b32.xlu1 %v4675_v17, %s4220_s25  ;;  %v4703_v17 = vsel %vm448_vm2, %v525_v61, %v527_v53  ;;  %v634_v61 = vrot.slane %v4405_v37, 2  ;;  %v641_v53 = vrot.slane %v4410_v40, 2 }
  0x67   : > { %589 = vrot.lane.b32.xlu0 %v4683_v16, %s4220_s25  ;;  %8173 = vst [vmem:[#allocation29_spill] sm:$0xff] %v4703_v17 }
  0x68   : > { %v4725_v7 = vsel %vm625_vm3, %v632_v8, %v634_v61  ;;  %v644_v8 = vrot.slane %v4436_v51, 2  ;;  %v652_v61 = vrot.slane %v4447_v56, 2 }
  0x6a   : > { %587 = vrot.lane.b32.xlu1 %v4692_v58, %s4220_s25  ;;  %v630_v58 = vsel %vm625_vm3, %v627_v57, %v629_v52  ;;  %v646_v57 = vrot.slane %v4426_v47, 2  ;;  %v647_v52 = vrot.slane %v4428_v48, 2  ;;  %v4757_v51 = vsel %vm625_vm3, %v651_v11, %v652_v61 }
  0x6b   : > { %706 = vrot.lane.b32.xlu0 %v628_v5, %s4221_s26  ;;  %v642_v5 = vrot.slane %v4412_v41, 2  ;;  %v662_v11 = vrot.slane %v4503_v20, 2 }
  0x6d   : > { %v4731_v37 = vsel %vm625_vm3, %v641_v53, %v642_v5  ;;  %v4751_v53 = vsel %vm625_vm3, %v642_v5, %v644_v8  ;;  %v654_v5 = vrot.slane %v4485_v13, 2  ;;  %v661_v8 = vrot.slane %v4501_v19, 2 }
  0x6e   : > { %591 = vrot.lane.b32.xlu1 %v4703_v17, %s4220_s25  ;;  %v639_v17 = vrot.slane %v4414_v42, 2  ;;  %v4744_v42 = vsel %vm625_vm3, %v646_v57, %v647_v52  ;;  %8175 = vst [vmem:[#allocation31_spill] sm:$0xff] %v4751_v53  ;;  %v657_v57 = vrot.slane %v4465_v1, 2 }
  0x6f   : > { %710 = vrot.lane.b32.xlu0 %v4708_v18, %s4221_s26  ;;  %v4783_v13 = vsel %vm625_vm3, %v661_v8, %v662_v11  ;;  %v672_v8 = vrot.slane %v4541_v45, 2 }
  0x70   : > { %8178 = vst [vmem:[#allocation34_spill] sm:$0xff] %v4783_v13 }
  0x72   : > { %708 = vrot.lane.b32.xlu1 %v630_v58, %s4221_s26  ;;  %v4738_v58 = vsel %vm625_vm3, %v637_v24, %v639_v17  ;;  %v649_v17 = vrot.slane %v4455_v59, 2  ;;  %v656_v24 = vrot.slane %v4463_v0, 2 }
  0x73   : > { %714 = vrot.lane.b32.xlu0 %v4719_v9, %s4221_s26  ;;  %8174 = vst [vmem:[#allocation30_spill] sm:$0xff] %v4738_v58 }
  0x74   : > { %v4770_v59 = vsel %vm625_vm3, %v656_v24, %v657_v57  ;;  %v667_v24 = vrot.slane %v4522_v28, 2 }
  0x76   : > { %712 = vrot.lane.b32.xlu1 %v4725_v7, %s4221_s26 }
  0x77   : > { %718 = vrot.lane.b32.xlu0 %v4731_v37, %s4221_s26 }
  0x7a   : > { %716 = vrot.lane.b32.xlu1 %v4738_v58, %s4221_s26  ;;  %v4764_v58 = vsel %vm625_vm3, %v647_v52, %v649_v17  ;;  %v659_v52 = vrot.slane %v4511_v23, 2  ;;  %v666_v17 = vrot.slane %v4520_v27, 2 }
  0x7b   : > { %722 = vrot.lane.b32.xlu0 %v4744_v42, %s4221_s26  ;;  %8176 = vst [vmem:[#allocation32_spill] sm:$0xff] %v4764_v58 }
  0x7c   : > { %v4796_v23 = vsel %vm625_vm3, %v666_v17, %v667_v24  ;;  %v677_v17 = vrot.slane %v4560_v2, 2 }
  0x7d   : > { %8180 = vst [vmem:[#allocation36_spill] sm:$0xff] %v4796_v23 }
  0x7e   : > { %720 = vrot.lane.b32.xlu1 %v4751_v53, %s4221_s26  ;;  %v4777_v53 = vsel %vm625_vm3, %v652_v61, %v654_v5  ;;  %v664_v61 = vrot.slane %v4530_v34, 2  ;;  %v671_v5 = vrot.slane %v4539_v44, 2 }
  0x7f   : > { %726 = vrot.lane.b32.xlu0 %v4757_v51, %s4221_s26  ;;  %8177 = vst [vmem:[#allocation33_spill] sm:$0xff] %v4777_v53 }
  0x80   : > { %v4809_v34 = vsel %vm625_vm3, %v671_v5, %v672_v8  ;;  %v682_v5 = vrot.slane %v4579_v15, 2 }
  0x81   : > { %8182 = vst [vmem:[#allocation38_spill] sm:$0xff] %v4809_v34 }
  0x82   : > { %724 = vrot.lane.b32.xlu1 %v4764_v58, %s4221_s26  ;;  %v4790_v58 = vsel %vm625_vm3, %v657_v57, %v659_v52  ;;  %v669_v57 = vrot.slane %v4549_v54, 2  ;;  %v676_v52 = vrot.slane %v4558_v63, 2 }
  0x83   : > { %730 = vrot.lane.b32.xlu0 %v4770_v59, %s4221_s26  ;;  %8179 = vst [vmem:[#allocation35_spill] sm:$0xff] %v4790_v58 }
  0x84   : > { %v4822_v54 = vsel %vm625_vm3, %v676_v52, %v677_v17  ;;  %v687_v52 = vrot.slane %v4598_v39, 2 }
  0x85   : > { %8184 = vst [vmem:[#allocation40_spill] sm:$0xff] %v4822_v54 }
  0x86   : > { %728 = vrot.lane.b32.xlu1 %v4777_v53, %s4221_s26  ;;  %v4803_v53 = vsel %vm625_vm3, %v662_v11, %v664_v61  ;;  %v674_v11 = vrot.slane %v4568_v6, 2  ;;  %v681_v61 = vrot.slane %v4577_v14, 2 }
  0x87   : > { %734 = vrot.lane.b32.xlu0 %v4783_v13, %s4221_s26  ;;  %8181 = vst [vmem:[#allocation37_spill] sm:$0xff] %v4803_v53 }
  0x88   : > { %v4835_v6 = vsel %vm625_vm3, %v681_v61, %v682_v5  ;;  %v692_v61 = vrot.slane %v4617_v62, 2 }
  0x89   : > { %8186 = vst [vmem:[#allocation42_spill] sm:$0xff] %v4835_v6 }
  0x8a   : > { %732 = vrot.lane.b32.xlu1 %v4790_v58, %s4221_s26  ;;  %v4816_v58 = vsel %vm625_vm3, %v667_v24, %v669_v57  ;;  %v679_v24 = vrot.slane %v4587_v22, 2  ;;  %v686_v57 = vrot.slane %v4596_v38, 2 }
  0x8b   : > { %738 = vrot.lane.b32.xlu0 %v4796_v23, %s4221_s26  ;;  %8183 = vst [vmem:[#allocation39_spill] sm:$0xff] %v4816_v58 }
  0x8c   : > { %v4848_v22 = vsel %vm625_vm3, %v686_v57, %v687_v52  ;;  %v697_v57 = vrot.slane %v4636_v60, 2 }
  0x8d   : > { %8188 = vst [vmem:[#allocation44_spill] sm:$0xff] %v4848_v22 }
  0x8e   : > { %736 = vrot.lane.b32.xlu1 %v4803_v53, %s4221_s26  ;;  %v4829_v53 = vsel %vm625_vm3, %v672_v8, %v674_v11  ;;  %v684_v8 = vrot.slane %v4606_v4, 2  ;;  %v691_v11 = vrot.slane %v4615_v3, 2 }
  0x8f   : > { %742 = vrot.lane.b32.xlu0 %v4809_v34, %s4221_s26  ;;  %8185 = vst [vmem:[#allocation41_spill] sm:$0xff] %v4829_v53 }
  0x90   : > { %v4861_v4 = vsel %vm625_vm3, %v691_v11, %v692_v61  ;;  %v701_v11 = vrot.slane %v4653_v21, 2 }
  0x92   : > { %740 = vrot.lane.b32.xlu1 %v4816_v58, %s4221_s26  ;;  %v4842_v58 = vsel %vm625_vm3, %v677_v17, %v679_v24  ;;  %v689_v17 = vrot.slane %v4625_v26, 2  ;;  %v696_v24 = vrot.slane %v4634_v12, 2  ;;  %v694_v26 = vrot.slane %v4644_v10, 2 }
  0x93   : > { %746 = vrot.lane.b32.xlu0 %v4822_v54, %s4221_s26  ;;  %8187 = vst [vmem:[#allocation43_spill] sm:$0xff] %v4842_v58  ;;  %v699_v10 = vrot.slane %v4664_v50, 2 }
  0x96   : > { %744 = vrot.lane.b32.xlu1 %v4829_v53, %s4221_s26  ;;  %v4855_v53 = vsel %vm625_vm3, %v682_v5, %v684_v8  ;;  %v4870_v5 = vsel %vm625_vm3, %v687_v52, %v689_v17  ;;  %v4876_v8 = vsel %vm625_vm3, %v696_v24, %v697_v57  ;;  %v4885_v52 = vsel %vm625_vm3, %v692_v61, %v694_v26 }
  0x97   : > { %750 = vrot.lane.b32.xlu0 %v4835_v6, %s4221_s26  ;;  %v4865_v6 = vpop.permute.xlu0 %529  ;;  %8190 = vst [vmem:[#allocation46_spill] sm:$0xff] %v4876_v8  ;;  %8192 = vst [vmem:[#allocation48_spill] sm:$0xff] %v4885_v52  ;;  %v704_v61 = vrot.slane %v4680_v29, 2 }
  0x98   : > { %8189 = vst [vmem:[#allocation45_spill] sm:$0xff] %v4865_v6 }
  0x9a   : > { %748 = vrot.lane.b32.xlu1 %v4842_v58, %s4221_s26 }
  0x9b   : > { %754 = vrot.lane.b32.xlu0 %v4848_v22, %s4221_s26  ;;  %v702_v22 = vrot.slane %v4655_v25, 2  ;;  %v4880_v58 = vpop.permute.xlu0 %531 }
  0x9c   : > { %8191 = vst [vmem:[#allocation47_spill] sm:$0xff] %v4880_v58  ;;  %v4900_v58 = vsel %vm625_vm3, %v697_v57, %v699_v10 }
  0x9d   : > { %v4893_v24 = vsel %vm625_vm3, %v701_v11, %v702_v22  ;;  %v4912_v11 = vsel %vm625_vm3, %v702_v22, %v704_v61 }
  0x9e   : > { %752 = vrot.lane.b32.xlu1 %v4855_v53, %s4221_s26 }
  0x9f   : > { %758 = vrot.lane.b32.xlu0 %v4861_v4, %s4221_s26 }
  0xa2   : > { %756 = vrot.lane.b32.xlu1 %v4870_v5, %s4221_s26 }
  0xa3   : > { %762 = vrot.lane.b32.xlu0 %v4876_v8, %s4221_s26 }
  0xa4   : > { %v4890_v17 = vpop.permute.xlu1 %533 }
  0xa5   : > { %8193 = vst [vmem:[#allocation49_spill] sm:$0xff] %v4890_v17  ;;  %v4895_v6 = vpop.permute.xlu0 %537  ;;  %v8245_v17 = vld [vmem:[#allocation9_spill] sm:$0xff] }
  0xa6   : > { %8194 = vst [vmem:[#allocation50_spill] sm:$0xff] %v4895_v6  ;;  %760 = vrot.lane.b32.xlu1 %v4885_v52, %s4221_s26 }
  0xa7   : > { %766 = vrot.lane.b32.xlu0 %v4893_v24, %s4221_s26 }
  0xa8   : > { %v4905_v50 = vpop.permute.xlu1 %535 }
  0xa9   : > { %8195 = vst [vmem:[#allocation51_spill] sm:$0xff] %v4905_v50  ;;  %v4907_v26 = vpop.permute.xlu0 %541  ;;  %v8233_v50 = vld [vmem:[#allocation3_spill] sm:$0xff] }
  0xaa   : > { %8196 = vst [vmem:[#allocation52_spill] sm:$0xff] %v4907_v26  ;;  %764 = vrot.lane.b32.xlu1 %v4900_v58, %s4221_s26 }
  0xab   : > { %804 = vrot.lane.b32.xlu0 %v4391_v30, %s4222_s27 }
  0xac   : > { %v4916_v57 = vpop.permute.xlu1 %539 }
  0xad   : > { %8197 = vst [vmem:[#allocation53_spill] sm:$0xff] %v4916_v57  ;;  %v4918_v29 = vpop.permute.xlu0 %545  ;;  %v5044_v57 = vld [vmem:[#allocation2 + $0x188] sm:$0xff] }
  0xae   : > { %8198 = vst [vmem:[#allocation54_spill] sm:$0xff] %v4918_v29  ;;  %768 = vrot.lane.b32.xlu1 %v4912_v11, %s4221_s26 }
  0xaf   : > { %808 = vrot.lane.b32.xlu0 %v4395_v32, %s4222_s27 }
  0xb0   : > { %v4924_v10 = vpop.permute.xlu1 %543 }
  0xb1   : > { %8199 = vst [vmem:[#allocation55_spill] sm:$0xff] %v4924_v10  ;;  %v4926_v26 = vpop.permute.xlu0 %549 }
  0xb2   : > { %8200 = vst [vmem:[#allocation56_spill] sm:$0xff] %v4926_v26  ;;  %806 = vrot.lane.b32.xlu1 %v4393_v31, %s4222_s27 }
  0xb3   : > { %812 = vrot.lane.b32.xlu0 %v4410_v40, %s4222_s27 }
  0xb4   : > { %v4932_v30 = vpop.permute.xlu1 %547 }
  0xb5   : > { %8201 = vst [vmem:[#allocation57_spill] sm:$0xff] %v4932_v30  ;;  %v4934_v22 = vpop.permute.xlu0 %553 }
  0xb6   : > { %8202 = vst [vmem:[#allocation58_spill] sm:$0xff] %v4934_v22  ;;  %810 = vrot.lane.b32.xlu1 %v4402_v35, %s4222_s27 }
  0xb7   : > { %816 = vrot.lane.b32.xlu0 %v4426_v47, %s4222_s27 }
  0xb8   : > { %v4940_v61 = vpop.permute.xlu1 %551 }
  0xb9   : > { %8203 = vst [vmem:[#allocation59_spill] sm:$0xff] %v4940_v61  ;;  %v4942_v10 = vpop.permute.xlu0 %557 }
  0xba   : > { %8204 = vst [vmem:[#allocation60_spill] sm:$0xff] %v4942_v10  ;;  %814 = vrot.lane.b32.xlu1 %v4412_v41, %s4222_s27 }
  0xbb   : > { %820 = vrot.lane.b32.xlu0 %v4445_v55, %s4222_s27 }
  0xbc   : > { %v4948_v31 = vpop.permute.xlu1 %555 }
  0xbd   : > { %8205 = vst [vmem:[#allocation61_spill] sm:$0xff] %v4948_v31  ;;  %v4950_v30 = vpop.permute.xlu0 %561 }
  0xbe   : > { %8206 = vst [vmem:[#allocation62_spill] sm:$0xff] %v4950_v30  ;;  %818 = vrot.lane.b32.xlu1 %v4428_v48, %s4222_s27 }
  0xbf   : > { %824 = vrot.lane.b32.xlu0 %v4463_v0, %s4222_s27 }
  0xc0   : > { %v4956_v22 = vpop.permute.xlu1 %559 }
  0xc1   : > { %8207 = vst [vmem:[#allocation63_spill] sm:$0xff] %v4956_v22  ;;  %v4958_v61 = vpop.permute.xlu0 %565 }
  0xc2   : > { %8208 = vst [vmem:[#allocation64_spill] sm:$0xff] %v4958_v61  ;;  %822 = vrot.lane.b32.xlu1 %v4447_v56, %s4222_s27 }
  0xc3   : > { %828 = vrot.lane.b32.xlu0 %v4501_v19, %s4222_s27 }
  0xc4   : > { %v4964_v10 = vpop.permute.xlu1 %563 }
  0xc5   : > { %8209 = vst [vmem:[#allocation65_spill] sm:$0xff] %v4964_v10  ;;  %v4966_v31 = vpop.permute.xlu0 %569 }
  0xc6   : > { %8210 = vst [vmem:[#allocation66_spill] sm:$0xff] %v4966_v31  ;;  %826 = vrot.lane.b32.xlu1 %v4465_v1, %s4222_s27 }
  0xc7   : > { %832 = vrot.lane.b32.xlu0 %v4520_v27, %s4222_s27 }
  0xc8   : > { %v4972_v30 = vpop.permute.xlu1 %567 }
  0xc9   : > { %8211 = vst [vmem:[#allocation67_spill] sm:$0xff] %v4972_v30  ;;  %v4974_v22 = vpop.permute.xlu0 %573 }
  0xca   : > { %8212 = vst [vmem:[#allocation68_spill] sm:$0xff] %v4974_v22  ;;  %830 = vrot.lane.b32.xlu1 %v4503_v20, %s4222_s27 }
  0xcb   : > { %836 = vrot.lane.b32.xlu0 %v4539_v44, %s4222_s27 }
  0xcc   : > { %v4980_v61 = vpop.permute.xlu1 %571 }
  0xcd   : > { %8213 = vst [vmem:[#allocation69_spill] sm:$0xff] %v4980_v61  ;;  %v4982_v10 = vpop.permute.xlu0 %577 }
  0xce   : > { %8214 = vst [vmem:[#allocation70_spill] sm:$0xff] %v4982_v10  ;;  %834 = vrot.lane.b32.xlu1 %v4522_v28, %s4222_s27 }
  0xcf   : > { %840 = vrot.lane.b32.xlu0 %v4558_v63, %s4222_s27 }
  0xd0   : > { %v4988_v31 = vpop.permute.xlu1 %575 }
  0xd1   : > { %8215 = vst [vmem:[#allocation71_spill] sm:$0xff] %v4988_v31  ;;  %v4990_v30 = vpop.permute.xlu0 %581 }
  0xd2   : > { %8216 = vst [vmem:[#allocation72_spill] sm:$0xff] %v4990_v30  ;;  %838 = vrot.lane.b32.xlu1 %v4541_v45, %s4222_s27 }
  0xd3   : > { %844 = vrot.lane.b32.xlu0 %v4577_v14, %s4222_s27 }
  0xd4   : > { %v4996_v22 = vpop.permute.xlu1 %579 }
  0xd5   : > { %8217 = vst [vmem:[#allocation73_spill] sm:$0xff] %v4996_v22  ;;  %v4998_v61 = vpop.permute.xlu0 %585 }
  0xd6   : > { %8218 = vst [vmem:[#allocation74_spill] sm:$0xff] %v4998_v61  ;;  %842 = vrot.lane.b32.xlu1 %v4560_v2, %s4222_s27 }
  0xd7   : > { %848 = vrot.lane.b32.xlu0 %v4596_v38, %s4222_s27 }
  0xd8   : > { %v5004_v10 = vpop.permute.xlu1 %583 }
  0xd9   : > { %8219 = vst [vmem:[#allocation75_spill] sm:$0xff] %v5004_v10  ;;  %v5006_v31 = vpop.permute.xlu0 %589 }
  0xda   : > { %8220 = vst [vmem:[#allocation76_spill] sm:$0xff] %v5006_v31  ;;  %846 = vrot.lane.b32.xlu1 %v4579_v15, %s4222_s27 }
  0xdb   : > { %852 = vrot.lane.b32.xlu0 %v4615_v3, %s4222_s27 }
  0xdc   : > { %v5012_v30 = vpop.permute.xlu1 %587 }
  0xdd   : > { %8221 = vst [vmem:[#allocation77_spill] sm:$0xff] %v5012_v30  ;;  %v5014_v22 = vpop.permute.xlu0 %706  ;;  %v5030_v30 = vld [vmem:[#allocation2 + $0x180] sm:$0xff] }
  0xde   : > { %8222 = vst [vmem:[#allocation78_spill] sm:$0xff] %v5014_v22  ;;  %850 = vrot.lane.b32.xlu1 %v4598_v39, %s4222_s27 }
  0xdf   : > { %856 = vrot.lane.b32.xlu0 %v4634_v12, %s4222_s27 }
  0xe0   : > { %v5020_v61 = vpop.permute.xlu1 %591 }
  0xe1   : > { %8223 = vst [vmem:[#allocation79_spill] sm:$0xff] %v5020_v61  ;;  %v5022_v10 = vpop.permute.xlu0 %710 }
  0xe2   : > { %8224 = vst [vmem:[#allocation80_spill] sm:$0xff] %v5022_v10  ;;  %854 = vrot.lane.b32.xlu1 %v4617_v62, %s4222_s27 }
  0xe3   : > { %860 = vrot.lane.b32.xlu0 %v4653_v21, %s4222_s27 }
  0xe4   : > { %v5028_v31 = vpop.permute.xlu1 %708 }
  0xe5   : > { %8225 = vst [vmem:[#allocation81_spill] sm:$0xff] %v5028_v31  ;;  %v5032_v26 = vpop.permute.xlu0 %714  ;;  %v8237_v31 = vld [vmem:[#allocation5_spill] sm:$0xff] }
  0xe6   : > { %8226 = vst [vmem:[#allocation82_spill] sm:$0xff] %v5032_v26  ;;  %858 = vrot.lane.b32.xlu1 %v4636_v60, %s4222_s27 }
  0xe7   : > { %864 = vrot.lane.b32.xlu0 %v5030_v30, %s4222_s27 }
  0xe8   : > { %v5038_v61 = vpop.permute.xlu1 %712 }
  0xe9   : > { %8227 = vst [vmem:[#allocation83_spill] sm:$0xff] %v5038_v61  ;;  %v5040_v29 = vpop.permute.xlu0 %718 }
  0xea   : > { %8228 = vst [vmem:[#allocation84_spill] sm:$0xff] %v5040_v29  ;;  %862 = vrot.lane.b32.xlu1 %v4655_v25, %s4222_s27 }
  0xeb   : > { %906 = vrot.lane.b32.xlu0 %v4417_v43, %s4223_s28 }
  0xec   : > { %v5048_v26 = vpop.permute.xlu1 %716 }
  0xed   : > { %8229 = vst [vmem:[#allocation85_spill] sm:$0xff] %v5048_v26  ;;  %v5050_v10 = vpop.permute.xlu0 %722 }
  0xee   : > { %8230 = vst [vmem:[#allocation86_spill] sm:$0xff] %v5050_v10  ;;  %866 = vrot.lane.b32.xlu1 %v5044_v57, %s4222_s27  ;;  %v8236_v10 = vld [vmem:[#allocation4_spill] sm:$0xff] }
  0xef   : > { %910 = vrot.lane.b32.xlu0 %v4424_v46, %s4223_s28 }
  0xf0   : > { %v5056_v29 = vpop.permute.xlu1 %720 }
  0xf1   : > { %8231 = vst [vmem:[#allocation87_spill] sm:$0xff] %v5056_v29  ;;  %v5058_v61 = vpop.permute.xlu0 %726 }
  0xf2   : > { %8232 = vst [vmem:[#allocation88_spill] sm:$0xff] %v5058_v61  ;;  %908 = vrot.lane.b32.xlu1 %v4431_v49, %s4223_s28  ;;  %v8240_v61 = vld [vmem:[#allocation6_spill] sm:$0xff]  ;;  %v8241_v49 = vld [vmem:[#allocation7_spill] sm:$0xff] }
  0xf3   : > { %914 = vrot.lane.b32.xlu0 %v8233_v50, %s4223_s28 }
  0xf4   : > { %v5064_v43 = vpop.permute.xlu1 %724 }
  0xf5   : > { %8234 = vst [vmem:[#allocation3_spill] sm:$0xff] %v5064_v43  ;;  %v5066_v26 = vpop.permute.xlu0 %730 }
  0xf6   : > { %8235 = vst [vmem:[#allocation89_spill] sm:$0xff] %v5066_v26  ;;  %912 = vrot.lane.b32.xlu1 %v8236_v10, %s4223_s28  ;;  %v8244_v26 = vld [vmem:[#allocation8_spill] sm:$0xff] }
  0xf7   : > { %918 = vrot.lane.b32.xlu0 %v8237_v31, %s4223_s28 }
  0xf8   : > { %v5072_v6 = vpop.permute.xlu1 %728 }
  0xf9   : > { %8238 = vst [vmem:[#allocation4_spill] sm:$0xff] %v5072_v6  ;;  %v5074_v29 = vpop.permute.xlu0 %734 }
  0xfa   : > { %8239 = vst [vmem:[#allocation90_spill] sm:$0xff] %v5074_v29  ;;  %916 = vrot.lane.b32.xlu1 %v8240_v61, %s4223_s28  ;;  %v8248_v29 = vld [vmem:[#allocation10_spill] sm:$0xff]  ;;  %v8249_v61 = vld [vmem:[#allocation11_spill] sm:$0xff] }
  0xfb   : > { %922 = vrot.lane.b32.xlu0 %v8241_v49, %s4223_s28 }
  0xfc   : > { %v5080_v22 = vpop.permute.xlu1 %732 }
  0xfd   : > { %8242 = vst [vmem:[#allocation91_spill] sm:$0xff] %v5080_v22  ;;  %v5082_v43 = vpop.permute.xlu0 %738 }
  0xfe   : > { %8243 = vst [vmem:[#allocation92_spill] sm:$0xff] %v5082_v43  ;;  %920 = vrot.lane.b32.xlu1 %v8244_v26, %s4223_s28  ;;  %v8252_v43 = vld [vmem:[#allocation12_spill] sm:$0xff]  ;;  %v8253_v26 = vld [vmem:[#allocation13_spill] sm:$0xff] }
  0xff   : > { %926 = vrot.lane.b32.xlu0 %v8245_v17, %s4223_s28 }
 0x100   : > { %v5088_v31 = vpop.permute.xlu1 %736 }
 0x101   : > { %8246 = vst [vmem:[#allocation93_spill] sm:$0xff] %v5088_v31  ;;  %v5090_v6 = vpop.permute.xlu0 %742 }
 0x102   : > { %8247 = vst [vmem:[#allocation94_spill] sm:$0xff] %v5090_v6  ;;  %924 = vrot.lane.b32.xlu1 %v8248_v29, %s4223_s28  ;;  %v8256_v6 = vld [vmem:[#allocation14_spill] sm:$0xff]  ;;  %v8257_v29 = vld [vmem:[#allocation15_spill] sm:$0xff] }
 0x103   : > { %930 = vrot.lane.b32.xlu0 %v8249_v61, %s4223_s28 }
 0x104   : > { %v5096_v49 = vpop.permute.xlu1 %740 }
 0x105   : > { %8250 = vst [vmem:[#allocation95_spill] sm:$0xff] %v5096_v49  ;;  %v5098_v22 = vpop.permute.xlu0 %746 }
 0x106   : > { %8251 = vst [vmem:[#allocation96_spill] sm:$0xff] %v5098_v22  ;;  %928 = vrot.lane.b32.xlu1 %v8252_v43, %s4223_s28  ;;  %v8260_v22 = vld [vmem:[#allocation16_spill] sm:$0xff]  ;;  %v8261_v43 = vld [vmem:[#allocation17_spill] sm:$0xff] }
 0x107   : > { %934 = vrot.lane.b32.xlu0 %v8253_v26, %s4223_s28 }
 0x108   : > { %v5104_v17 = vpop.permute.xlu1 %744 }
 0x109   : > { %8254 = vst [vmem:[#allocation97_spill] sm:$0xff] %v5104_v17  ;;  %v5106_v31 = vpop.permute.xlu0 %750 }
 0x10a   : > { %8255 = vst [vmem:[#allocation98_spill] sm:$0xff] %v5106_v31  ;;  %932 = vrot.lane.b32.xlu1 %v8256_v6, %s4223_s28  ;;  %v8264_v31 = vld [vmem:[#allocation18_spill] sm:$0xff]  ;;  %v8265_v6 = vld [vmem:[#allocation19_spill] sm:$0xff] }
 0x10b   : > { %938 = vrot.lane.b32.xlu0 %v8257_v29, %s4223_s28 }
 0x10c   : > { %v5112_v61 = vpop.permute.xlu1 %748 }
 0x10d   : > { %8258 = vst [vmem:[#allocation99_spill] sm:$0xff] %v5112_v61  ;;  %v5114_v49 = vpop.permute.xlu0 %754 }
 0x10e   : > { %8259 = vst [vmem:[#allocation100_spill] sm:$0xff] %v5114_v49  ;;  %936 = vrot.lane.b32.xlu1 %v8260_v22, %s4223_s28  ;;  %v8268_v49 = vld [vmem:[#allocation20_spill] sm:$0xff]  ;;  %v8269_v22 = vld [vmem:[#allocation21_spill] sm:$0xff] }
 0x10f   : > { %942 = vrot.lane.b32.xlu0 %v8261_v43, %s4223_s28 }
 0x110   : > { %v5120_v26 = vpop.permute.xlu1 %752 }
 0x111   : > { %8262 = vst [vmem:[#allocation101_spill] sm:$0xff] %v5120_v26  ;;  %v5122_v17 = vpop.permute.xlu0 %758 }
 0x112   : > { %8263 = vst [vmem:[#allocation102_spill] sm:$0xff] %v5122_v17  ;;  %940 = vrot.lane.b32.xlu1 %v8264_v31, %s4223_s28  ;;  %v8272_v17 = vld [vmem:[#allocation22_spill] sm:$0xff]  ;;  %v8273_v31 = vld [vmem:[#allocation23_spill] sm:$0xff] }
 0x113   : > { %946 = vrot.lane.b32.xlu0 %v8265_v6, %s4223_s28 }
 0x114   : > { %v5128_v29 = vpop.permute.xlu1 %756 }
 0x115   : > { %8266 = vst [vmem:[#allocation103_spill] sm:$0xff] %v5128_v29  ;;  %v5130_v61 = vpop.permute.xlu0 %762 }
 0x116   : > { %8267 = vst [vmem:[#allocation104_spill] sm:$0xff] %v5130_v61  ;;  %944 = vrot.lane.b32.xlu1 %v8268_v49, %s4223_s28 }
 0x117   : > { %950 = vrot.lane.b32.xlu0 %v8269_v22, %s4223_s28 }
 0x118   : > { %v5136_v43 = vpop.permute.xlu1 %760 }
 0x119   : > { %8270 = vst [vmem:[#allocation20_spill] sm:$0xff] %v5136_v43  ;;  %v5138_v26 = vpop.permute.xlu0 %766  ;;  %v902_v43 = vrot.slane %v5044_v57, 1 }
 0x11a   : > { %8271 = vst [vmem:[#allocation21_spill] sm:$0xff] %v5138_v26  ;;  %948 = vrot.lane.b32.xlu1 %v8272_v17, %s4223_s28  ;;  %v901_v26 = vrot.slane %v5030_v30, 1 }
 0x11b   : > { %954 = vrot.lane.b32.xlu0 %v8273_v31, %s4223_s28  ;;  %v8278_v31 = vld [vmem:[#allocation26_spill] sm:$0xff] }
 0x11c   : > { %v5144_v6 = vpop.permute.xlu1 %764 }
 0x11d   : > { %8274 = vst [vmem:[#allocation105_spill] sm:$0xff] %v5144_v6  ;;  %v5146_v29 = vpop.permute.xlu0 %804 }
 0x11e   : > { %8275 = vst [vmem:[#allocation106_spill] sm:$0xff] %v5146_v29  ;;  %952 = vrot.lane.b32.xlu1 %v4658_v33, %s4223_s28  ;;  %v5164_v29 = vld [vmem:[#allocation2 + $0x190] sm:$0x3]  ;;  %v8282_v33 = vld [vmem:[#allocation28_spill] sm:$0xff] }
 0x11f   : > { %958 = vrot.lane.b32.xlu0 %v4668_v36, %s4223_s28  ;;  %v5167_v36 = vsel %vm448_vm2, %v901_v26, %v902_v43 }
 0x120   : > { %v5152_v61 = vpop.permute.xlu1 %768  ;;  %8280 = vst [vmem:[#allocation110_spill] sm:$0xff] %v5167_v36 }
 0x121   : > { %8276 = vst [vmem:[#allocation107_spill] sm:$0xff] %v5152_v61  ;;  %v5156_v17 = vpop.permute.xlu0 %808 }
 0x122   : > { %8277 = vst [vmem:[#allocation108_spill] sm:$0xff] %v5156_v17  ;;  %956 = vrot.lane.b32.xlu1 %v8278_v31, %s4223_s28  ;;  %v904_v17 = vrot.slane %v5164_v29, 1 }
 0x123   : > { %962 = vrot.lane.b32.xlu0 %v4683_v16, %s4223_s28 }
 0x124   : > { %v5162_v6 = vpop.permute.xlu1 %806  ;;  %v5183_v26 = vsel %vm448_vm2, %v902_v43, %v904_v17  ;;  %v8293_v43 = vld [vmem:[#allocation30_spill] sm:$0xff] }
 0x125   : > { %8279 = vst [vmem:[#allocation109_spill] sm:$0xff] %v5162_v6  ;;  %v5169_v61 = vpop.permute.xlu0 %812  ;;  %v8285_v6 = vld [vmem:[#allocation29_spill] sm:$0xff]  ;;  %8286 = vst [vmem:[#allocation114_spill] sm:$0xff] %v5183_v26 }
 0x126   : > { %8281 = vst [vmem:[#allocation111_spill] sm:$0xff] %v5169_v61  ;;  %960 = vrot.lane.b32.xlu1 %v8282_v33, %s4223_s28 }
 0x127   : > { %966 = vrot.lane.b32.xlu0 %v5167_v36, %s4223_s28 }
 0x128   : > { %v5176_v31 = vpop.permute.xlu1 %810 }
 0x129   : > { %8283 = vst [vmem:[#allocation112_spill] sm:$0xff] %v5176_v31  ;;  %v5178_v16 = vpop.permute.xlu0 %816 }
 0x12a   : > { %8284 = vst [vmem:[#allocation113_spill] sm:$0xff] %v5178_v16  ;;  %964 = vrot.lane.b32.xlu1 %v8285_v6, %s4223_s28 }
 0x12b   : > { %1007 = vrot.lane.b32.xlu0 %v4708_v18, %s4224_s29 }
 0x12c   : > { %v5187_v61 = vpop.permute.xlu1 %814 }
 0x12d   : > { %8287 = vst [vmem:[#allocation115_spill] sm:$0xff] %v5187_v61  ;;  %v5189_v33 = vpop.permute.xlu0 %820 }
 0x12e   : > { %8288 = vst [vmem:[#allocation116_spill] sm:$0xff] %v5189_v33  ;;  %968 = vrot.lane.b32.xlu1 %v5183_v26, %s4223_s28 }
 0x12f   : > { %1011 = vrot.lane.b32.xlu0 %v4719_v9, %s4224_s29 }
 0x130   : > { %v5195_v16 = vpop.permute.xlu1 %818 }
 0x131   : > { %8289 = vst [vmem:[#allocation117_spill] sm:$0xff] %v5195_v16  ;;  %v5197_v31 = vpop.permute.xlu0 %824 }
 0x132   : > { %8290 = vst [vmem:[#allocation118_spill] sm:$0xff] %v5197_v31  ;;  %1009 = vrot.lane.b32.xlu1 %v4725_v7, %s4224_s29  ;;  %v8296_v31 = vld [vmem:[#allocation31_spill] sm:$0xff] }
 0x133   : > { %1015 = vrot.lane.b32.xlu0 %v4731_v37, %s4224_s29 }
 0x134   : > { %v5203_v18 = vpop.permute.xlu1 %822 }
 0x135   : > { %8291 = vst [vmem:[#allocation119_spill] sm:$0xff] %v5203_v18  ;;  %v5205_v17 = vpop.permute.xlu0 %828 }
 0x136   : > { %8292 = vst [vmem:[#allocation120_spill] sm:$0xff] %v5205_v17  ;;  %1013 = vrot.lane.b32.xlu1 %v8293_v43, %s4224_s29  ;;  %v8299_v17 = vld [vmem:[#allocation32_spill] sm:$0xff] }
 0x137   : > { %1019 = vrot.lane.b32.xlu0 %v4744_v42, %s4224_s29 }
 0x138   : > { %v5211_v33 = vpop.permute.xlu1 %826 }
 0x139   : > { %8294 = vst [vmem:[#allocation30_spill] sm:$0xff] %v5211_v33  ;;  %v5213_v16 = vpop.permute.xlu0 %832 }
 0x13a   : > { %8295 = vst [vmem:[#allocation121_spill] sm:$0xff] %v5213_v16  ;;  %1017 = vrot.lane.b32.xlu1 %v8296_v31, %s4224_s29  ;;  %v8302_v16 = vld [vmem:[#allocation33_spill] sm:$0xff] }
 0x13b   : > { %1023 = vrot.lane.b32.xlu0 %v4757_v51, %s4224_s29 }
 0x13c   : > { %v5219_v7 = vpop.permute.xlu1 %830 }
 0x13d   : > { %8297 = vst [vmem:[#allocation31_spill] sm:$0xff] %v5219_v7  ;;  %v5221_v18 = vpop.permute.xlu0 %836 }
 0x13e   : > { %8298 = vst [vmem:[#allocation122_spill] sm:$0xff] %v5221_v18  ;;  %1021 = vrot.lane.b32.xlu1 %v8299_v17, %s4224_s29  ;;  %v8305_v18 = vld [vmem:[#allocation35_spill] sm:$0xff] }
 0x13f   : > { %1027 = vrot.lane.b32.xlu0 %v4770_v59, %s4224_s29 }
 0x140   : > { %v5227_v61 = vpop.permute.xlu1 %834 }
 0x141   : > { %8300 = vst [vmem:[#allocation32_spill] sm:$0xff] %v5227_v61  ;;  %v5229_v33 = vpop.permute.xlu0 %840 }
 0x142   : > { %8301 = vst [vmem:[#allocation123_spill] sm:$0xff] %v5229_v33  ;;  %1025 = vrot.lane.b32.xlu1 %v8302_v16, %s4224_s29  ;;  %v8308_v33 = vld [vmem:[#allocation37_spill] sm:$0xff] }
 0x143   : > { %1031 = vrot.lane.b32.xlu0 %v4783_v13, %s4224_s29  ;;  %v8315_v13 = vld [vmem:[#allocation42_spill] sm:$0xff] }
 0x144   : > { %v5235_v26 = vpop.permute.xlu1 %838 }
 0x145   : > { %8303 = vst [vmem:[#allocation33_spill] sm:$0xff] %v5235_v26  ;;  %v5237_v7 = vpop.permute.xlu0 %844 }
 0x146   : > { %8304 = vst [vmem:[#allocation124_spill] sm:$0xff] %v5237_v7  ;;  %1029 = vrot.lane.b32.xlu1 %v8305_v18, %s4224_s29  ;;  %v8311_v7 = vld [vmem:[#allocation39_spill] sm:$0xff] }
 0x147   : > { %1035 = vrot.lane.b32.xlu0 %v4796_v23, %s4224_s29 }
 0x148   : > { %v5243_v36 = vpop.permute.xlu1 %842 }
 0x149   : > { %8306 = vst [vmem:[#allocation35_spill] sm:$0xff] %v5243_v36  ;;  %v5245_v61 = vpop.permute.xlu0 %848 }
 0x14a   : > { %8307 = vst [vmem:[#allocation125_spill] sm:$0xff] %v5245_v61  ;;  %1033 = vrot.lane.b32.xlu1 %v8308_v33, %s4224_s29  ;;  %v8314_v61 = vld [vmem:[#allocation41_spill] sm:$0xff] }
 0x14b   : > { %1039 = vrot.lane.b32.xlu0 %v4809_v34, %s4224_s29 }
 0x14c   : > { %v5251_v6 = vpop.permute.xlu1 %846 }
 0x14d   : > { %8309 = vst [vmem:[#allocation37_spill] sm:$0xff] %v5251_v6  ;;  %v5253_v26 = vpop.permute.xlu0 %852 }
 0x14e   : > { %8310 = vst [vmem:[#allocation126_spill] sm:$0xff] %v5253_v26  ;;  %1037 = vrot.lane.b32.xlu1 %v8311_v7, %s4224_s29  ;;  %v8318_v26 = vld [vmem:[#allocation43_spill] sm:$0xff]  ;;  %v8319_v7 = vld [vmem:[#allocation44_spill] sm:$0xff] }
 0x14f   : > { %1043 = vrot.lane.b32.xlu0 %v4822_v54, %s4224_s29 }
 0x150   : > { %v5259_v23 = vpop.permute.xlu1 %850 }
 0x151   : > { %8312 = vst [vmem:[#allocation127_spill] sm:$0xff] %v5259_v23  ;;  %v5261_v36 = vpop.permute.xlu0 %856 }
 0x152   : > { %8313 = vst [vmem:[#allocation128_spill] sm:$0xff] %v5261_v36  ;;  %1041 = vrot.lane.b32.xlu1 %v8314_v61, %s4224_s29 }
 0x153   : > { %1047 = vrot.lane.b32.xlu0 %v8315_v13, %s4224_s29 }
 0x154   : > { %v5267_v34 = vpop.permute.xlu1 %854 }
 0x155   : > { %8316 = vst [vmem:[#allocation41_spill] sm:$0xff] %v5267_v34  ;;  %v5269_v6 = vpop.permute.xlu0 %860 }
 0x156   : > { %8317 = vst [vmem:[#allocation42_spill] sm:$0xff] %v5269_v6  ;;  %1045 = vrot.lane.b32.xlu1 %v8318_v26, %s4224_s29 }
 0x157   : > { %1051 = vrot.lane.b32.xlu0 %v8319_v7, %s4224_s29 }
 0x158   : > { %v5275_v54 = vpop.permute.xlu1 %858 }
 0x159   : > { %8320 = vst [vmem:[#allocation43_spill] sm:$0xff] %v5275_v54  ;;  %v5277_v23 = vpop.permute.xlu0 %864  ;;  %v1003_v54 = vrot.slane %v5044_v57, 2 }
 0x15a   : > { %8321 = vst [vmem:[#allocation129_spill] sm:$0xff] %v5277_v23  ;;  %1049 = vrot.lane.b32.xlu1 %v4855_v53, %s4224_s29  ;;  %v1002_v23 = vrot.slane %v5030_v30, 2 }
 0x15b   : > { %1055 = vrot.lane.b32.xlu0 %v4861_v4, %s4224_s29 }
 0x15c   : > { %v5283_v36 = vpop.permute.xlu1 %862 }
 0x15d   : > { %8322 = vst [vmem:[#allocation130_spill] sm:$0xff] %v5283_v36  ;;  %v5285_v34 = vpop.permute.xlu0 %906 }
 0x15e   : > { %8323 = vst [vmem:[#allocation131_spill] sm:$0xff] %v5285_v34  ;;  %1053 = vrot.lane.b32.xlu1 %v4870_v5, %s4224_s29  ;;  %v5304_v34 = vsel %vm625_vm3, %v1002_v23, %v1003_v54 }
 0x15f   : > { %1059 = vrot.lane.b32.xlu0 %v4876_v8, %s4224_s29 }
 0x160   : > { %v5291_v6 = vpop.permute.xlu1 %866 }
 0x161   : > { %8324 = vst [vmem:[#allocation132_spill] sm:$0xff] %v5291_v6  ;;  %v5295_v7 = vpop.permute.xlu0 %910  ;;  %v1005_v6 = vrot.slane %v5164_v29, 2 }
 0x162   : > { %8325 = vst [vmem:[#allocation133_spill] sm:$0xff] %v5295_v7  ;;  %1057 = vrot.lane.b32.xlu1 %v4885_v52, %s4224_s29 }
 0x163   : > { %1063 = vrot.lane.b32.xlu0 %v4893_v24, %s4224_s29  ;;  %v5320_v23 = vsel %vm625_vm3, %v1003_v54, %v1005_v6 }
 0x164   : > { %v5301_v36 = vpop.permute.xlu1 %908 }
 0x165   : > { %v5306_v8 = vpop.permute.xlu0 %914 }
 0x166   : > { %8326 = vst [vmem:[#allocation134_spill] sm:$0xff] %v5306_v8  ;;  %1061 = vrot.lane.b32.xlu1 %v4900_v58, %s4224_s29 }
 0x167   : > { %1067 = vrot.lane.b32.xlu0 %v5304_v34, %s4224_s29 }
 0x168   : > { %v5313_v7 = vpop.permute.xlu1 %912 }
 0x169   : > { %8327 = vst [vmem:[#allocation135_spill] sm:$0xff] %v5313_v7  ;;  %v5315_v52 = vpop.permute.xlu0 %918 }
 0x16a   : > { %8328 = vst [vmem:[#allocation136_spill] sm:$0xff] %v5315_v52  ;;  %1065 = vrot.lane.b32.xlu1 %v4912_v11, %s4224_s29 }
 0x16b   : > { %1105 = vrot.lane.b32.xlu0 %v4395_v32, %s4225_s30 }
 0x16c   : > { %v5324_v8 = vpop.permute.xlu1 %916 }
 0x16d   : > { %v5326_v29 = vpop.permute.xlu0 %922 }
 0x16e   : > { %1069 = vrot.lane.b32.xlu1 %v5320_v23, %s4224_s29 }
 0x16f   : > { %1109 = vrot.lane.b32.xlu0 %v4410_v40, %s4225_s30 }
 0x170   : > { %v5332_v52 = vpop.permute.xlu1 %920 }
 0x171   : > { %v5334_v7 = vpop.permute.xlu0 %926 }
 0x172   : > { %1107 = vrot.lane.b32.xlu1 %v4402_v35, %s4225_s30 }
 0x173   : > { %1113 = vrot.lane.b32.xlu0 %v4426_v47, %s4225_s30 }
 0x174   : > { %v5340_v32 = vpop.permute.xlu1 %924 }
 0x175   : > { %v5342_v54 = vpop.permute.xlu0 %930 }
 0x176   : > { %1111 = vrot.lane.b32.xlu1 %v4412_v41, %s4225_s30 }
 0x177   : > { %1117 = vrot.lane.b32.xlu0 %v4445_v55, %s4225_s30 }
 0x178   : > { %v5348_v40 = vpop.permute.xlu1 %928 }
 0x179   : > { %v5350_v6 = vpop.permute.xlu0 %934 }
 0x17a   : > { %8329 = vst [vmem:[#allocation137_spill] sm:$0xff] %v5350_v6  ;;  %1115 = vrot.lane.b32.xlu1 %v4428_v48, %s4225_s30  ;;  %v8433_v6 = vld [vmem:[#allocation50_spill] sm:$0xff] }
 0x17b   : > { %1121 = vrot.lane.b32.xlu0 %v4463_v0, %s4225_s30 }
 0x17c   : > { %v5356_v35 = vpop.permute.xlu1 %932 }
 0x17d   : > { %v5358_v47 = vpop.permute.xlu0 %938 }
 0x17e   : > { %8330 = vst [vmem:[#allocation138_spill] sm:$0xff] %v5358_v47  ;;  %1119 = vrot.lane.b32.xlu1 %v4447_v56, %s4225_s30 }
 0x17f   : > { %1125 = vrot.lane.b32.xlu0 %v4501_v19, %s4225_s30 }
 0x180   : > { %v5364_v41 = vpop.permute.xlu1 %936 }
 0x181   : > { %8331 = vst [vmem:[#allocation139_spill] sm:$0xff] %v5364_v41  ;;  %v5366_v55 = vpop.permute.xlu0 %942  ;;  %v8431_v41 = vld [vmem:[#allocation49_spill] sm:$0xff] }
 0x182   : > { %8332 = vst [vmem:[#allocation140_spill] sm:$0xff] %v5366_v55  ;;  %1123 = vrot.lane.b32.xlu1 %v4465_v1, %s4225_s30  ;;  %v1671_v55 = vld [vmem:[%s7974_s1 + $0x20] sm:$0xff] }
 0x183   : > { %1129 = vrot.lane.b32.xlu0 %v4520_v27, %s4225_s30 }
 0x184   : > { %v5372_v48 = vpop.permute.xlu1 %940 }
 0x185   : > { %8333 = vst [vmem:[#allocation141_spill] sm:$0xff] %v5372_v48  ;;  %v5374_v0 = vpop.permute.xlu0 %946 }
 0x186   : > { %8334 = vst [vmem:[#allocation142_spill] sm:$0xff] %v5374_v0  ;;  %1127 = vrot.lane.b32.xlu1 %v4503_v20, %s4225_s30 }
 0x187   : > { %1133 = vrot.lane.b32.xlu0 %v4539_v44, %s4225_s30 }
 0x188   : > { %v5380_v56 = vpop.permute.xlu1 %944 }
 0x189   : > { %8335 = vst [vmem:[#allocation143_spill] sm:$0xff] %v5380_v56  ;;  %v5382_v19 = vpop.permute.xlu0 %950  ;;  %v1673_v56 = vld [vmem:[%s7974_s1 + $0x30] sm:$0xff] }
 0x18a   : > { %8336 = vst [vmem:[#allocation144_spill] sm:$0xff] %v5382_v19  ;;  %1131 = vrot.lane.b32.xlu1 %v4522_v28, %s4225_s30  ;;  %v8355_v19 = vld [vmem:[#allocation10_spill] sm:$0xff] }
 0x18b   : > { %1137 = vrot.lane.b32.xlu0 %v4558_v63, %s4225_s30 }
 0x18c   : > { %v5388_v1 = vpop.permute.xlu1 %948 }
 0x18d   : > { %8337 = vst [vmem:[#allocation145_spill] sm:$0xff] %v5388_v1  ;;  %v5390_v27 = vpop.permute.xlu0 %954  ;;  %v1675_v1 = vld [vmem:[%s7974_s1 + $0x40] sm:$0xff] }
 0x18e   : > { %8338 = vst [vmem:[#allocation146_spill] sm:$0xff] %v5390_v27  ;;  %1135 = vrot.lane.b32.xlu1 %v4541_v45, %s4225_s30  ;;  %v8351_v27 = vld [vmem:[#allocation8_spill] sm:$0xff]  ;;  %3998 = vmatprep.subr.mxu0 %v1675_v1 }
 0x18f   : > { %1141 = vrot.lane.b32.xlu0 %v4577_v14, %s4225_s30  ;;  %3999 = vmatpush3.msra.mxu0 %v1675_v1  ;;  %v8363_v1 = vld [vmem:[#allocation14_spill] sm:$0xff] }
 0x190   : > { %v5396_v20 = vpop.permute.xlu1 %952 }
 0x191   : > { %8339 = vst [vmem:[#allocation147_spill] sm:$0xff] %v5396_v20  ;;  %v5398_v44 = vpop.permute.xlu0 %958 }
 0x192   : > { %8340 = vst [vmem:[#allocation148_spill] sm:$0xff] %v5398_v44  ;;  %1139 = vrot.lane.b32.xlu1 %v4560_v2, %s4225_s30  ;;  %v8349_v44 = vld [vmem:[#allocation7_spill] sm:$0xff] }
 0x193   : > { %1145 = vrot.lane.b32.xlu0 %v4596_v38, %s4225_s30 }
 0x194   : > { %v5404_v28 = vpop.permute.xlu1 %956 }
 0x195   : > { %8341 = vst [vmem:[#allocation149_spill] sm:$0xff] %v5404_v28  ;;  %v5406_v63 = vpop.permute.xlu0 %962 }
 0x196   : > { %8342 = vst [vmem:[#allocation150_spill] sm:$0xff] %v5406_v63  ;;  %1143 = vrot.lane.b32.xlu1 %v4579_v15, %s4225_s30 }
 0x197   : > { %1149 = vrot.lane.b32.xlu0 %v4615_v3, %s4225_s30 }
 0x198   : > { %v5412_v45 = vpop.permute.xlu1 %960 }
 0x199   : > { %8343 = vst [vmem:[#allocation151_spill] sm:$0xff] %v5412_v45  ;;  %v5414_v14 = vpop.permute.xlu0 %966  ;;  %v8348_v45 = vld [vmem:[#allocation6_spill] sm:$0xff] }
 0x19a   : > { %8344 = vst [vmem:[#allocation152_spill] sm:$0xff] %v5414_v14  ;;  %1147 = vrot.lane.b32.xlu1 %v4598_v39, %s4225_s30 }
 0x19b   : > { %1153 = vrot.lane.b32.xlu0 %v4634_v12, %s4225_s30  ;;  %v5438_v12 = vld [vmem:[#allocation2 + $0x198] sm:$0xff] }
 0x19c   : > { %v5420_v2 = vpop.permute.xlu1 %964 }
 0x19d   : > { %8345 = vst [vmem:[#allocation153_spill] sm:$0xff] %v5420_v2  ;;  %v5422_v38 = vpop.permute.xlu0 %1007 }
 0x19e   : > { %1151 = vrot.lane.b32.xlu1 %v4617_v62, %s4225_s30 }
 0x19f   : > { %1157 = vrot.lane.b32.xlu0 %v4653_v21, %s4225_s30 }
 0x1a0   : > { %v5428_v3 = vpop.permute.xlu1 %968 }
 0x1a1   : > { %8346 = vst [vmem:[#allocation154_spill] sm:$0xff] %v5428_v3  ;;  %v5430_v15 = vpop.permute.xlu0 %1011 }
 0x1a2   : > { %1155 = vrot.lane.b32.xlu1 %v4636_v60, %s4225_s30  ;;  %v5452_v60 = vld [vmem:[#allocation2 + $0x1a0] sm:$0xff] }
 0x1a3   : > { %1161 = vrot.lane.b32.xlu0 %v5030_v30, %s4225_s30 }
 0x1a4   : > { %v5436_v39 = vpop.permute.xlu1 %1009 }
 0x1a5   : > { %v5440_v14 = vpop.permute.xlu0 %1015 }
 0x1a6   : > { %1159 = vrot.lane.b32.xlu1 %v4655_v25, %s4225_s30 }
 0x1a7   : > { %1165 = vrot.lane.b32.xlu0 %v5438_v12, %s4225_s30 }
 0x1a8   : > { %v5446_v21 = vpop.permute.xlu1 %1013 }
 0x1a9   : > { %v5448_v62 = vpop.permute.xlu0 %1019 }
 0x1aa   : > { %1163 = vrot.lane.b32.xlu1 %v5044_v57, %s4225_s30  ;;  %v8347_v57 = vld [vmem:[#allocation5_spill] sm:$0xff] }
 0x1ab   : > { %1207 = vrot.lane.b32.xlu0 %v4424_v46, %s4226_s6 }
 0x1ac   : > { %v5456_v30 = vpop.permute.xlu1 %1017 }
 0x1ad   : > { %v5458_v3 = vpop.permute.xlu0 %1023 }
 0x1ae   : > { %1167 = vrot.lane.b32.xlu1 %v5452_v60, %s4225_s30 }
 0x1af   : > { %1211 = vrot.lane.b32.xlu0 %v8233_v50, %s4226_s6 }
 0x1b0   : > { %v5464_v25 = vpop.permute.xlu1 %1021 }
 0x1b1   : > { %v5466_v2 = vpop.permute.xlu0 %1027 }
 0x1b2   : > { %1209 = vrot.lane.b32.xlu1 %v8236_v10, %s4226_s6  ;;  %v8352_v10 = vld [vmem:[#allocation9_spill] sm:$0xff] }
 0x1b3   : > { %1215 = vrot.lane.b32.xlu0 %v8347_v57, %s4226_s6 }
 0x1b4   : > { %v5472_v46 = vpop.permute.xlu1 %1025 }
 0x1b5   : > { %v5474_v63 = vpop.permute.xlu0 %1031 }
 0x1b6   : > { %1213 = vrot.lane.b32.xlu1 %v8348_v45, %s4226_s6  ;;  %v8356_v45 = vld [vmem:[#allocation11_spill] sm:$0xff] }
 0x1b7   : > { %1219 = vrot.lane.b32.xlu0 %v8349_v44, %s4226_s6 }
 0x1b8   : > { %v5480_v50 = vpop.permute.xlu1 %1029 }
 0x1b9   : > { %v5482_v28 = vpop.permute.xlu0 %1035 }
 0x1ba   : > { %8350 = vst [vmem:[#allocation5_spill] sm:$0xff] %v5482_v28  ;;  %1217 = vrot.lane.b32.xlu1 %v8351_v27, %s4226_s6  ;;  %v8430_v28 = vld [vmem:[#allocation47_spill] sm:$0xff] }
 0x1bb   : > { %1223 = vrot.lane.b32.xlu0 %v8352_v10, %s4226_s6  ;;  %v8359_v10 = vld [vmem:[#allocation12_spill] sm:$0xff] }
 0x1bc   : > { %v5488_v57 = vpop.permute.xlu1 %1033 }
 0x1bd   : > { %8353 = vst [vmem:[#allocation6_spill] sm:$0xff] %v5488_v57  ;;  %v5490_v20 = vpop.permute.xlu0 %1039 }
 0x1be   : > { %8354 = vst [vmem:[#allocation7_spill] sm:$0xff] %v5490_v20  ;;  %1221 = vrot.lane.b32.xlu1 %v8355_v19, %s4226_s6  ;;  %v1674_v19 = vld [vmem:[%s7974_s1 + $0x38] sm:$0xff] }
 0x1bf   : > { %1227 = vrot.lane.b32.xlu0 %v8356_v45, %s4226_s6  ;;  %4000 = vmatprep.subr.mxu0 %v1674_v19  ;;  %v8360_v45 = vld [vmem:[#allocation13_spill] sm:$0xff] }
 0x1c0   : > { %v5496_v44 = vpop.permute.xlu1 %1037  ;;  %4001 = vmatpush3.msra.mxu0 %v1674_v19 }
 0x1c1   : > { %8357 = vst [vmem:[#allocation8_spill] sm:$0xff] %v5496_v44  ;;  %v5501_v27 = vpop.permute.xlu0 %1043  ;;  %4002 = vmatprep.subr.mxu0 %v1673_v56 }
 0x1c2   : > { %8358 = vst [vmem:[#allocation9_spill] sm:$0xff] %v5501_v27  ;;  %1225 = vrot.lane.b32.xlu1 %v8359_v10, %s4226_s6  ;;  %4003 = vmatpush3.msra.mxu0 %v1673_v56  ;;  %v1672_v10 = vld [vmem:[%s7974_s1 + $0x28] sm:$0xff]  ;;  %v8367_v56 = vld [vmem:[#allocation16_spill] sm:$0xff] }
 0x1c3   : > { %1231 = vrot.lane.b32.xlu0 %v8360_v45, %s4226_s6  ;;  %4004 = vmatprep.subr.mxu0 %v1672_v10  ;;  %v8364_v45 = vld [vmem:[#allocation15_spill] sm:$0xff] }
 0x1c4   : > { %v5510_v0 = vpop.permute.xlu1 %1041  ;;  %4005 = vmatpush3.msra.mxu0 %v1672_v10 }
 0x1c5   : > { %8361 = vst [vmem:[#allocation10_spill] sm:$0xff] %v5510_v0  ;;  %v5515_v27 = vpop.permute.xlu0 %1047  ;;  %4006 = vmatprep.subr.mxu0 %v1671_v55 }
 0x1c6   : > { %8362 = vst [vmem:[#allocation11_spill] sm:$0xff] %v5515_v27  ;;  %1229 = vrot.lane.b32.xlu1 %v8363_v1, %s4226_s6  ;;  %4007 = vmatpush3.msra.mxu0 %v1671_v55  ;;  %v1670_v1 = vld [vmem:[%s7974_s1 + $0x18] sm:$0xff]  ;;  %v8371_v55 = vld [vmem:[#allocation18_spill] sm:$0xff] }
 0x1c7   : > { %1235 = vrot.lane.b32.xlu0 %v8364_v45, %s4226_s6  ;;  %4008 = vmatprep.subr.mxu0 %v1670_v1  ;;  %v8368_v45 = vld [vmem:[#allocation17_spill] sm:$0xff] }
 0x1c8   : > { %v5524_v19 = vpop.permute.xlu1 %1045  ;;  %4009 = vmatpush3.msra.mxu0 %v1670_v1 }
 0x1c9   : > { %8365 = vst [vmem:[#allocation12_spill] sm:$0xff] %v5524_v19  ;;  %v5529_v27 = vpop.permute.xlu0 %1051  ;;  %v1669_v19 = vld [vmem:[%s7974_s1 + $0x10] sm:$0xff] }
 0x1ca   : > { %8366 = vst [vmem:[#allocation13_spill] sm:$0xff] %v5529_v27  ;;  %1233 = vrot.lane.b32.xlu1 %v8367_v56, %s4226_s6  ;;  %4010 = vmatprep.subr.mxu0 %v1669_v19  ;;  %v1668_v56 = vld [vmem:[%s7974_s1 + $0x8] sm:$0xff] }
 0x1cb   : > { %1239 = vrot.lane.b32.xlu0 %v8368_v45, %s4226_s6  ;;  %4011 = vmatpush3.msra.mxu0 %v1669_v19  ;;  %v8372_v45 = vld [vmem:[#allocation19_spill] sm:$0xff] }
 0x1cc   : > { %v5538_v10 = vpop.permute.xlu1 %1049  ;;  %4012 = vmatprep.subr.mxu0 %v1668_v56 }
 0x1cd   : > { %8369 = vst [vmem:[#allocation14_spill] sm:$0xff] %v5538_v10  ;;  %v5543_v27 = vpop.permute.xlu0 %1055  ;;  %4013 = vmatpush3.msra.mxu0 %v1668_v56  ;;  %v1667_v10 = vld [vmem:[%s7974_s1] sm:$0xff]  ;;  %v8377_v56 = vld [vmem:[#allocation22_spill] sm:$0xff] }
 0x1ce   : > { %8370 = vst [vmem:[#allocation15_spill] sm:$0xff] %v5543_v27  ;;  %1237 = vrot.lane.b32.xlu1 %v8371_v55, %s4226_s6  ;;  %4014 = vmatprep.subr.mxu0 %v1667_v10 }
 0x1cf   : > { %1243 = vrot.lane.b32.xlu0 %v8372_v45, %s4226_s6  ;;  %4015 = vmatpush3.msra.mxu0 %v1667_v10  ;;  %v8378_v45 = vld [vmem:[#allocation23_spill] sm:$0xff] }
 0x1d0   : > { %v5552_v1 = vpop.permute.xlu1 %1053 }
 0x1d1   : > { %8373 = vst [vmem:[#allocation16_spill] sm:$0xff] %v5552_v1  ;;  %v5557_v27 = vpop.permute.xlu0 %1059 }
 0x1d2   : > { %8374 = vst [vmem:[#allocation17_spill] sm:$0xff] %v5557_v27  ;;  %1241 = vrot.lane.b32.xlu1 %v8268_v49, %s4226_s6  ;;  %v8381_v49 = vld [vmem:[#allocation24_spill] sm:$0xff] }
 0x1d3   : > { %1247 = vrot.lane.b32.xlu0 %v8269_v22, %s4226_s6 }
 0x1d4   : > { %v5563_v19 = vpop.permute.xlu1 %1057 }
 0x1d5   : > { %8375 = vst [vmem:[#allocation18_spill] sm:$0xff] %v5563_v19  ;;  %v5565_v55 = vpop.permute.xlu0 %1063  ;;  %v8397_v19 = vld [vmem:[#allocation44_spill] sm:$0xff] }
 0x1d6   : > { %8376 = vst [vmem:[#allocation19_spill] sm:$0xff] %v5565_v55  ;;  %1245 = vrot.lane.b32.xlu1 %v8377_v56, %s4226_s6  ;;  %v8389_v55 = vld [vmem:[#allocation38_spill] sm:$0xff] }
 0x1d7   : > { %1251 = vrot.lane.b32.xlu0 %v8378_v45, %s4226_s6 }
 0x1d8   : > { %v5571_v1 = vpop.permute.xlu1 %1061 }
 0x1d9   : > { %8379 = vst [vmem:[#allocation22_spill] sm:$0xff] %v5571_v1  ;;  %v5573_v27 = vpop.permute.xlu0 %1067  ;;  %v8392_v1 = vld [vmem:[#allocation40_spill] sm:$0xff] }
 0x1da   : > { %8380 = vst [vmem:[#allocation23_spill] sm:$0xff] %v5573_v27  ;;  %1249 = vrot.lane.b32.xlu1 %v8381_v49, %s4226_s6 }
 0x1db   : > { %1310 = vrot.lane.b32.xlu0 %v8293_v43, %s4227_s10 }
 0x1dc   : > { %v5579_v22 = vpop.permute.xlu1 %1065 }
 0x1dd   : > { %8382 = vst [vmem:[#allocation24_spill] sm:$0xff] %v5579_v22  ;;  %v5581_v10 = vpop.permute.xlu0 %1105  ;;  %v8387_v22 = vld [vmem:[#allocation36_spill] sm:$0xff] }
 0x1de   : > { %1308 = vrot.lane.b32.xlu1 %v4719_v9, %s4227_s10 }
 0x1df   : > { %1314 = vrot.lane.b32.xlu0 %v8296_v31, %s4227_s10 }
 0x1e0   : > { %v5587_v56 = vpop.permute.xlu1 %1069 }
 0x1e1   : > { %8383 = vst [vmem:[#allocation155_spill] sm:$0xff] %v5587_v56  ;;  %v5589_v45 = vpop.permute.xlu0 %1109  ;;  %v8384_v56 = vld [vmem:[#allocation34_spill] sm:$0xff] }
 0x1e2   : > { %1312 = vrot.lane.b32.xlu1 %v4731_v37, %s4227_s10 }
 0x1e3   : > { %1318 = vrot.lane.b32.xlu0 %v8299_v17, %s4227_s10 }
 0x1e4   : > { %v5595_v43 = vpop.permute.xlu1 %1107 }
 0x1e5   : > { %v5597_v49 = vpop.permute.xlu0 %1113 }
 0x1e6   : > { %1316 = vrot.lane.b32.xlu1 %v4744_v42, %s4227_s10 }
 0x1e7   : > { %1322 = vrot.lane.b32.xlu0 %v8302_v16, %s4227_s10 }
 0x1e8   : > { %v5603_v9 = vpop.permute.xlu1 %1111 }
 0x1e9   : > { %v5605_v31 = vpop.permute.xlu0 %1117 }
 0x1ea   : > { %1320 = vrot.lane.b32.xlu1 %v4757_v51, %s4227_s10  ;;  %v8385_v51 = vld [vmem:[#allocation39_spill] sm:$0xff] }
 0x1eb   : > { %1326 = vrot.lane.b32.xlu0 %v8305_v18, %s4227_s10 }
 0x1ec   : > { %v5611_v37 = vpop.permute.xlu1 %1115 }
 0x1ed   : > { %v5613_v17 = vpop.permute.xlu0 %1121 }
 0x1ee   : > { %1324 = vrot.lane.b32.xlu1 %v4770_v59, %s4227_s10 }
 0x1ef   : > { %1330 = vrot.lane.b32.xlu0 %v8308_v33, %s4227_s10 }
 0x1f0   : > { %v5619_v16 = vpop.permute.xlu1 %1119 }
 0x1f1   : > { %v5621_v42 = vpop.permute.xlu0 %1125 }
 0x1f2   : > { %1328 = vrot.lane.b32.xlu1 %v8384_v56, %s4227_s10 }
 0x1f3   : > { %1334 = vrot.lane.b32.xlu0 %v8385_v51, %s4227_s10 }
 0x1f4   : > { %v5627_v18 = vpop.permute.xlu1 %1123 }
 0x1f5   : > { %v5629_v27 = vpop.permute.xlu0 %1129 }
 0x1f6   : > { %8386 = vst [vmem:[#allocation34_spill] sm:$0xff] %v5629_v27  ;;  %1332 = vrot.lane.b32.xlu1 %v8387_v22, %s4227_s10  ;;  %v8436_v27 = vld [vmem:[#allocation51_spill] sm:$0xff] }
 0x1f7   : > { %1338 = vrot.lane.b32.xlu0 %v8314_v61, %s4227_s10 }
 0x1f8   : > { %v5635_v33 = vpop.permute.xlu1 %1127 }
 0x1f9   : > { %v5637_v59 = vpop.permute.xlu0 %1133 }
 0x1fa   : > { %8388 = vst [vmem:[#allocation39_spill] sm:$0xff] %v5637_v59  ;;  %1336 = vrot.lane.b32.xlu1 %v8389_v55, %s4227_s10  ;;  %v8428_v59 = vld [vmem:[#allocation45_spill] sm:$0xff] }
 0x1fb   : > { %1342 = vrot.lane.b32.xlu0 %v8318_v26, %s4227_s10 }
 0x1fc   : > { %v5643_v56 = vpop.permute.xlu1 %1131 }
 0x1fd   : > { %8390 = vst [vmem:[#allocation36_spill] sm:$0xff] %v5643_v56  ;;  %v5645_v51 = vpop.permute.xlu0 %1137 }
 0x1fe   : > { %8391 = vst [vmem:[#allocation38_spill] sm:$0xff] %v5645_v51  ;;  %1340 = vrot.lane.b32.xlu1 %v8392_v1, %s4227_s10 }
 0x1ff   : > { %1346 = vrot.lane.b32.xlu0 %v4855_v53, %s4227_s10 }
 0x200   : > { %v5651_v61 = vpop.permute.xlu1 %1135 }
 0x201   : > { %8393 = vst [vmem:[#allocation40_spill] sm:$0xff] %v5651_v61  ;;  %v5653_v22 = vpop.permute.xlu0 %1141  ;;  %v4147_v61 = vld [vmem:[#allocation2] sm:$0xff] }
 0x202   : > { %8394 = vst [vmem:[#allocation156_spill] sm:$0xff] %v5653_v22  ;;  %1344 = vrot.lane.b32.xlu1 %v8315_v13, %s4227_s10  ;;  %v8400_v22 = vld [vmem:[#allocation26_spill] sm:$0xff]  ;;  %v8401_v13 = vld [vmem:[#allocation25_spill] sm:$0xff] }
 0x203   : > { %1350 = vrot.lane.b32.xlu0 %v4870_v5, %s4227_s10 }
 0x204   : > { %v5659_v26 = vpop.permute.xlu1 %1139 }
 0x205   : > { %8395 = vst [vmem:[#allocation157_spill] sm:$0xff] %v5659_v26  ;;  %v5661_v55 = vpop.permute.xlu0 %1145 }
 0x206   : > { %8396 = vst [vmem:[#allocation158_spill] sm:$0xff] %v5661_v55  ;;  %1348 = vrot.lane.b32.xlu1 %v8397_v19, %s4227_s10  ;;  %v8404_v55 = vld [vmem:[#allocation48_spill] sm:$0xff]  ;;  %v8405_v19 = vld [vmem:[#allocation46_spill] sm:$0xff] }
 0x207   : > { %1352 = vrot.lane.b32.xlu0 %v4861_v4, %s4227_s10 }
 0x208   : > { %v5667_v53 = vpop.permute.xlu1 %1143 }
 0x209   : > { %8398 = vst [vmem:[#allocation44_spill] sm:$0xff] %v5667_v53  ;;  %v5669_v1 = vpop.permute.xlu0 %1149 }
 0x20a   : > { %8399 = vst [vmem:[#allocation159_spill] sm:$0xff] %v5669_v1  ;;  %1253 = vrot.lane.b32.xlu1 %v8400_v22, %s4226_s6  ;;  %v8408_v1 = vld [vmem:[#allocation28_spill] sm:$0xff]  ;;  %v8409_v22 = vld [vmem:[#allocation27_spill] sm:$0xff] }
 0x20b   : > { %1255 = vrot.lane.b32.xlu0 %v8401_v13, %s4226_s6 }
 0x20c   : > { %v5675_v5 = vpop.permute.xlu1 %1147 }
 0x20d   : > { %8402 = vst [vmem:[#allocation26_spill] sm:$0xff] %v5675_v5  ;;  %v5677_v26 = vpop.permute.xlu0 %1153 }
 0x20e   : > { %8403 = vst [vmem:[#allocation25_spill] sm:$0xff] %v5677_v26  ;;  %1354 = vrot.lane.b32.xlu1 %v8404_v55, %s4227_s10  ;;  %v8418_v26 = vld [vmem:[#allocation114_spill] sm:$0xff] }
 0x20f   : > { %1356 = vrot.lane.b32.xlu0 %v8405_v19, %s4227_s10 }
 0x210   : > { %v5683_v4 = vpop.permute.xlu1 %1151 }
 0x211   : > { %8406 = vst [vmem:[#allocation48_spill] sm:$0xff] %v5683_v4  ;;  %v5685_v53 = vpop.permute.xlu0 %1157 }
 0x212   : > { %8407 = vst [vmem:[#allocation46_spill] sm:$0xff] %v5685_v53  ;;  %1257 = vrot.lane.b32.xlu1 %v8408_v1, %s4226_s6  ;;  %v8414_v53 = vld [vmem:[#allocation29_spill] sm:$0xff]  ;;  %v8415_v1 = vld [vmem:[#allocation110_spill] sm:$0xff] }
 0x213   : > { %1259 = vrot.lane.b32.xlu0 %v8409_v22, %s4226_s6 }
 0x214   : > { %v5691_v13 = vpop.permute.xlu1 %1155 }
 0x215   : > { %8410 = vst [vmem:[#allocation28_spill] sm:$0xff] %v5691_v13  ;;  %v5693_v5 = vpop.permute.xlu0 %1161  ;;  %v1203_v13 = vrot.slane %v5452_v60, 1 }
 0x216   : > { %8411 = vst [vmem:[#allocation27_spill] sm:$0xff] %v5693_v5  ;;  %1358 = vrot.lane.b32.xlu1 %v4900_v58, %s4227_s10  ;;  %v1202_v5 = vrot.slane %v5438_v12, 1 }
 0x217   : > { %1360 = vrot.lane.b32.xlu0 %v4893_v24, %s4227_s10 }
 0x218   : > { %v5699_v55 = vpop.permute.xlu1 %1159 }
 0x219   : > { %8412 = vst [vmem:[#allocation160_spill] sm:$0xff] %v5699_v55  ;;  %v5701_v19 = vpop.permute.xlu0 %1165 }
 0x21a   : > { %8413 = vst [vmem:[#allocation161_spill] sm:$0xff] %v5701_v19  ;;  %1261 = vrot.lane.b32.xlu1 %v8414_v53, %s4226_s6  ;;  %v399_v53 = vld [vmem:[#allocation2 + $0x1a8] sm:$0x3]  ;;  %v1303_v19 = vrot.slane %v5438_v12, 2 }
 0x21b   : > { %1263 = vrot.lane.b32.xlu0 %v8415_v1, %s4226_s6  ;;  %v1304_v1 = vrot.slane %v5452_v60, 2  ;;  %v1205_v4 = vrot.slane %v399_v53, 1  ;;  %v1306_v60 = vrot.slane %v399_v53, 2 }
 0x21c   : > { %v5707_v22 = vpop.permute.xlu1 %1163 }
 0x21d   : > { %8416 = vst [vmem:[#allocation29_spill] sm:$0xff] %v5707_v22  ;;  %v5711_v58 = vpop.permute.xlu0 %1207  ;;  %v1204_v22 = vsel %vm448_vm2, %v1202_v5, %v1203_v13  ;;  %v1206_v12 = vsel %vm448_vm2, %v1203_v13, %v1205_v4 }
 0x21e   : > { %1362 = vrot.lane.b32.xlu1 %v4912_v11, %s4227_s10 }
 0x21f   : > { %1364 = vrot.lane.b32.xlu0 %v5304_v34, %s4227_s10  ;;  %v1305_v34 = vsel %vm625_vm3, %v1303_v19, %v1304_v1 }
 0x220   : > { %v5717_v24 = vpop.permute.xlu1 %1167 }
 0x221   : > { %8417 = vst [vmem:[#allocation110_spill] sm:$0xff] %v5717_v24  ;;  %v5722_v55 = vpop.permute.xlu0 %1211 }
 0x222   : > { %1265 = vrot.lane.b32.xlu1 %v8418_v26, %s4226_s6 }
 0x223   : > { %1267 = vrot.lane.b32.xlu0 %v1204_v22, %s4226_s6  ;;  %v1307_v22 = vsel %vm625_vm3, %v1304_v1, %v1306_v60 }
 0x224   : > { %v5727_v11 = vpop.permute.xlu1 %1209 }
 0x225   : > { %v5730_v24 = vpop.permute.xlu0 %1215 }
 0x226   : > { %1366 = vrot.lane.b32.xlu1 %v5320_v23, %s4227_s10 }
 0x227   : > { %1368 = vrot.lane.b32.xlu0 %v1305_v34, %s4227_s10 }
 0x228   : > { %v5736_v5 = vpop.permute.xlu1 %1213 }
 0x229   : > { %v5738_v26 = vpop.permute.xlu0 %1219 }
 0x22a   : > { %1269 = vrot.lane.b32.xlu1 %v1206_v12, %s4226_s6 }
 0x22c   : > { %v5742_v51 = vpop.permute.xlu1 %1217 }
 0x22d   : > { %v5744_v19 = vpop.permute.xlu0 %1223 }
 0x22e   : > { %1370 = vrot.lane.b32.xlu1 %v1307_v22, %s4227_s10 }
 0x230   : > { %v5747_v23 = vpop.permute.xlu1 %1221 }
 0x231   : > { %v5749_v4 = vpop.permute.xlu0 %1227 }
 0x234   : > { %v5751_v13 = vpop.permute.xlu1 %1225 }
 0x235   : > { %v5753_v53 = vpop.permute.xlu0 %1231 }
 0x236   : > { %8419 = vst [vmem:[#allocation114_spill] sm:$0xff] %v5753_v53 }
 0x238   : > { %v5755_v34 = vpop.permute.xlu1 %1229 }
 0x239   : > { %v5757_v0 = vpop.permute.xlu0 %1235 }
 0x23a   : > { %8420 = vst [vmem:[#allocation162_spill] sm:$0xff] %v5757_v0  ;;  %v1404_v0 = vsel %vm225_vm0, %v4147_v61, %v8428_v59  ;;  %v8434_v59 = vld [vmem:[#allocation81_spill] sm:$0xff] }
 0x23c   : > { %v5759_v12 = vpop.permute.xlu1 %1233 }
 0x23d   : > { %8421 = vst [vmem:[#allocation163_spill] sm:$0xff] %v5759_v12  ;;  %v5761_v1 = vpop.permute.xlu0 %1239 }
 0x23e   : > { %8422 = vst [vmem:[#allocation164_spill] sm:$0xff] %v5761_v1  ;;  %v4148_v1 = vld [vmem:[#allocation2 + $0x8] sm:$0xff] }
 0x240   : > { %v5763_v60 = vpop.permute.xlu1 %1237 }
 0x241   : > { %8423 = vst [vmem:[#allocation165_spill] sm:$0xff] %v5763_v60  ;;  %v5765_v20 = vpop.permute.xlu0 %1243  ;;  %v1405_v60 = vsel %vm225_vm0, %v4148_v1, %v8430_v28  ;;  %v4151_v1 = vld [vmem:[#allocation2 + $0x20] sm:$0xff] }
 0x242   : > { %8424 = vst [vmem:[#allocation166_spill] sm:$0xff] %v5765_v20  ;;  %v4149_v20 = vld [vmem:[#allocation2 + $0x18] sm:$0xff]  ;;  %v1438_v61 = vsel %vm1436_vm4, %v1405_v60, %v8434_v59 }
 0x243   : > { %v8440_v59 = vld [vmem:[#allocation80_spill] sm:$0xff] }
 0x244   : > { %v5767_v22 = vpop.permute.xlu1 %1241 }
 0x245   : > { %8425 = vst [vmem:[#allocation167_spill] sm:$0xff] %v5767_v22  ;;  %v5769_v48 = vpop.permute.xlu0 %1247  ;;  %v1406_v22 = vsel %vm225_vm0, %v4149_v20, %v8431_v41  ;;  %v1407_v41 = vsel %vm225_vm0, %v4151_v1, %v8436_v27  ;;  %v8437_v20 = vld [vmem:[#allocation109_spill] sm:$0xff] }
 0x246   : > { %8426 = vst [vmem:[#allocation168_spill] sm:$0xff] %v5769_v48  ;;  %v8432_v48 = vld [vmem:[#allocation78_spill] sm:$0xff] }
 0x247   : > { %v1437_v12 = vsel %vm1436_vm4, %v1404_v0, %v8432_v48  ;;  %v1471_v48 = vsel %vm1469_vm5, %v1438_v61, %v8437_v20  ;;  %v8438_v0 = vld [vmem:[#allocation131_spill] sm:$0xff] }
 0x248   : > { %v5771_v47 = vpop.permute.xlu1 %1245  ;;  %v8441_v20 = vld [vmem:[#allocation83_spill] sm:$0xff] }
 0x249   : > { %8427 = vst [vmem:[#allocation169_spill] sm:$0xff] %v5771_v47  ;;  %v5775_v44 = vpop.permute.xlu0 %1251  ;;  %v4150_v47 = vld [vmem:[#allocation2 + $0x30] sm:$0xff] }
 0x24a   : > { %8429 = vst [vmem:[#allocation45_spill] sm:$0xff] %v5775_v44  ;;  %v1408_v53 = vsel %vm225_vm0, %v4150_v47, %v8433_v6  ;;  %v8435_v44 = vld [vmem:[#allocation106_spill] sm:$0xff]  ;;  %v8439_v47 = vld [vmem:[#allocation52_spill] sm:$0xff] }
 0x24b   : > { %v1470_v56 = vsel %vm1469_vm5, %v1437_v12, %v8435_v44  ;;  %v4152_v6 = vld [vmem:[#allocation2 + $0x48] sm:$0xff]  ;;  %v1439_v44 = vsel %vm1436_vm4, %v1406_v22, %v8440_v59  ;;  %v1504_v12 = vsel %vm1502_vm6, %v1471_v48, %v5301_v36  ;;  %v8443_v48 = vld [vmem:[#allocation112_spill] sm:$0xff] }
 0x24c   : > { %v5789_v28 = vpop.permute.xlu1 %1249  ;;  %v1503_v57 = vsel %vm1502_vm6, %v1470_v56, %v8438_v0  ;;  %v1410_v60 = vsel %vm225_vm0, %v4152_v6, %v8439_v47  ;;  %v1537_v61 = vsel %vm1535_vm7, %v1504_v12, %v5436_v39  ;;  %v1440_v0 = vsel %vm1436_vm4, %v1407_v41, %v8441_v20  ;;  %v8442_v6 = vld [vmem:[#allocation108_spill] sm:$0xff]  ;;  %v8444_v47 = vld [vmem:[#allocation133_spill] sm:$0xff] }
 0x24d   : > { %v1536_v27 = vsel %vm1535_vm7, %v1503_v57, %v5422_v38  ;;  %v1311_v1 = vpop.permute.xlu0 %1310  ;;  %v1472_v22 = vsel %vm1469_vm5, %v1439_v44, %v8442_v6  ;;  %v1570_v36 = vsel %vm1568_vm8, %v1537_v61, %v5595_v43  ;;  %v1473_v39 = vsel %vm1469_vm5, %v1440_v0, %v8443_v48  ;;  %v4153_v12 = vld [vmem:[#allocation2 + $0x38] sm:$0xff]  ;;  %v8445_v44 = vld [vmem:[#allocation53_spill] sm:$0xff]  ;;  %v8446_v43 = vld [vmem:[#allocation135_spill] sm:$0xff] }
 0x24e   : > { %v1569_v56 = vsel %vm1568_vm8, %v1536_v27, %v5581_v10  ;;  %v1505_v10 = vsel %vm1502_vm6, %v1472_v22, %v8444_v47  ;;  %v1603_v59 = vsel %vm1601_vm9, %v1570_v36, %v5727_v11  ;;  %v1409_v27 = vsel %vm225_vm0, %v4153_v12, %v8445_v44  ;;  %v4154_v0 = vld [vmem:[#allocation2 + $0x60] sm:$0xff]  ;;  %v8447_v6 = vld [vmem:[#allocation54_spill] sm:$0xff]  ;;  %v8450_v48 = vld [vmem:[#allocation111_spill] sm:$0xff] }
 0x24f   : > { %v1602_v38 = vsel %vm1601_vm9, %v1569_v56, %v5711_v58  ;;  %v1506_v61 = vsel %vm1502_vm6, %v1473_v39, %v8446_v43  ;;  %v1538_v58 = vsel %vm1535_vm7, %v1505_v10, %v5430_v15  ;;  %v1636_v56 = vsel %vm1634_vm10, %v1603_v59, %v1311_v1  ;;  %v8448_v22 = vld [vmem:[#allocation82_spill] sm:$0xff]  ;;  %v8449_v15 = vld [vmem:[#allocation85_spill] sm:$0xff]  ;;  %v8451_v59 = vld [vmem:[#allocation115_spill] sm:$0xff] }
 0x250   : > { %v1309_v57 = vpop.permute.xlu1 %1308  ;;  %v1412_v11 = vsel %vm225_vm0, %v4154_v0, %v8447_v6  ;;  %v1441_v36 = vsel %vm1436_vm4, %v1408_v53, %v8448_v22  ;;  %v1442_v1 = vsel %vm1436_vm4, %v1409_v27, %v8449_v15  ;;  %v4155_v27 = vld [vmem:[#allocation2 + $0x50] sm:$0xff]  ;;  %v4156_v0 = vld [vmem:[#allocation2 + $0x78] sm:$0xff] }
 0x251   : > { %v1635_v41 = vsel %vm1634_vm10, %v1602_v38, %v1309_v57  ;;  %v1315_v20 = vpop.permute.xlu0 %1314  ;;  %v1539_v38 = vsel %vm1535_vm7, %v1506_v61, %v5446_v21  ;;  %v1571_v57 = vsel %vm1568_vm8, %v1538_v58, %v5589_v45  ;;  %v1474_v39 = vsel %vm1469_vm5, %v1441_v36, %v8450_v48  ;;  %v8453_v43 = vld [vmem:[#allocation55_spill] sm:$0xff]  ;;  %v8454_v6 = vld [vmem:[#allocation56_spill] sm:$0xff] }
 0x252   : > { %4016 = vmatprep.mubr.msk.f32.mxu0 %vm1683_vm11, %v1635_v41  ;;  %v1572_v47 = vsel %vm1568_vm8, %v1539_v38, %v5603_v9  ;;  %v1604_v53 = vsel %vm1601_vm9, %v1571_v57, %v5722_v55  ;;  %v1475_v21 = vsel %vm1469_vm5, %v1442_v1, %v8451_v59  ;;  %v8452_v41 = vld [vmem:[#allocation134_spill] sm:$0xff]  ;;  %v1411_v61 = vsel %vm225_vm0, %v4155_v27, %v8453_v43  ;;  %v8455_v22 = vld [vmem:[#allocation84_spill] sm:$0xff]  ;;  %v8457_v57 = vld [vmem:[#allocation113_spill] sm:$0xff] }
 0x253   : > { %4017 = vmatmul.mubr.msk.f32.vlgmr.msra.gmra.mxu0 %vm1683_vm11, %v1636_v56  ;;  %v1507_v45 = vsel %vm1502_vm6, %v1474_v39, %v8452_v41  ;;  %v1605_v12 = vsel %vm1601_vm9, %v1572_v47, %v5736_v5  ;;  %v1508_v9 = vsel %vm1502_vm6, %v1475_v21, %v5324_v8  ;;  %v1414_v5 = vsel %vm225_vm0, %v4156_v0, %v8454_v6  ;;  %v8458_v39 = vld [vmem:[#allocation117_spill] sm:$0xff]  ;;  %v8459_v47 = vld [vmem:[#allocation136_spill] sm:$0xff]  ;;  %v4157_v59 = vld [vmem:[#allocation2 + $0x68] sm:$0xff] }
 0x254   : > { %v1313_v10 = vpop.permute.xlu1 %1312  ;;  %v1540_v55 = vsel %vm1535_vm7, %v1507_v45, %v5440_v14  ;;  %v1638_v58 = vsel %vm1634_vm10, %v1605_v12, %v1315_v20  ;;  %v1443_v36 = vsel %vm1436_vm4, %v1410_v60, %v8455_v22  ;;  %v1541_v38 = vsel %vm1535_vm7, %v1508_v9, %v5456_v30  ;;  %v8456_v14 = vld [vmem:[#allocation87_spill] sm:$0xff]  ;;  %v8460_v21 = vld [vmem:[#allocation57_spill] sm:$0xff]  ;;  %v8461_v27 = vld [vmem:[#allocation58_spill] sm:$0xff] }
 0x255   : > { %v1637_v44 = vsel %vm1634_vm10, %v1604_v53, %v1313_v10  ;;  %v1319_v56 = vpop.permute.xlu0 %1318  ;;  %v1573_v8 = vsel %vm1568_vm8, %v1540_v55, %v5597_v49  ;;  %v1444_v20 = vsel %vm1436_vm4, %v1411_v61, %v8456_v14  ;;  %v1476_v15 = vsel %vm1469_vm5, %v1443_v36, %v8457_v57  ;;  %v8462_v43 = vld [vmem:[#allocation86_spill] sm:$0xff]  ;;  %v8465_v22 = vld [vmem:[#allocation119_spill] sm:$0xff] }
 0x256   : > { %4019 = vmatprep.mubr.msk.f32.mxu0 %vm1683_vm11, %v1637_v44  ;;  %v1574_v1 = vsel %vm1568_vm8, %v1541_v38, %v5611_v37  ;;  %v1606_v60 = vsel %vm1601_vm9, %v1573_v8, %v5730_v24  ;;  %v1477_v30 = vsel %vm1469_vm5, %v1444_v20, %v8458_v39  ;;  %v1509_v49 = vsel %vm1502_vm6, %v1476_v15, %v8459_v47  ;;  %v4158_v44 = vld [vmem:[#allocation2 + $0x90] sm:$0xff]  ;;  %v4159_v8 = vld [vmem:[#allocation2 + $0x80] sm:$0xff]  ;;  %v8470_v47 = vld [vmem:[#allocation118_spill] sm:$0xff] }
 0x257   : > { %4020 = vmatmul.mubr.msk.f32.gmra.mxu0 %vm1683_vm11, %v1638_v58  ;;  %v1607_v53 = vsel %vm1601_vm9, %v1574_v1, %v5742_v51  ;;  %v1413_v41 = vsel %vm225_vm0, %v4157_v59, %v8460_v21  ;;  %v1510_v37 = vsel %vm1502_vm6, %v1477_v30, %v5332_v52  ;;  %v1542_v24 = vsel %vm1535_vm7, %v1509_v49, %v5448_v62  ;;  %v8463_v62 = vld [vmem:[#allocation3_spill] sm:$0xff]  ;;  %v8464_v58 = vld [vmem:[#allocation116_spill] sm:$0xff]  ;;  %v8471_v59 = vld [vmem:[#allocation30_spill] sm:$0xff] }
 0x258   : > { %v1317_v48 = vpop.permute.xlu1 %1316  ;;  %v1640_v45 = vsel %vm1634_vm10, %v1607_v53, %v1319_v56  ;;  %v1416_v51 = vsel %vm225_vm0, %v4158_v44, %v8461_v27  ;;  %v1445_v61 = vsel %vm1436_vm4, %v1412_v11, %v8462_v43  ;;  %v1543_v9 = vsel %vm1535_vm7, %v1510_v37, %v5464_v25  ;;  %v8466_v14 = vld [vmem:[#allocation59_spill] sm:$0xff]  ;;  %v8467_v1 = vld [vmem:[#allocation60_spill] sm:$0xff]  ;;  %v8473_v27 = vld [vmem:[#allocation62_spill] sm:$0xff] }
 0x259   : > { %v1639_v10 = vsel %vm1634_vm10, %v1606_v60, %v1317_v48  ;;  %v1323_v12 = vpop.permute.xlu0 %1322  ;;  %v1575_v52 = vsel %vm1568_vm8, %v1542_v24, %v5605_v31  ;;  %v1446_v55 = vsel %vm1436_vm4, %v1413_v41, %v8463_v62  ;;  %v1478_v56 = vsel %vm1469_vm5, %v1445_v61, %v8464_v58  ;;  %v8468_v60 = vld [vmem:[#allocation88_spill] sm:$0xff]  ;;  %v8472_v24 = vld [vmem:[#allocation61_spill] sm:$0xff] }
 0x25a   : > { %4022 = vmatprep.mubr.msk.f32.mxu0 %vm1683_vm11, %v1639_v10  ;;  %v1576_v0 = vsel %vm1568_vm8, %v1543_v9, %v5619_v16  ;;  %v1608_v11 = vsel %vm1601_vm9, %v1575_v52, %v5738_v26  ;;  %v1479_v25 = vsel %vm1469_vm5, %v1446_v55, %v8465_v22  ;;  %v1511_v31 = vsel %vm1502_vm6, %v1478_v56, %v5326_v29  ;;  %v4160_v29 = vld [vmem:[#allocation2 + $0xa8] sm:$0xff]  ;;  %v4161_v37 = vld [vmem:[#allocation2 + $0x98] sm:$0xff]  ;;  %v8474_v43 = vld [vmem:[#allocation89_spill] sm:$0xff] }
 0x25b   : > { %4023 = vmatmul.mubr.msk.f32.gmra.mxu0 %vm1683_vm11, %v1640_v45  ;;  %v1609_v36 = vsel %vm1601_vm9, %v1576_v0, %v5747_v23  ;;  %v1415_v20 = vsel %vm225_vm0, %v4159_v8, %v8466_v14  ;;  %v1512_v16 = vsel %vm1502_vm6, %v1479_v25, %v5340_v32  ;;  %v1544_v26 = vsel %vm1535_vm7, %v1511_v31, %v5458_v3  ;;  %v8469_v3 = vld [vmem:[#allocation4_spill] sm:$0xff]  ;;  %v8477_v0 = vld [vmem:[#allocation31_spill] sm:$0xff]  ;;  %v8480_v14 = vld [vmem:[#allocation90_spill] sm:$0xff] }
 0x25c   : > { %v1321_v6 = vpop.permute.xlu1 %1320  ;;  %v1642_v57 = vsel %vm1634_vm10, %v1609_v36, %v1323_v12  ;;  %v1418_v23 = vsel %vm225_vm0, %v4160_v29, %v8467_v1  ;;  %v1447_v48 = vsel %vm1436_vm4, %v1414_v5, %v8468_v60  ;;  %v1545_v39 = vsel %vm1535_vm7, %v1512_v16, %v5472_v46  ;;  %v8476_v62 = vld [vmem:[#allocation120_spill] sm:$0xff]  ;;  %v4163_v22 = vld [vmem:[#allocation2 + $0xb0] sm:$0xff]  ;;  %v8481_v16 = vld [vmem:[#allocation6_spill] sm:$0xff] }
 0x25d   : > { %v1641_v38 = vsel %vm1634_vm10, %v1608_v11, %v1321_v6  ;;  %v1327_v15 = vpop.permute.xlu0 %1326  ;;  %v1577_v32 = vsel %vm1568_vm8, %v1544_v26, %v5613_v17  ;;  %v1448_v30 = vsel %vm1436_vm4, %v1415_v20, %v8469_v3  ;;  %v1480_v49 = vsel %vm1469_vm5, %v1447_v48, %v8470_v47  ;;  %v8478_v25 = vld [vmem:[#allocation63_spill] sm:$0xff]  ;;  %v8479_v8 = vld [vmem:[#allocation64_spill] sm:$0xff]  ;;  %v8484_v29 = vld [vmem:[#allocation121_spill] sm:$0xff] }
 0x25e   : > { %4025 = vmatprep.mubr.msk.f32.mxu0 %vm1683_vm11, %v1641_v38  ;;  %v1578_v53 = vsel %vm1568_vm8, %v1545_v39, %v5627_v18  ;;  %v1610_v5 = vsel %vm1601_vm9, %v1577_v32, %v5744_v19  ;;  %v1481_v46 = vsel %vm1469_vm5, %v1448_v30, %v8471_v59  ;;  %v1513_v17 = vsel %vm1502_vm6, %v1480_v49, %v5334_v7  ;;  %v4162_v7 = vld [vmem:[#allocation2 + $0xc0] sm:$0xff]  ;;  %v8485_v60 = vld [vmem:[#allocation36_spill] sm:$0xff]  ;;  %v8486_v39 = vld [vmem:[#allocation114_spill] sm:$0xff] }
 0x25f   : > { %4026 = vmatmul.mubr.msk.f32.gmra.mxu0 %vm1683_vm11, %v1642_v57  ;;  %v1611_v21 = vsel %vm1601_vm9, %v1578_v53, %v5751_v13  ;;  %v1417_v45 = vsel %vm225_vm0, %v4161_v37, %v8472_v24  ;;  %v1514_v18 = vsel %vm1502_vm6, %v1481_v46, %v5348_v40  ;;  %v1546_v19 = vsel %vm1535_vm7, %v1513_v17, %v5466_v2  ;;  %v8475_v2 = vld [vmem:[#allocation91_spill] sm:$0xff]  ;;  %v8482_v57 = vld [vmem:[#allocation34_spill] sm:$0xff]  ;;  %v8487_v3 = vld [vmem:[#allocation32_spill] sm:$0xff] }
 0x260   : > { %v1325_v10 = vpop.permute.xlu1 %1324  ;;  %v1644_v12 = vsel %vm1634_vm10, %v1611_v21, %v1327_v15  ;;  %v1420_v13 = vsel %vm225_vm0, %v4162_v7, %v8473_v27  ;;  %v1449_v61 = vsel %vm1436_vm4, %v1416_v51, %v8474_v43  ;;  %v1547_v9 = vsel %vm1535_vm7, %v1514_v18, %v5480_v50  ;;  %v8488_v47 = vld [vmem:[#allocation137_spill] sm:$0xff]  ;;  %v8489_v53 = vld [vmem:[#allocation163_spill] sm:$0xff]  ;;  %v4165_v59 = vld [vmem:[#allocation2 + $0xc8] sm:$0xff] }
 0x261   : > { %v1643_v41 = vsel %vm1634_vm10, %v1610_v5, %v1325_v10  ;;  %v1331_v44 = vpop.permute.xlu0 %1330  ;;  %v1579_v40 = vsel %vm1568_vm8, %v1546_v19, %v5621_v42  ;;  %v1450_v52 = vsel %vm1436_vm4, %v1417_v45, %v8475_v2  ;;  %v1482_v55 = vsel %vm1469_vm5, %v1449_v61, %v8476_v62  ;;  %v8490_v46 = vld [vmem:[#allocation65_spill] sm:$0xff]  ;;  %v8491_v21 = vld [vmem:[#allocation139_spill] sm:$0xff]  ;;  %v8494_v7 = vld [vmem:[#allocation92_spill] sm:$0xff] }
 0x262   : > { %4028 = vmatprep.mubr.msk.f32.mxu0 %vm1683_vm11, %v1643_v41  ;;  %v1580_v58 = vsel %vm1568_vm8, %v1547_v9, %v5635_v33  ;;  %v1612_v51 = vsel %vm1601_vm9, %v1579_v40, %v5749_v4  ;;  %v1483_v50 = vsel %vm1469_vm5, %v1450_v52, %v8477_v0  ;;  %v1515_v42 = vsel %vm1502_vm6, %v1482_v55, %v5342_v54  ;;  %v4164_v54 = vld [vmem:[#allocation2 + $0xd8] sm:$0xff]  ;;  %v8492_v37 = vld [vmem:[#allocation5_spill] sm:$0xff]  ;;  %v4166_v19 = vld [vmem:[#allocation2 + $0xf0] sm:$0xff] }
 0x263   : > { %4029 = vmatmul.mubr.msk.f32.gmra.mxu0 %vm1683_vm11, %v1644_v12  ;;  %v1613_v11 = vsel %vm1601_vm9, %v1580_v58, %v5755_v34  ;;  %v1419_v31 = vsel %vm225_vm0, %v4163_v22, %v8478_v25  ;;  %v1516_v33 = vsel %vm1502_vm6, %v1483_v50, %v5356_v35  ;;  %v1548_v4 = vsel %vm1535_vm7, %v1515_v42, %v5474_v63  ;;  %v8483_v63 = vld [vmem:[#allocation93_spill] sm:$0xff]  ;;  %v8493_v12 = vld [vmem:[#allocation66_spill] sm:$0xff]  ;;  %v8495_v43 = vld [vmem:[#allocation8_spill] sm:$0xff] }
 0x264   : > { %v1329_v56 = vpop.permute.xlu1 %1328  ;;  %v1646_v36 = vsel %vm1634_vm10, %v1613_v11, %v1331_v44  ;;  %v1422_v34 = vsel %vm225_vm0, %v4164_v54, %v8479_v8  ;;  %v1451_v20 = vsel %vm1436_vm4, %v1418_v23, %v8480_v14  ;;  %v1549_v26 = vsel %vm1535_vm7, %v1516_v33, %v8481_v16  ;;  %v8496_v9 = vld [vmem:[#allocation39_spill] sm:$0xff]  ;;  %v8498_v62 = vld [vmem:[#allocation122_spill] sm:$0xff]  ;;  %v8499_v58 = vld [vmem:[#allocation40_spill] sm:$0xff] }
 0x265   : > { %v1645_v6 = vsel %vm1634_vm10, %v1612_v51, %v1329_v56  ;;  %v1335_v38 = vpop.permute.xlu0 %1334  ;;  %v1581_v35 = vsel %vm1568_vm8, %v1548_v4, %v8482_v57  ;;  %v1452_v15 = vsel %vm1436_vm4, %v1419_v31, %v8483_v63  ;;  %v1484_v1 = vsel %vm1469_vm5, %v1451_v20, %v8484_v29  ;;  %v8497_v2 = vld [vmem:[#allocation95_spill] sm:$0xff]  ;;  %v8500_v56 = vld [vmem:[#allocation162_spill] sm:$0xff]  ;;  %v8501_v50 = vld [vmem:[#allocation33_spill] sm:$0xff] }
 0x266   : > { %4031 = vmatprep.mubr.msk.f32.mxu0 %vm1683_vm11, %v1645_v6  ;;  %v1582_v48 = vsel %vm1568_vm8, %v1549_v26, %v8485_v60  ;;  %v1614_v23 = vsel %vm1601_vm9, %v1581_v35, %v8486_v39  ;;  %v1485_v30 = vsel %vm1469_vm5, %v1452_v15, %v8487_v3  ;;  %v1517_v49 = vsel %vm1502_vm6, %v1484_v1, %v8488_v47  ;;  %v8502_v11 = vld [vmem:[#allocation138_spill] sm:$0xff]  ;;  %v8503_v22 = vld [vmem:[#allocation165_spill] sm:$0xff]  ;;  %v8504_v4 = vld [vmem:[#allocation67_spill] sm:$0xff] }
 0x267   : > { %4032 = vmatmul.mubr.msk.f32.gmra.mxu0 %vm1683_vm11, %v1646_v36  ;;  %v1615_v5 = vsel %vm1601_vm9, %v1582_v48, %v8489_v53  ;;  %v1421_v17 = vsel %vm225_vm0, %v4165_v59, %v8490_v46  ;;  %v1518_v41 = vsel %vm1502_vm6, %v1485_v30, %v8491_v21  ;;  %v1550_v24 = vsel %vm1535_vm7, %v1517_v49, %v8492_v37  ;;  %v4167_v33 = vld [vmem:[#allocation2 + $0xe0] sm:$0xff]  ;;  %v8506_v8 = vld [vmem:[#allocation7_spill] sm:$0xff]  ;;  %v4168_v26 = vld [vmem:[#allocation2 + $0x108] sm:$0xff] }
 0x268   : > { %v1333_v32 = vpop.permute.xlu1 %1332  ;;  %v1648_v45 = vsel %vm1634_vm10, %v1615_v5, %v1335_v38  ;;  %v1424_v44 = vsel %vm225_vm0, %v4166_v19, %v8493_v12  ;;  %v1453_v27 = vsel %vm1436_vm4, %v1420_v13, %v8494_v7  ;;  %v1551_v61 = vsel %vm1535_vm7, %v1518_v41, %v8495_v43  ;;  %v8505_v38 = vld [vmem:[#allocation141_spill] sm:$0xff]  ;;  %v8507_v57 = vld [vmem:[#allocation68_spill] sm:$0xff]  ;;  %v8508_v63 = vld [vmem:[#allocation94_spill] sm:$0xff] }
 0x269   : > { %v1647_v10 = vsel %vm1634_vm10, %v1614_v23, %v1333_v32  ;;  %v1339_v18 = vpop.permute.xlu0 %1338  ;;  %v1583_v40 = vsel %vm1568_vm8, %v1550_v24, %v8496_v9  ;;  %v1454_v52 = vsel %vm1436_vm4, %v1421_v17, %v8497_v2  ;;  %v1486_v55 = vsel %vm1469_vm5, %v1453_v27, %v8498_v62  ;;  %v8509_v29 = vld [vmem:[#allocation10_spill] sm:$0xff]  ;;  %v8511_v39 = vld [vmem:[#allocation97_spill] sm:$0xff]  ;;  %v8512_v32 = vld [vmem:[#allocation123_spill] sm:$0xff] }
 0x26a   : > { %4034 = vmatprep.mubr.msk.f32.mxu0 %vm1683_vm11, %v1647_v10  ;;  %v1584_v51 = vsel %vm1568_vm8, %v1551_v61, %v8499_v58  ;;  %v1616_v13 = vsel %vm1601_vm9, %v1583_v40, %v8500_v56  ;;  %v1487_v42 = vsel %vm1469_vm5, %v1454_v52, %v8501_v50  ;;  %v1519_v6 = vsel %vm1502_vm6, %v1486_v55, %v8502_v11  ;;  %v8510_v60 = vld [vmem:[#allocation38_spill] sm:$0xff]  ;;  %v8513_v30 = vld [vmem:[#allocation157_spill] sm:$0xff]  ;;  %v8514_v49 = vld [vmem:[#allocation164_spill] sm:$0xff] }
 0x26b   : > { %4035 = vmatmul.mubr.msk.f32.gmra.mxu0 %vm1683_vm11, %v1648_v45  ;;  %v1617_v25 = vsel %vm1601_vm9, %v1584_v51, %v8503_v22  ;;  %v1423_v36 = vsel %vm225_vm0, %v4167_v33, %v8504_v4  ;;  %v1520_v54 = vsel %vm1502_vm6, %v1487_v42, %v8505_v38  ;;  %v1552_v14 = vsel %vm1535_vm7, %v1519_v6, %v8506_v8  ;;  %v8515_v5 = vld [vmem:[#allocation35_spill] sm:$0xff]  ;;  %v8516_v59 = vld [vmem:[#allocation140_spill] sm:$0xff]  ;;  %v8518_v24 = vld [vmem:[#allocation69_spill] sm:$0xff] }
 0x26c   : > { %v1337_v0 = vpop.permute.xlu1 %1336  ;;  %v1650_v20 = vsel %vm1634_vm10, %v1617_v25, %v1339_v18  ;;  %v1426_v35 = vsel %vm225_vm0, %v4168_v26, %v8507_v57  ;;  %v1455_v15 = vsel %vm1436_vm4, %v1422_v34, %v8508_v63  ;;  %v1553_v1 = vsel %vm1535_vm7, %v1520_v54, %v8509_v29  ;;  %v8517_v17 = vld [vmem:[#allocation167_spill] sm:$0xff]  ;;  %v4169_v37 = vld [vmem:[#allocation2 + $0xf8] sm:$0xff]  ;;  %v8520_v12 = vld [vmem:[#allocation9_spill] sm:$0xff] }
 0x26d   : > { %v1649_v31 = vsel %vm1634_vm10, %v1616_v13, %v1337_v0  ;;  %v1343_v16 = vpop.permute.xlu0 %1342  ;;  %v1585_v48 = vsel %vm1568_vm8, %v1552_v14, %v8510_v60  ;;  %v1456_v23 = vsel %vm1436_vm4, %v1423_v36, %v8511_v39  ;;  %v1488_v3 = vsel %vm1469_vm5, %v1455_v15, %v8512_v32  ;;  %v8519_v18 = vld [vmem:[#allocation143_spill] sm:$0xff]  ;;  %v8521_v61 = vld [vmem:[#allocation96_spill] sm:$0xff]  ;;  %v8522_v40 = vld [vmem:[#allocation98_spill] sm:$0xff] }
 0x26e   : > { %4037 = vmatprep.mubr.msk.f32.mxu0 %vm1683_vm11, %v1649_v31  ;;  %v1586_v47 = vsel %vm1568_vm8, %v1553_v1, %v8513_v30  ;;  %v1618_v34 = vsel %vm1601_vm9, %v1585_v48, %v8514_v49  ;;  %v1489_v10 = vsel %vm1469_vm5, %v1456_v23, %v8515_v5  ;;  %v1521_v46 = vsel %vm1502_vm6, %v1488_v3, %v8516_v59  ;;  %v8523_v52 = vld [vmem:[#allocation12_spill] sm:$0xff]  ;;  %v8525_v51 = vld [vmem:[#allocation99_spill] sm:$0xff]  ;;  %v8528_v42 = vld [vmem:[#allocation166_spill] sm:$0xff] }
 0x26f   : > { %4038 = vmatmul.mubr.msk.f32.gmra.mxu0 %vm1683_vm11, %v1650_v20  ;;  %v1619_v21 = vsel %vm1601_vm9, %v1586_v47, %v8517_v17  ;;  %v1425_v45 = vsel %vm225_vm0, %v4169_v37, %v8518_v24  ;;  %v1522_v19 = vsel %vm1502_vm6, %v1489_v10, %v8519_v18  ;;  %v1554_v7 = vsel %vm1535_vm7, %v1521_v46, %v8520_v12  ;;  %v8524_v55 = vld [vmem:[#allocation156_spill] sm:$0xff]  ;;  %v8529_v22 = vld [vmem:[#allocation37_spill] sm:$0xff]  ;;  %v8530_v31 = vld [vmem:[#allocation142_spill] sm:$0xff] }
 0x270   : > { %v1341_v53 = vpop.permute.xlu1 %1340  ;;  %v1652_v27 = vsel %vm1634_vm10, %v1619_v21, %v1343_v16  ;;  %v1457_v9 = vsel %vm1436_vm4, %v1424_v44, %v8521_v61  ;;  %v1459_v2 = vsel %vm1436_vm4, %v1426_v35, %v8522_v40  ;;  %v1555_v62 = vsel %vm1535_vm7, %v1522_v19, %v8523_v52  ;;  %v8526_v13 = vld [vmem:[#allocation124_spill] sm:$0xff]  ;;  %v8531_v4 = vld [vmem:[#allocation169_spill] sm:$0xff]  ;;  %v8534_v16 = vld [vmem:[#allocation11_spill] sm:$0xff] }
 0x271   : > { %v1651_v41 = vsel %vm1634_vm10, %v1618_v34, %v1341_v53  ;;  %v1347_v43 = vpop.permute.xlu0 %1346  ;;  %v1587_v58 = vsel %vm1568_vm8, %v1554_v7, %v8524_v55  ;;  %v1458_v56 = vsel %vm1436_vm4, %v1425_v45, %v8525_v51  ;;  %v1490_v0 = vsel %vm1469_vm5, %v1457_v9, %v8526_v13  ;;  %v8527_v50 = vld [vmem:[#allocation44_spill] sm:$0xff]  ;;  %v8532_v54 = vld [vmem:[#allocation125_spill] sm:$0xff]  ;;  %v8536_v29 = vld [vmem:[#allocation14_spill] sm:$0xff] }
 0x272   : > { %4040 = vmatprep.mubr.msk.f32.mxu0 %vm1683_vm11, %v1651_v41  ;;  %v1588_v44 = vsel %vm1568_vm8, %v1555_v62, %v8527_v50  ;;  %v1620_v11 = vsel %vm1601_vm9, %v1587_v58, %v8528_v42  ;;  %v1491_v25 = vsel %vm1469_vm5, %v1458_v56, %v8529_v22  ;;  %v1523_v33 = vsel %vm1502_vm6, %v1490_v0, %v8530_v31  ;;  %v8533_v14 = vld [vmem:[#allocation145_spill] sm:$0xff]  ;;  %v8535_v63 = vld [vmem:[#allocation144_spill] sm:$0xff]  ;;  %v8537_v60 = vld [vmem:[#allocation158_spill] sm:$0xff] }
 0x273   : > { %4041 = vmatmul.mubr.msk.f32.gmra.mxu0 %vm1683_vm11, %v1652_v27  ;;  %v1621_v36 = vsel %vm1601_vm9, %v1588_v44, %v8531_v4  ;;  %v1492_v8 = vsel %vm1469_vm5, %v1459_v2, %v8532_v54  ;;  %v1524_v20 = vsel %vm1502_vm6, %v1491_v25, %v8533_v14  ;;  %v1556_v26 = vsel %vm1535_vm7, %v1523_v33, %v8534_v16  ;;  %v8538_v39 = vld [vmem:[#allocation13_spill] sm:$0xff]  ;;  %v8539_v32 = vld [vmem:[#allocation26_spill] sm:$0xff]  ;;  %v8540_v30 = vld [vmem:[#allocation168_spill] sm:$0xff] }
 0x274   : > { %v1345_v6 = vpop.permute.xlu1 %1344  ;;  %v1654_v57 = vsel %vm1634_vm10, %v1621_v36, %v1347_v43  ;;  %v1525_v15 = vsel %vm1502_vm6, %v1492_v8, %v8535_v63  ;;  %v1557_v1 = vsel %vm1535_vm7, %v1524_v20, %v8536_v29  ;;  %v1589_v48 = vsel %vm1568_vm8, %v1556_v26, %v8537_v60  ;;  %v8541_v34 = vld [vmem:[#allocation159_spill] sm:$0xff]  ;;  %v8543_v21 = vld [vmem:[#allocation45_spill] sm:$0xff]  ;;  %v8545_v12 = vld [vmem:[#allocation70_spill] sm:$0xff] }
 0x275   : > { %v1653_v38 = vsel %vm1634_vm10, %v1620_v11, %v1345_v6  ;;  %v1351_v35 = vpop.permute.xlu0 %1350  ;;  %v1558_v23 = vsel %vm1535_vm7, %v1525_v15, %v8538_v39  ;;  %v1590_v3 = vsel %vm1568_vm8, %v1557_v1, %v8539_v32  ;;  %v1622_v47 = vsel %vm1601_vm9, %v1589_v48, %v8540_v30  ;;  %v4170_v59 = vld [vmem:[#allocation2 + $0x110] sm:$0xff]  ;;  %v8544_v45 = vld [vmem:[#allocation101_spill] sm:$0xff]  ;;  %v8547_v9 = vld [vmem:[#allocation100_spill] sm:$0xff] }
 0x276   : > { %4043 = vmatprep.mubr.msk.f32.mxu0 %vm1683_vm11, %v1653_v38  ;;  %v1591_v53 = vsel %vm1568_vm8, %v1558_v23, %v8541_v34  ;;  %v1623_v5 = vsel %vm1601_vm9, %v1590_v3, %v5789_v28  ;;  %v8542_v46 = vld [vmem:[#allocation71_spill] sm:$0xff]  ;;  %v4171_v28 = vld [vmem:[#allocation2 + $0x120] sm:$0xff]  ;;  %v8549_v62 = vld [vmem:[#allocation126_spill] sm:$0xff] }
 0x277   : > { %4044 = vmatmul.mubr.msk.f32.gmra.mxu0 %vm1683_vm11, %v1654_v57  ;;  %v1427_v17 = vsel %vm225_vm0, %v4170_v59, %v8542_v46  ;;  %v1624_v41 = vsel %vm1601_vm9, %v1591_v53, %v8543_v21  ;;  %v1656_v37 = vsel %vm1634_vm10, %v1623_v5, %v1351_v35  ;;  %v1428_v7 = vsel %vm225_vm0, %v4171_v28, %v8545_v12  ;;  %v8546_v27 = vld [vmem:[#allocation127_spill] sm:$0xff]  ;;  %v8550_v58 = vld [vmem:[#allocation16_spill] sm:$0xff]  ;;  %v8551_v13 = vld [vmem:[#allocation146_spill] sm:$0xff] }
 0x278   : > { %v1349_v49 = vpop.permute.xlu1 %1348  ;;  %v1460_v18 = vsel %vm1436_vm4, %v1427_v17, %v8544_v45  ;;  %v1461_v40 = vsel %vm1436_vm4, %v1428_v7, %v8547_v9  ;;  %v8548_v2 = vld [vmem:[#allocation147_spill] sm:$0xff]  ;;  %v8552_v50 = vld [vmem:[#allocation48_spill] sm:$0xff]  ;;  %v8554_v25 = vld [vmem:[#allocation25_spill] sm:$0xff] }
 0x279   : > { %v1655_v10 = vsel %vm1634_vm10, %v1622_v47, %v1349_v49  ;;  %v1353_v24 = vpop.permute.xlu0 %1352  ;;  %v1493_v43 = vsel %vm1469_vm5, %v1460_v18, %v8546_v27  ;;  %v1494_v55 = vsel %vm1469_vm5, %v1461_v40, %v8549_v62  ;;  %v8553_v42 = vld [vmem:[#allocation15_spill] sm:$0xff]  ;;  %v4172_v4 = vld [vmem:[#allocation2 + $0x128] sm:$0xff]  ;;  %v8555_v36 = vld [vmem:[#allocation73_spill] sm:$0xff] }
 0x27a   : > { %4046 = vmatprep.mubr.msk.f32.mxu0 %vm1683_vm11, %v1655_v10  ;;  %v1657_v19 = vsel %vm1634_vm10, %v1624_v41, %v1353_v24  ;;  %v1526_v52 = vsel %vm1502_vm6, %v1493_v43, %v8548_v2  ;;  %v1527_v0 = vsel %vm1502_vm6, %v1494_v55, %v8551_v13  ;;  %v1429_v38 = vsel %vm225_vm0, %v4172_v4, %v8555_v36  ;;  %v8556_v14 = vld [vmem:[#allocation103_spill] sm:$0xff]  ;;  %v4173_v26 = vld [vmem:[#allocation2 + $0x138] sm:$0xff]  ;;  %v8558_v63 = vld [vmem:[#allocation41_spill] sm:$0xff] }
 0x27b   : > { %4047 = vmatmul.mubr.msk.f32.gmra.mxu0 %vm1683_vm11, %v1656_v37  ;;  %v1559_v51 = vsel %vm1535_vm7, %v1526_v52, %v8550_v58  ;;  %v1560_v11 = vsel %vm1535_vm7, %v1527_v0, %v8553_v42  ;;  %v1462_v20 = vsel %vm1436_vm4, %v1429_v38, %v8556_v14  ;;  %v8557_v57 = vld [vmem:[#allocation72_spill] sm:$0xff]  ;;  %v8559_v1 = vld [vmem:[#allocation102_spill] sm:$0xff]  ;;  %v8560_v48 = vld [vmem:[#allocation149_spill] sm:$0xff] }
 0x27c   : > { %4049 = vmatprep.mubr.msk.f32.mxu0 %vm1683_vm11, %v1657_v19  ;;  %v1254_v61 = vpop.permute.xlu1 %1253  ;;  %v1592_v44 = vsel %vm1568_vm8, %v1559_v51, %v8552_v50  ;;  %v1593_v31 = vsel %vm1568_vm8, %v1560_v11, %v8554_v25  ;;  %v1430_v35 = vsel %vm225_vm0, %v4173_v26, %v8557_v57  ;;  %v1495_v15 = vsel %vm1469_vm5, %v1462_v20, %v8558_v63  ;;  %v8561_v23 = vld [vmem:[#allocation128_spill] sm:$0xff]  ;;  %v8562_v3 = vld [vmem:[#allocation18_spill] sm:$0xff]  ;;  %v8565_v10 = vld [vmem:[#allocation17_spill] sm:$0xff] }
 0x27d   : > { %v1256_v56 = vpop.permute.xlu0 %1255  ;;  %v1625_v6 = vsel %vm1601_vm9, %v1592_v44, %v1254_v61  ;;  %v1463_v60 = vsel %vm1436_vm4, %v1430_v35, %v8559_v1  ;;  %v1528_v39 = vsel %vm1502_vm6, %v1495_v15, %v8560_v48  ;;  %v8563_v49 = vld [vmem:[#allocation148_spill] sm:$0xff]  ;;  %v8566_v21 = vld [vmem:[#allocation46_spill] sm:$0xff]  ;;  %v4174_v24 = vld [vmem:[#allocation2 + $0x140] sm:$0xff] }
 0x27e   : > { %v1626_v54 = vsel %vm1601_vm9, %v1593_v31, %v1256_v56  ;;  %v1496_v32 = vsel %vm1469_vm5, %v1463_v60, %v8561_v23  ;;  %v1561_v30 = vsel %vm1535_vm7, %v1528_v39, %v8562_v3  ;;  %v8564_v53 = vld [vmem:[#allocation28_spill] sm:$0xff]  ;;  %v8567_v45 = vld [vmem:[#allocation75_spill] sm:$0xff]  ;;  %v8569_v61 = vld [vmem:[#allocation74_spill] sm:$0xff] }
 0x27f   : > { %v1529_v34 = vsel %vm1502_vm6, %v1496_v32, %v8563_v49  ;;  %v1594_v5 = vsel %vm1568_vm8, %v1561_v30, %v8564_v53  ;;  %v1431_v18 = vsel %vm225_vm0, %v4174_v24, %v8567_v45  ;;  %v8568_v12 = vld [vmem:[#allocation20_spill] sm:$0xff]  ;;  %v4175_v43 = vld [vmem:[#allocation2 + $0x150] sm:$0xff]  ;;  %v8573_v56 = vld [vmem:[#allocation42_spill] sm:$0xff] }
 0x280   : > { %v1355_v22 = vpop.permute.xlu1 %1354  ;;  %v1562_v59 = vsel %vm1535_vm7, %v1529_v34, %v8565_v10  ;;  %v1464_v7 = vsel %vm1436_vm4, %v1431_v18, %v8568_v12  ;;  %v1432_v9 = vsel %vm225_vm0, %v4175_v43, %v8569_v61  ;;  %v8570_v40 = vld [vmem:[#allocation43_spill] sm:$0xff]  ;;  %v8571_v62 = vld [vmem:[#allocation104_spill] sm:$0xff]  ;;  %v8574_v0 = vld [vmem:[#allocation22_spill] sm:$0xff] }
 0x281   : > { %v1658_v33 = vsel %vm1634_vm10, %v1625_v6, %v1355_v22  ;;  %v1357_v8 = vpop.permute.xlu0 %1356  ;;  %v1595_v41 = vsel %vm1568_vm8, %v1562_v59, %v8566_v21  ;;  %v1497_v2 = vsel %vm1469_vm5, %v1464_v7, %v8570_v40  ;;  %v1465_v55 = vsel %vm1436_vm4, %v1432_v9, %v8571_v62  ;;  %v8572_v58 = vld [vmem:[#allocation151_spill] sm:$0xff]  ;;  %v8575_v42 = vld [vmem:[#allocation150_spill] sm:$0xff]  ;;  %v8576_v6 = vld [vmem:[#allocation160_spill] sm:$0xff] }
 0x282   : > { %4050 = vmatmul.mubr.msk.f32.gmra.mxu0 %vm1683_vm11, %v1658_v33  ;;  %v1659_v16 = vsel %vm1634_vm10, %v1626_v54, %v1357_v8  ;;  %v1530_v51 = vsel %vm1502_vm6, %v1497_v2, %v8572_v58  ;;  %v1498_v13 = vsel %vm1469_vm5, %v1465_v55, %v8573_v56  ;;  %v8577_v25 = vld [vmem:[#allocation19_spill] sm:$0xff]  ;;  %v4176_v8 = vld [vmem:[#allocation2 + $0x158] sm:$0xff]  ;;  %v8579_v14 = vld [vmem:[#allocation77_spill] sm:$0xff] }
 0x283   : > { %4052 = vmatprep.mubr.msk.f32.mxu0 %vm1683_vm11, %v1659_v16  ;;  %v1563_v50 = vsel %vm1535_vm7, %v1530_v51, %v8574_v0  ;;  %v1531_v11 = vsel %vm1502_vm6, %v1498_v13, %v8575_v42  ;;  %v8578_v36 = vld [vmem:[#allocation27_spill] sm:$0xff]  ;;  %v1433_v20 = vsel %vm225_vm0, %v4176_v8, %v8579_v14  ;;  %v8580_v57 = vld [vmem:[#allocation105_spill] sm:$0xff]  ;;  %v4177_v15 = vld [vmem:[#allocation2 + $0x168] sm:$0xff] }
 0x284   : > { %v1258_v29 = vpop.permute.xlu1 %1257  ;;  %v1596_v22 = vsel %vm1568_vm8, %v1563_v50, %v8576_v6  ;;  %v1564_v31 = vsel %vm1535_vm7, %v1531_v11, %v8577_v25  ;;  %v1466_v35 = vsel %vm1436_vm4, %v1433_v20, %v8580_v57  ;;  %v8582_v60 = vld [vmem:[#allocation130_spill] sm:$0xff]  ;;  %v8583_v23 = vld [vmem:[#allocation21_spill] sm:$0xff]  ;;  %v8586_v34 = vld [vmem:[#allocation24_spill] sm:$0xff] }
 0x285   : > { %v1260_v47 = vpop.permute.xlu0 %1259  ;;  %v1627_v46 = vsel %vm1601_vm9, %v1594_v5, %v1258_v29  ;;  %v1597_v38 = vsel %vm1568_vm8, %v1564_v31, %v8578_v36  ;;  %v8581_v29 = vld [vmem:[#allocation76_spill] sm:$0xff]  ;;  %v1499_v48 = vsel %vm1469_vm5, %v1466_v35, %v8582_v60  ;;  %v8584_v3 = vld [vmem:[#allocation153_spill] sm:$0xff]  ;;  %v8589_v21 = vld [vmem:[#allocation23_spill] sm:$0xff] }
 0x286   : > { %v1628_v19 = vsel %vm1601_vm9, %v1595_v41, %v1260_v47  ;;  %v1434_v1 = vsel %vm225_vm0, %v4177_v15, %v8581_v29  ;;  %v1532_v30 = vsel %vm1502_vm6, %v1499_v48, %v8584_v3  ;;  %v8585_v47 = vld [vmem:[#allocation129_spill] sm:$0xff]  ;;  %v8587_v10 = vld [vmem:[#allocation152_spill] sm:$0xff]  ;;  %v8591_v12 = vld [vmem:[#allocation79_spill] sm:$0xff] }
 0x287   : > { %v1467_v32 = vsel %vm1436_vm4, %v1434_v1, %v8583_v23  ;;  %v1565_v53 = vsel %vm1535_vm7, %v1532_v30, %v8586_v34  ;;  %v8590_v45 = vld [vmem:[#allocation161_spill] sm:$0xff]  ;;  %v8592_v61 = vld [vmem:[#allocation107_spill] sm:$0xff]  ;;  %v8593_v2 = vld [vmem:[#allocation132_spill] sm:$0xff] }
 0x288   : > { %v1359_v17 = vpop.permute.xlu1 %1358  ;;  %v1500_v49 = vsel %vm1469_vm5, %v1467_v32, %v8585_v47  ;;  %v8594_v55 = vld [vmem:[#allocation154_spill] sm:$0xff]  ;;  %v6273_v51 = vld [vmem:[#allocation2] sm:$0xff]  ;;  %v6277_v13 = vld [vmem:[#allocation2 + $0x10] sm:$0x3] }
 0x289   : > { %v1660_v37 = vsel %vm1634_vm10, %v1627_v46, %v1359_v17  ;;  %v1361_v28 = vpop.permute.xlu0 %1360  ;;  %v1533_v59 = vsel %vm1502_vm6, %v1500_v49, %v8587_v10  ;;  %v8588_v46 = vld [vmem:[#allocation29_spill] sm:$0xff]  ;;  %v6275_v56 = vld [vmem:[#allocation2 + $0x8] sm:$0xff]  ;;  %v8595_v0 = vld [vmem:[#allocation155_spill] sm:$0xff]  ;;  %v2174_v11 = vrot.slane %v6277_v13, 1 }
 0x28a   : > { %4053 = vmatmul.mubr.msk.f32.gmra.mxu0 %vm1683_vm11, %v1660_v37  ;;  %v1661_v27 = vsel %vm1634_vm10, %v1628_v19, %v1361_v28  ;;  %v1598_v17 = vsel %vm1568_vm8, %v1565_v53, %v8588_v46  ;;  %v1566_v41 = vsel %vm1535_vm7, %v1533_v59, %v8589_v21  ;;  %v4178_v28 = vld [vmem:[#allocation2 + $0x170] sm:$0xff]  ;;  %v2172_v42 = vrot.slane %v6275_v56, 1  ;;  %v8596_v6 = vld [vmem:[#allocation110_spill] sm:$0xff] }
 0x28b   : > { %4055 = vmatprep.mubr.msk.f32.mxu0 %vm1683_vm11, %v1661_v27  ;;  %v1599_v18 = vsel %vm1568_vm8, %v1566_v41, %v8590_v45  ;;  %v1435_v7 = vsel %vm225_vm0, %v4178_v28, %v8591_v12 }
 0x28c   : > { %v1262_v52 = vpop.permute.xlu1 %1261  ;;  %v1468_v9 = vsel %vm1436_vm4, %v1435_v7, %v8592_v61 }
 0x28d   : > { %v1264_v44 = vpop.permute.xlu0 %1263  ;;  %v1629_v33 = vsel %vm1601_vm9, %v1596_v22, %v1262_v52  ;;  %v1501_v52 = vsel %vm1469_vm5, %v1468_v9, %v8593_v2 }
 0x28e   : > { %v1630_v16 = vsel %vm1601_vm9, %v1597_v38, %v1264_v44  ;;  %v1534_v58 = vsel %vm1502_vm6, %v1501_v52, %v8594_v55  ;;  %v2171_v44 = vrot.slane %v6273_v51, 1  ;;  %v6296_v38 = vld [vmem:[%s7975_s2] ss:$0 sm:$0xff] }
 0x28f   : > { %v1567_v50 = vsel %vm1535_vm7, %v1534_v58, %v8595_v0 }
 0x290   : > { %v1363_v4 = vpop.permute.xlu1 %1362  ;;  %v1600_v22 = vsel %vm1568_vm8, %v1567_v50, %v8596_v6 }
 0x291   : > { %v1662_v54 = vsel %vm1634_vm10, %v1629_v33, %v1363_v4  ;;  %v1365_v26 = vpop.permute.xlu0 %1364  ;;  %v2173_v33 = vsel %vm448_vm2, %v2171_v44, %v2172_v42  ;;  %v2175_v4 = vsel %vm448_vm2, %v2172_v42, %v2174_v11 }
 0x292   : > { %4056 = vmatmul.mubr.msk.f32.gmra.mxu0 %vm1683_vm11, %v1662_v54  ;;  %v1663_v63 = vsel %vm1634_vm10, %v1630_v16, %v1365_v26  ;;  %2251 = vrot.lane.b32.xlu0 %v2173_v33, %s4220_s25 }
 0x293   : > { %4058 = vmatprep.mubr.msk.f32.mxu0 %vm1683_vm11, %v1663_v63  ;;  %2253 = vrot.lane.b32.xlu1 %v2175_v4, %s4220_s25 }
 0x294   : > { %v1266_v39 = vpop.permute.xlu1 %1265 }
 0x295   : > { %v1268_v5 = vpop.permute.xlu0 %1267  ;;  %v1631_v37 = vsel %vm1601_vm9, %v1598_v17, %v1266_v39 }
 0x296   : > { %v1632_v27 = vsel %vm1601_vm9, %v1599_v18, %v1268_v5 }
 0x298   : > { %v1367_v24 = vpop.permute.xlu1 %1366 }
 0x299   : > { %v1664_v19 = vsel %vm1634_vm10, %v1631_v37, %v1367_v24  ;;  %v1369_v43 = vpop.permute.xlu0 %1368 }
 0x29a   : > { %4059 = vmatmul.mubr.msk.f32.gmra.mxu0 %vm1683_vm11, %v1664_v19  ;;  %v1665_v40 = vsel %vm1634_vm10, %v1632_v27, %v1369_v43 }
 0x29b   : > { %4061 = vmatprep.mubr.msk.f32.mxu0 %vm1683_vm11, %v1665_v40 }
 0x29c   : > { %v1270_v62 = vpop.permute.xlu1 %1269 }
 0x29d   : > { %v1633_v25 = vsel %vm1601_vm9, %v1600_v22, %v1270_v62 }
 0x2a0   : > { %v1371_v31 = vpop.permute.xlu1 %1370 }
 0x2a1   : > { %v1666_v36 = vsel %vm1634_vm10, %v1633_v25, %v1371_v31 }
 0x2a2   : > { %4062 = vmatmul.mubr.msk.f32.gmra.mxu0 %vm1683_vm11, %v1666_v36 }
 0x313   : > { %v4018_v54 = vpop.f32.mrf.mxu0 }
 0x314   : > { %v1852_v8 = vadd.f32 %v4018_v54, %v6296_v38 }
 0x315   : > { %v1846_v14 = vpop.f32.mrf.mxu0 }
 0x316   : > { %v2006_v20 = vmax.f32 %v1852_v8, 0.0  ;;  %v1847_v16 = vadd.f32 %v6296_v38, %v1846_v14 }
 0x317   : > { %v4021_v26 = vpop.f32.mrf.mxu0 }
 0x318   : > { %2038 = vst.msk [vmem:[#allocation2 + $0x21] sm:$0xff] %vm225_vm0, %v2006_v20  ;;  %v2005_v57 = vmax.f32 %v1847_v16, 0.0  ;;  %v1862_v35 = vadd.f32 %v4021_v26, %v6296_v38 }
 0x319   : > { %v1856_v63 = vpop.f32.mrf.mxu0 }
 0x31a   : > { %2037 = vst.msk [vmem:[#allocation2 + $0x19] sm:$0xff] %vm225_vm0, %v2005_v57  ;;  %v2008_v15 = vmax.f32 %v1862_v35, 0.0  ;;  %v1857_v29 = vadd.f32 %v6296_v38, %v1856_v63 }
 0x31b   : > { %v4024_v1 = vpop.f32.mrf.mxu0 }
 0x31c   : > { %2040 = vst.msk [vmem:[#allocation2 + $0x39] sm:$0xff] %vm225_vm0, %v2008_v15  ;;  %v2007_v60 = vmax.f32 %v1857_v29, 0.0  ;;  %v1872_v48 = vadd.f32 %v4024_v1, %v6296_v38 }
 0x31d   : > { %v1866_v39 = vpop.f32.mrf.mxu0 }
 0x31e   : > { %2039 = vst.msk [vmem:[#allocation2 + $0x31] sm:$0xff] %vm225_vm0, %v2007_v60  ;;  %v2010_v23 = vmax.f32 %v1872_v48, 0.0  ;;  %v1867_v32 = vadd.f32 %v6296_v38, %v1866_v39 }
 0x31f   : > { %v4027_v3 = vpop.f32.mrf.mxu0  ;;  %v6308_v30 = vld [vmem:[#allocation2 + $0x28] sm:$0x3] }
 0x320   : > { %2042 = vst.msk [vmem:[#allocation2 + $0x51] sm:$0xff] %vm225_vm0, %v2010_v23  ;;  %v2009_v47 = vmax.f32 %v1867_v32, 0.0  ;;  %v1882_v49 = vadd.f32 %v4027_v3, %v6296_v38  ;;  %v2179_v5 = vrot.slane %v6308_v30, 1 }
 0x321   : > { %v1876_v34 = vpop.f32.mrf.mxu0  ;;  %v6312_v53 = vld [vmem:[#allocation2 + $0x20] sm:$0xff]  ;;  %v6315_v10 = vld [vmem:[#allocation2 + $0x18] sm:$0xff] }
 0x322   : > { %2041 = vst.msk [vmem:[#allocation2 + $0x49] sm:$0xff] %vm225_vm0, %v2009_v47  ;;  %v2012_v59 = vmax.f32 %v1882_v49, 0.0  ;;  %v1877_v46 = vadd.f32 %v6296_v38, %v1876_v34  ;;  %v2177_v17 = vrot.slane %v6312_v53, 1  ;;  %v2176_v21 = vrot.slane %v6315_v10, 1 }
 0x323   : > { %v4030_v41 = vpop.f32.mrf.mxu0  ;;  %v6321_v37 = vld [vmem:[#allocation2 + $0x40] sm:$0x3] }
 0x324   : > { %2044 = vst.msk [vmem:[#allocation2 + $0x69] sm:$0xff] %vm225_vm0, %v2012_v59  ;;  %v2011_v24 = vmax.f32 %v1877_v46, 0.0  ;;  %v1892_v45 = vadd.f32 %v4030_v41, %v6296_v38  ;;  %v6326_v18 = vsel %vm448_vm2, %v2177_v17, %v2179_v5  ;;  %v6329_v19 = vsel %vm448_vm2, %v2176_v21, %v2177_v17 }
 0x325   : > { %2257 = vrot.lane.b32.xlu1 %v6326_v18, %s4220_s25  ;;  %2255 = vrot.lane.b32.xlu0 %v6329_v19, %s4220_s25  ;;  %v1886_v28 = vpop.f32.mrf.mxu0  ;;  %v6335_v12 = vld [vmem:[#allocation2 + $0x38] sm:$0xff]  ;;  %v2184_v7 = vrot.slane %v6321_v37, 1  ;;  %v6338_v27 = vld [vmem:[#allocation2 + $0x30] sm:$0xff] }
 0x326   : > { %2043 = vst.msk [vmem:[#allocation2 + $0x61] sm:$0xff] %vm225_vm0, %v2011_v24  ;;  %v2014_v43 = vmax.f32 %v1892_v45, 0.0  ;;  %v1887_v61 = vadd.f32 %v6296_v38, %v1886_v28  ;;  %v2182_v9 = vrot.slane %v6335_v12, 1  ;;  %v2181_v40 = vrot.slane %v6338_v27, 1 }
 0x327   : > { %v4033_v2 = vpop.f32.mrf.mxu0  ;;  %v6344_v52 = vld [vmem:[#allocation2 + $0x58] sm:$0x3] }
 0x328   : > { %2046 = vst.msk [vmem:[#allocation2 + $0x81] sm:$0xff] %vm225_vm0, %v2014_v43  ;;  %v2013_v62 = vmax.f32 %v1887_v61, 0.0  ;;  %v1902_v55 = vadd.f32 %v4033_v2, %v6296_v38  ;;  %v6349_v58 = vsel %vm448_vm2, %v2182_v9, %v2184_v7  ;;  %v6352_v0 = vsel %vm448_vm2, %v2181_v40, %v2182_v9 }
 0x329   : > { %2261 = vrot.lane.b32.xlu1 %v6349_v58, %s4220_s25  ;;  %2259 = vrot.lane.b32.xlu0 %v6352_v0, %s4220_s25  ;;  %v1896_v50 = vpop.f32.mrf.mxu0  ;;  %v6358_v44 = vld [vmem:[#allocation2 + $0x50] sm:$0xff]  ;;  %v2189_v42 = vrot.slane %v6344_v52, 1  ;;  %v6361_v11 = vld [vmem:[#allocation2 + $0x48] sm:$0xff] }
 0x32a   : > { %2045 = vst.msk [vmem:[#allocation2 + $0x79] sm:$0xff] %vm225_vm0, %v2013_v62  ;;  %v2016_v6 = vmax.f32 %v1902_v55, 0.0  ;;  %v1897_v22 = vadd.f32 %v6296_v38, %v1896_v50  ;;  %v2187_v25 = vrot.slane %v6358_v44, 1  ;;  %v2186_v31 = vrot.slane %v6361_v11, 1 }
 0x32b   : > { %v4036_v33 = vpop.f32.mrf.mxu0  ;;  %v6367_v4 = vld [vmem:[#allocation2 + $0x70] sm:$0x3] }
 0x32c   : > { %2048 = vst.msk [vmem:[#allocation2 + $0x99] sm:$0xff] %vm225_vm0, %v2016_v6  ;;  %v2015_v36 = vmax.f32 %v1897_v22, 0.0  ;;  %v1912_v54 = vadd.f32 %v4036_v33, %v6296_v38  ;;  %v6372_v8 = vsel %vm448_vm2, %v2187_v25, %v2189_v42  ;;  %v6375_v14 = vsel %vm448_vm2, %v2186_v31, %v2187_v25 }
 0x32d   : > { %2265 = vrot.lane.b32.xlu1 %v6372_v8, %s4220_s25  ;;  %2263 = vrot.lane.b32.xlu0 %v6375_v14, %s4220_s25  ;;  %v1906_v20 = vpop.f32.mrf.mxu0  ;;  %v6381_v16 = vld [vmem:[#allocation2 + $0x68] sm:$0xff]  ;;  %v2194_v26 = vrot.slane %v6367_v4, 1  ;;  %v6384_v57 = vld [vmem:[#allocation2 + $0x60] sm:$0xff] }
 0x32e   : > { %2047 = vst.msk [vmem:[#allocation2 + $0x91] sm:$0xff] %vm225_vm0, %v2015_v36  ;;  %v2018_v35 = vmax.f32 %v1912_v54, 0.0  ;;  %v1907_v63 = vadd.f32 %v6296_v38, %v1906_v20  ;;  %v2192_v15 = vrot.slane %v6381_v16, 1  ;;  %v2191_v29 = vrot.slane %v6384_v57, 1 }
 0x32f   : > { %v4039_v1 = vpop.f32.mrf.mxu0  ;;  %v6390_v60 = vld [vmem:[#allocation2 + $0x88] sm:$0x3] }
 0x330   : > { %2050 = vst.msk [vmem:[#allocation2 + $0xb1] sm:$0xff] %vm225_vm0, %v2018_v35  ;;  %v2017_v48 = vmax.f32 %v1907_v63, 0.0  ;;  %v1922_v39 = vadd.f32 %v4039_v1, %v6296_v38  ;;  %v6395_v23 = vsel %vm448_vm2, %v2192_v15, %v2194_v26  ;;  %v6398_v32 = vsel %vm448_vm2, %v2191_v29, %v2192_v15 }
 0x331   : > { %8597 = vst [vmem:[#allocation47_spill] sm:$0xff] %v6395_v23  ;;  %8598 = vst [vmem:[#allocation49_spill] sm:$0xff] %v6398_v32  ;;  %2269 = vrot.lane.b32.xlu1 %v6395_v23, %s4220_s25  ;;  %2267 = vrot.lane.b32.xlu0 %v6398_v32, %s4220_s25  ;;  %v1916_v3 = vpop.f32.mrf.mxu0  ;;  %v6404_v47 = vld [vmem:[#allocation2 + $0x80] sm:$0xff]  ;;  %v2199_v49 = vrot.slane %v6390_v60, 1  ;;  %v6407_v34 = vld [vmem:[#allocation2 + $0x78] sm:$0xff] }
 0x332   : > { %2049 = vst.msk [vmem:[#allocation2 + $0xa9] sm:$0xff] %vm225_vm0, %v2017_v48  ;;  %v2020_v5 = vmax.f32 %v1922_v39, 0.0  ;;  %v1917_v59 = vadd.f32 %v6296_v38, %v1916_v3  ;;  %v2197_v46 = vrot.slane %v6404_v47, 1  ;;  %v2196_v17 = vrot.slane %v6407_v34, 1 }
 0x333   : > { %v4042_v21 = vpop.f32.mrf.mxu0  ;;  %v6413_v41 = vld [vmem:[#allocation2 + $0xa0] sm:$0x3] }
 0x334   : > { %2052 = vst.msk [vmem:[#allocation2 + $0xc9] sm:$0xff] %vm225_vm0, %v2020_v5  ;;  %v2019_v24 = vmax.f32 %v1917_v59, 0.0  ;;  %v1932_v45 = vadd.f32 %v4042_v21, %v6296_v38  ;;  %v6418_v28 = vsel %vm448_vm2, %v2197_v46, %v2199_v49  ;;  %v6421_v7 = vsel %vm448_vm2, %v2196_v17, %v2197_v46 }
 0x335   : > { %8599 = vst [vmem:[#allocation78_spill] sm:$0xff] %v6418_v28  ;;  %8600 = vst [vmem:[#allocation50_spill] sm:$0xff] %v6421_v7  ;;  %2273 = vrot.lane.b32.xlu1 %v6418_v28, %s4220_s25  ;;  %2271 = vrot.lane.b32.xlu0 %v6421_v7, %s4220_s25  ;;  %v1926_v43 = vpop.f32.mrf.mxu0  ;;  %v6427_v61 = vld [vmem:[#allocation2 + $0x98] sm:$0xff]  ;;  %v2204_v9 = vrot.slane %v6413_v41, 1  ;;  %v6430_v40 = vld [vmem:[#allocation2 + $0x90] sm:$0xff] }
 0x336   : > { %2051 = vst.msk [vmem:[#allocation2 + $0xc1] sm:$0xff] %vm225_vm0, %v2019_v24  ;;  %v2022_v2 = vmax.f32 %v1932_v45, 0.0  ;;  %v1927_v62 = vadd.f32 %v6296_v38, %v1926_v43  ;;  %v2202_v55 = vrot.slane %v6427_v61, 1  ;;  %v2201_v50 = vrot.slane %v6430_v40, 1 }
 0x337   : > { %v4045_v42 = vpop.f32.mrf.mxu0  ;;  %v6436_v6 = vld [vmem:[#allocation2 + $0xb8] sm:$0x3] }
 0x338   : > { %2054 = vst.msk [vmem:[#allocation2 + $0xe1] sm:$0xff] %vm225_vm0, %v2022_v2  ;;  %v2021_v22 = vmax.f32 %v1927_v62, 0.0  ;;  %v1942_v25 = vadd.f32 %v4045_v42, %v6296_v38  ;;  %v6441_v31 = vsel %vm448_vm2, %v2202_v55, %v2204_v9  ;;  %v6444_v33 = vsel %vm448_vm2, %v2201_v50, %v2202_v55 }
 0x339   : > { %8601 = vst [vmem:[#allocation81_spill] sm:$0xff] %v6441_v31  ;;  %8602 = vst [vmem:[#allocation106_spill] sm:$0xff] %v6444_v33  ;;  %2277 = vrot.lane.b32.xlu1 %v6441_v31, %s4220_s25  ;;  %2275 = vrot.lane.b32.xlu0 %v6444_v33, %s4220_s25  ;;  %v1936_v36 = vpop.f32.mrf.mxu0  ;;  %v6450_v54 = vld [vmem:[#allocation2 + $0xb0] sm:$0xff]  ;;  %v2209_v20 = vrot.slane %v6436_v6, 1  ;;  %v6453_v26 = vld [vmem:[#allocation2 + $0xa8] sm:$0xff] }
 0x33a   : > { %2053 = vst.msk [vmem:[#allocation2 + $0xd9] sm:$0xff] %vm225_vm0, %v2021_v22  ;;  %v2024_v35 = vmax.f32 %v1942_v25, 0.0  ;;  %v1937_v63 = vadd.f32 %v6296_v38, %v1936_v36  ;;  %v2207_v15 = vrot.slane %v6450_v54, 1  ;;  %v2206_v29 = vrot.slane %v6453_v26, 1 }
 0x33b   : > { %v4048_v1 = vpop.f32.mrf.mxu0  ;;  %v6459_v48 = vld [vmem:[#allocation2 + $0xd0] sm:$0x3] }
 0x33c   : > { %2056 = vst.msk [vmem:[#allocation2 + $0xf9] sm:$0xff] %vm225_vm0, %v2024_v35  ;;  %v2023_v39 = vmax.f32 %v1937_v63, 0.0  ;;  %v1952_v3 = vadd.f32 %v4048_v1, %v6296_v38  ;;  %v6464_v49 = vsel %vm448_vm2, %v2207_v15, %v2209_v20  ;;  %v6467_v5 = vsel %vm448_vm2, %v2206_v29, %v2207_v15 }
 0x33d   : > { %8603 = vst [vmem:[#allocation51_spill] sm:$0xff] %v6464_v49  ;;  %8604 = vst [vmem:[#allocation109_spill] sm:$0xff] %v6467_v5  ;;  %2281 = vrot.lane.b32.xlu1 %v6464_v49, %s4220_s25  ;;  %2279 = vrot.lane.b32.xlu0 %v6467_v5, %s4220_s25  ;;  %v1946_v59 = vpop.f32.mrf.mxu0  ;;  %v6473_v46 = vld [vmem:[#allocation2 + $0xc8] sm:$0xff]  ;;  %v2214_v17 = vrot.slane %v6459_v48, 1  ;;  %v6476_v21 = vld [vmem:[#allocation2 + $0xc0] sm:$0xff] }
 0x33e   : > { %2055 = vst.msk [vmem:[#allocation2 + $0xf1] sm:$0xff] %vm225_vm0, %v2023_v39  ;;  %v2026_v24 = vmax.f32 %v1952_v3, 0.0  ;;  %v1947_v45 = vadd.f32 %v6296_v38, %v1946_v59  ;;  %v2212_v43 = vrot.slane %v6473_v46, 1  ;;  %v2211_v9 = vrot.slane %v6476_v21, 1 }
 0x33f   : > { %v6482_v2 = vld [vmem:[#allocation2 + $0xe8] sm:$0x3] }
 0x340   : > { %2058 = vst.msk [vmem:[#allocation2 + $0x111] sm:$0xff] %vm225_vm0, %v2026_v24  ;;  %v2025_v62 = vmax.f32 %v1947_v45, 0.0  ;;  %v6486_v55 = vsel %vm448_vm2, %v2212_v43, %v2214_v17  ;;  %v6489_v50 = vsel %vm448_vm2, %v2211_v9, %v2212_v43  ;;  %v2219_v20 = vrot.slane %v6482_v2, 1 }
 0x341   : > { %8605 = vst [vmem:[#allocation131_spill] sm:$0xff] %v6486_v55  ;;  %8606 = vst [vmem:[#allocation52_spill] sm:$0xff] %v6489_v50  ;;  %2285 = vrot.lane.b32.xlu1 %v6486_v55, %s4220_s25  ;;  %2283 = vrot.lane.b32.xlu0 %v6489_v50, %s4220_s25  ;;  %v6495_v42 = vld [vmem:[#allocation2 + $0xe0] sm:$0xff]  ;;  %v6497_v22 = vld [vmem:[#allocation2 + $0xd8] sm:$0xff] }
 0x342   : > { %2057 = vst.msk [vmem:[#allocation2 + $0x109] sm:$0xff] %vm225_vm0, %v2025_v62  ;;  %v4051_v25 = vpop.f32.mrf.mxu0  ;;  %v2217_v36 = vrot.slane %v6495_v42, 1  ;;  %v2216_v35 = vrot.slane %v6497_v22, 1 }
 0x343   : > { %v1962_v63 = vadd.f32 %v4051_v25, %v6296_v38  ;;  %v6504_v15 = vld [vmem:[#allocation2 + $0x100] sm:$0x3] }
 0x344   : > { %v1956_v29 = vpop.f32.mrf.mxu0  ;;  %v6507_v1 = vsel %vm448_vm2, %v2217_v36, %v2219_v20  ;;  %v6510_v39 = vsel %vm448_vm2, %v2216_v35, %v2217_v36  ;;  %v2224_v43 = vrot.slane %v6504_v15, 1 }
 0x345   : > { %8607 = vst [vmem:[#allocation80_spill] sm:$0xff] %v6507_v1  ;;  %8608 = vst [vmem:[#allocation83_spill] sm:$0xff] %v6510_v39  ;;  %v2028_v3 = vmax.f32 %v1962_v63, 0.0  ;;  %v1957_v59 = vadd.f32 %v6296_v38, %v1956_v29  ;;  %2289 = vrot.lane.b32.xlu1 %v6507_v1, %s4220_s25  ;;  %2287 = vrot.lane.b32.xlu0 %v6510_v39, %s4220_s25  ;;  %v6517_v17 = vld [vmem:[#allocation2 + $0xf8] sm:$0xff]  ;;  %v6519_v24 = vld [vmem:[#allocation2 + $0xf0] sm:$0xff] }
 0x346   : > { %v2222_v45 = vrot.slane %v6517_v17, 1  ;;  %v2221_v9 = vrot.slane %v6519_v24, 1 }
 0x347   : > { %2060 = vst.msk [vmem:[#allocation2 + $0x129] sm:$0xff] %vm225_vm0, %v2028_v3  ;;  %v2027_v62 = vmax.f32 %v1957_v59, 0.0  ;;  %v6525_v25 = vld [vmem:[#allocation2 + $0x118] sm:$0x3] }
 0x348   : > { %v6528_v36 = vsel %vm448_vm2, %v2222_v45, %v2224_v43  ;;  %v6531_v20 = vsel %vm448_vm2, %v2221_v9, %v2222_v45  ;;  %v2229_v59 = vrot.slane %v6525_v25, 1 }
 0x349   : > { %8609 = vst [vmem:[#allocation108_spill] sm:$0xff] %v6528_v36  ;;  %8610 = vst [vmem:[#allocation112_spill] sm:$0xff] %v6531_v20  ;;  %2293 = vrot.lane.b32.xlu1 %v6528_v36, %s4220_s25  ;;  %2291 = vrot.lane.b32.xlu0 %v6531_v20, %s4220_s25  ;;  %v6538_v35 = vld [vmem:[#allocation2 + $0x110] sm:$0xff]  ;;  %v6540_v63 = vld [vmem:[#allocation2 + $0x108] sm:$0xff] }
 0x34a   : > { %2059 = vst.msk [vmem:[#allocation2 + $0x121] sm:$0xff] %vm225_vm0, %v2027_v62  ;;  %v4054_v29 = vpop.f32.mrf.mxu0  ;;  %v2227_v3 = vrot.slane %v6538_v35, 1  ;;  %v2226_v45 = vrot.slane %v6540_v63, 1 }
 0x34b   : > { %v1972_v43 = vadd.f32 %v4054_v29, %v6296_v38 }
 0x34c   : > { %v1966_v9 = vpop.f32.mrf.mxu0  ;;  %v6547_v62 = vsel %vm448_vm2, %v2227_v3, %v2229_v59  ;;  %v6550_v36 = vsel %vm448_vm2, %v2226_v45, %v2227_v3 }
 0x34d   : > { %8611 = vst [vmem:[#allocation133_spill] sm:$0xff] %v6547_v62  ;;  %8612 = vst [vmem:[#allocation53_spill] sm:$0xff] %v6550_v36  ;;  %v2030_v20 = vmax.f32 %v1972_v43, 0.0  ;;  %v1967_v1 = vadd.f32 %v6296_v38, %v1966_v9  ;;  %2297 = vrot.lane.b32.xlu1 %v6547_v62, %s4220_s25  ;;  %2295 = vrot.lane.b32.xlu0 %v6550_v36, %s4220_s25 }
 0x34e   : > { %v6557_v39 = vld [vmem:[#allocation2 + $0x130] sm:$0x3] }
 0x34f   : > { %2062 = vst.msk [vmem:[#allocation2 + $0x141] sm:$0xff] %vm225_vm0, %v2030_v20  ;;  %v2029_v29 = vmax.f32 %v1967_v1, 0.0  ;;  %v2234_v45 = vrot.slane %v6557_v39, 1 }
 0x351   : > { %v6560_v55 = vld [vmem:[#allocation2 + $0x128] sm:$0xff]  ;;  %v6562_v59 = vld [vmem:[#allocation2 + $0x120] sm:$0xff]  ;;  %2061 = vst.msk [vmem:[#allocation2 + $0x139] sm:$0xff] %vm225_vm0, %v2029_v29 }
 0x352   : > { %v2232_v3 = vrot.slane %v6560_v55, 1  ;;  %v2231_v43 = vrot.slane %v6562_v59, 1  ;;  %v4057_v9 = vpop.f32.mrf.mxu0 }
 0x353   : > { %v1982_v62 = vadd.f32 %v4057_v9, %v6296_v38 }
 0x354   : > { %v6570_v36 = vsel %vm448_vm2, %v2232_v3, %v2234_v45  ;;  %v6573_v1 = vsel %vm448_vm2, %v2231_v43, %v2232_v3  ;;  %v1976_v20 = vpop.f32.mrf.mxu0 }
 0x355   : > { %8613 = vst [vmem:[#allocation135_spill] sm:$0xff] %v6570_v36  ;;  %8614 = vst [vmem:[#allocation54_spill] sm:$0xff] %v6573_v1  ;;  %2301 = vrot.lane.b32.xlu1 %v6570_v36, %s4220_s25  ;;  %2299 = vrot.lane.b32.xlu0 %v6573_v1, %s4220_s25  ;;  %v2032_v29 = vmax.f32 %v1982_v62, 0.0  ;;  %v1977_v50 = vadd.f32 %v6296_v38, %v1976_v20 }
 0x356   : > { %v6580_v49 = vld [vmem:[#allocation2 + $0x148] sm:$0x3] }
 0x357   : > { %2064 = vst.msk [vmem:[#allocation2 + $0x159] sm:$0xff] %vm225_vm0, %v2032_v29  ;;  %v2031_v9 = vmax.f32 %v1977_v50, 0.0  ;;  %v2239_v43 = vrot.slane %v6580_v49, 1 }
 0x358   : > { %v6583_v45 = vld [vmem:[#allocation2 + $0x140] sm:$0xff]  ;;  %v6585_v5 = vld [vmem:[#allocation2 + $0x138] sm:$0xff] }
 0x359   : > { %2063 = vst.msk [vmem:[#allocation2 + $0x151] sm:$0xff] %vm225_vm0, %v2031_v9  ;;  %v2237_v3 = vrot.slane %v6583_v45, 1  ;;  %v2236_v36 = vrot.slane %v6585_v5, 1 }
 0x35a   : > { %v4060_v62 = vpop.f32.mrf.mxu0 }
 0x35b   : > { %v1992_v20 = vadd.f32 %v4060_v62, %v6296_v38  ;;  %v6593_v1 = vsel %vm448_vm2, %v2237_v3, %v2239_v43  ;;  %v6596_v50 = vsel %vm448_vm2, %v2236_v36, %v2237_v3 }
 0x35c   : > { %8615 = vst [vmem:[#allocation82_spill] sm:$0xff] %v6593_v1  ;;  %8616 = vst [vmem:[#allocation85_spill] sm:$0xff] %v6596_v50  ;;  %2305 = vrot.lane.b32.xlu1 %v6593_v1, %s4220_s25  ;;  %2303 = vrot.lane.b32.xlu0 %v6596_v50, %s4220_s25  ;;  %v1986_v29 = vpop.f32.mrf.mxu0 }
 0x35d   : > { %v2034_v9 = vmax.f32 %v1992_v20, 0.0  ;;  %v1987_v31 = vadd.f32 %v6296_v38, %v1986_v29 }
 0x35e   : > { %v6603_v33 = vld [vmem:[#allocation2 + $0x160] sm:$0x3] }
 0x35f   : > { %2066 = vst.msk [vmem:[#allocation2 + $0x171] sm:$0xff] %vm225_vm0, %v2034_v9  ;;  %v2033_v62 = vmax.f32 %v1987_v31, 0.0  ;;  %v2244_v3 = vrot.slane %v6603_v33, 1 }
 0x360   : > { %v6606_v43 = vld [vmem:[#allocation2 + $0x158] sm:$0xff]  ;;  %v6608_v28 = vld [vmem:[#allocation2 + $0x150] sm:$0xff] }
 0x361   : > { %2065 = vst.msk [vmem:[#allocation2 + $0x169] sm:$0xff] %vm225_vm0, %v2033_v62  ;;  %v2242_v36 = vrot.slane %v6606_v43, 1  ;;  %v2241_v1 = vrot.slane %v6608_v28, 1 }
 0x362   : > { %v4063_v20 = vpop.f32.mrf.mxu0 }
 0x363   : > { %v2002_v29 = vadd.f32 %v4063_v20, %v6296_v38  ;;  %v6616_v50 = vsel %vm448_vm2, %v2242_v36, %v2244_v3  ;;  %v6619_v31 = vsel %vm448_vm2, %v2241_v1, %v2242_v36  ;;  %v2348_v1 = vrot.slane %v6275_v56, 2 }
 0x364   : > { %8617 = vst [vmem:[#allocation111_spill] sm:$0xff] %v6616_v50  ;;  %8618 = vst [vmem:[#allocation115_spill] sm:$0xff] %v6619_v31  ;;  %2309 = vrot.lane.b32.xlu1 %v6616_v50, %s4220_s25  ;;  %2307 = vrot.lane.b32.xlu0 %v6619_v31, %s4220_s25  ;;  %v1996_v9 = vpop.f32.mrf.mxu0  ;;  %v2350_v36 = vrot.slane %v6277_v13, 2  ;;  %v2385_v31 = vrot.slane %v6436_v6, 2 }
 0x365   : > { %v2036_v62 = vmax.f32 %v2002_v29, 0.0  ;;  %v1997_v7 = vadd.f32 %v6296_v38, %v1996_v9  ;;  %v2347_v9 = vrot.slane %v6273_v51, 2  ;;  %v2352_v51 = vrot.slane %v6315_v10, 2 }
 0x366   : > { %v6626_v23 = vld [vmem:[#allocation2 + $0x178] sm:$0x3]  ;;  %v2351_v56 = vsel %vm625_vm3, %v2348_v1, %v2350_v36  ;;  %v2358_v36 = vrot.slane %v6335_v12, 2 }
 0x367   : > { %2068 = vst.msk [vmem:[#allocation2 + $0x189] sm:$0xff] %vm225_vm0, %v2036_v62  ;;  %v2035_v20 = vmax.f32 %v1997_v7, 0.0  ;;  %v2249_v29 = vrot.slane %v6626_v23, 1  ;;  %v2349_v13 = vsel %vm625_vm3, %v2347_v9, %v2348_v1  ;;  %v2357_v1 = vrot.slane %v6338_v27, 2 }
 0x368   : > { %v6629_v3 = vld [vmem:[#allocation2 + $0x170] sm:$0xff]  ;;  %v6631_v32 = vld [vmem:[#allocation2 + $0x168] sm:$0xff]  ;;  %v2360_v9 = vrot.slane %v6321_v37, 2 }
 0x369   : > { %2067 = vst.msk [vmem:[#allocation2 + $0x181] sm:$0xff] %vm225_vm0, %v2035_v20  ;;  %v2247_v50 = vrot.slane %v6629_v3, 1  ;;  %v2246_v38 = vrot.slane %v6631_v32, 1  ;;  %v2353_v20 = vrot.slane %v6312_v53, 2 }
 0x36b   : > { %v6641_v7 = vsel %vm448_vm2, %v2247_v50, %v2249_v29  ;;  %v6644_v62 = vsel %vm448_vm2, %v2246_v38, %v2247_v50  ;;  %v2355_v50 = vrot.slane %v6308_v30, 2  ;;  %v6661_v38 = vsel %vm625_vm3, %v2352_v51, %v2353_v20 }
 0x36c   : > { %8619 = vst [vmem:[#allocation134_spill] sm:$0xff] %v6641_v7  ;;  %8620 = vst [vmem:[#allocation55_spill] sm:$0xff] %v6644_v62  ;;  %2313 = vrot.lane.b32.xlu1 %v6641_v7, %s4220_s25  ;;  %2311 = vrot.lane.b32.xlu0 %v6644_v62, %s4220_s25  ;;  %v6671_v30 = vsel %vm625_vm3, %v2358_v36, %v2360_v9  ;;  %v2365_v51 = vrot.slane %v6344_v52, 2  ;;  %v2370_v9 = vrot.slane %v6367_v4, 2  ;;  %v2375_v7 = vrot.slane %v6390_v60, 2 }
 0x36d   : > { %v6658_v29 = vsel %vm625_vm3, %v2353_v20, %v2355_v50  ;;  %v2362_v20 = vrot.slane %v6361_v11, 2  ;;  %v2380_v62 = vrot.slane %v6413_v41, 2 }
 0x370   : > { %2429 = vrot.lane.b32.xlu1 %v2351_v56, %s4221_s26  ;;  %2427 = vrot.lane.b32.xlu0 %v2349_v13, %s4221_s26  ;;  %v6674_v56 = vsel %vm625_vm3, %v2357_v1, %v2358_v36  ;;  %v2363_v13 = vrot.slane %v6358_v44, 2  ;;  %v2368_v36 = vrot.slane %v6381_v16, 2  ;;  %v2367_v1 = vrot.slane %v6384_v57, 2 }
 0x372   : > { %v6684_v37 = vsel %vm625_vm3, %v2363_v13, %v2365_v51  ;;  %v6687_v50 = vsel %vm625_vm3, %v2362_v20, %v2363_v13  ;;  %v6697_v52 = vsel %vm625_vm3, %v2368_v36, %v2370_v9  ;;  %v6700_v51 = vsel %vm625_vm3, %v2367_v1, %v2368_v36 }
 0x373   : > { %v2373_v13 = vrot.slane %v6404_v47, 2  ;;  %v2372_v20 = vrot.slane %v6407_v34, 2  ;;  %v2378_v36 = vrot.slane %v6427_v61, 2  ;;  %v2377_v1 = vrot.slane %v6430_v40, 2 }
 0x374   : > { %2433 = vrot.lane.b32.xlu1 %v6658_v29, %s4221_s26  ;;  %2431 = vrot.lane.b32.xlu0 %v6661_v38, %s4221_s26 }
 0x375   : > { %v6710_v4 = vsel %vm625_vm3, %v2373_v13, %v2375_v7  ;;  %v6713_v9 = vsel %vm625_vm3, %v2372_v20, %v2373_v13  ;;  %v6723_v60 = vsel %vm625_vm3, %v2378_v36, %v2380_v62  ;;  %v6726_v7 = vsel %vm625_vm3, %v2377_v1, %v2378_v36 }
 0x376   : > { %8621 = vst [vmem:[#allocation56_spill] sm:$0xff] %v6723_v60  ;;  %8622 = vst [vmem:[#allocation84_spill] sm:$0xff] %v6726_v7  ;;  %v2383_v13 = vrot.slane %v6450_v54, 2  ;;  %v2382_v20 = vrot.slane %v6453_v26, 2  ;;  %v2388_v36 = vrot.slane %v6473_v46, 2  ;;  %v2387_v1 = vrot.slane %v6476_v21, 2 }
 0x378   : > { %2437 = vrot.lane.b32.xlu1 %v6671_v30, %s4221_s26  ;;  %2435 = vrot.lane.b32.xlu0 %v6674_v56, %s4221_s26  ;;  %v6736_v41 = vsel %vm625_vm3, %v2383_v13, %v2385_v31  ;;  %v6739_v62 = vsel %vm625_vm3, %v2382_v20, %v2383_v13  ;;  %v6752_v31 = vsel %vm625_vm3, %v2387_v1, %v2388_v36  ;;  %v2393_v13 = vrot.slane %v6495_v42, 2 }
 0x379   : > { %8623 = vst [vmem:[#allocation87_spill] sm:$0xff] %v6736_v41  ;;  %8624 = vst [vmem:[#allocation113_spill] sm:$0xff] %v6739_v62  ;;  %v2392_v20 = vrot.slane %v6497_v22, 2  ;;  %v2398_v1 = vrot.slane %v6517_v17, 2 }
 0x37a   : > { %8626 = vst [vmem:[#allocation136_spill] sm:$0xff] %v6752_v31 }
 0x37c   : > { %2441 = vrot.lane.b32.xlu1 %v6684_v37, %s4221_s26  ;;  %2439 = vrot.lane.b32.xlu0 %v6687_v50, %s4221_s26 }
 0x380   : > { %2445 = vrot.lane.b32.xlu1 %v6697_v52, %s4221_s26  ;;  %2443 = vrot.lane.b32.xlu0 %v6700_v51, %s4221_s26 }
 0x384   : > { %2449 = vrot.lane.b32.xlu1 %v6710_v4, %s4221_s26  ;;  %2447 = vrot.lane.b32.xlu0 %v6713_v9, %s4221_s26 }
 0x388   : > { %2453 = vrot.lane.b32.xlu1 %v6723_v60, %s4221_s26  ;;  %2451 = vrot.lane.b32.xlu0 %v6726_v7, %s4221_s26  ;;  %v2390_v60 = vrot.slane %v6459_v48, 2  ;;  %v2395_v48 = vrot.slane %v6482_v2, 2  ;;  %v2397_v7 = vrot.slane %v6519_v24, 2 }
 0x38a   : > { %v6749_v6 = vsel %vm625_vm3, %v2388_v36, %v2390_v60  ;;  %v6766_v60 = vsel %vm625_vm3, %v2393_v13, %v2395_v48  ;;  %v6769_v36 = vsel %vm625_vm3, %v2392_v20, %v2393_v13  ;;  %v6786_v13 = vsel %vm625_vm3, %v2397_v7, %v2398_v1 }
 0x38b   : > { %8625 = vst [vmem:[#allocation117_spill] sm:$0xff] %v6749_v6  ;;  %8628 = vst [vmem:[#allocation58_spill] sm:$0xff] %v6766_v60  ;;  %v2403_v20 = vrot.slane %v6538_v35, 2 }
 0x38c   : > { %2457 = vrot.lane.b32.xlu1 %v6736_v41, %s4221_s26  ;;  %2455 = vrot.lane.b32.xlu0 %v6739_v62, %s4221_s26  ;;  %v6760_v41 = vpop.permute.xlu0 %2251  ;;  %v6762_v62 = vpop.permute.xlu1 %2253  ;;  %8629 = vst [vmem:[#allocation86_spill] sm:$0xff] %v6769_v36  ;;  %8632 = vst [vmem:[#allocation119_spill] sm:$0xff] %v6786_v13 }
 0x38d   : > { %8627 = vst [vmem:[#allocation57_spill] sm:$0xff] %v6762_v62  ;;  %v2402_v62 = vrot.slane %v6540_v63, 2 }
 0x38f   : > { %v6803_v7 = vsel %vm625_vm3, %v2402_v62, %v2403_v20 }
 0x390   : > { %2461 = vrot.lane.b32.xlu1 %v6749_v6, %s4221_s26  ;;  %2459 = vrot.lane.b32.xlu0 %v6752_v31, %s4221_s26  ;;  %v2400_v6 = vrot.slane %v6504_v15, 2  ;;  %v2405_v15 = vrot.slane %v6525_v25, 2  ;;  %8635 = vst [vmem:[#allocation88_spill] sm:$0xff] %v6803_v7  ;;  %v2410_v25 = vrot.slane %v6557_v39, 2  ;;  %v2415_v39 = vrot.slane %v6580_v49, 2 }
 0x391   : > { %v2420_v49 = vrot.slane %v6603_v33, 2 }
 0x392   : > { %v6783_v48 = vsel %vm625_vm3, %v2398_v1, %v2400_v6  ;;  %v6800_v6 = vsel %vm625_vm3, %v2403_v20, %v2405_v15  ;;  %v2408_v1 = vrot.slane %v6560_v55, 2  ;;  %v2413_v20 = vrot.slane %v6583_v45, 2 }
 0x393   : > { %8631 = vst [vmem:[#allocation116_spill] sm:$0xff] %v6783_v48  ;;  %8634 = vst [vmem:[#allocation60_spill] sm:$0xff] %v6800_v6 }
 0x394   : > { %2465 = vrot.lane.b32.xlu1 %v6766_v60, %s4221_s26  ;;  %2463 = vrot.lane.b32.xlu0 %v6769_v36, %s4221_s26  ;;  %v6817_v15 = vsel %vm625_vm3, %v2408_v1, %v2410_v25 }
 0x395   : > { %8637 = vst [vmem:[#allocation118_spill] sm:$0xff] %v6817_v15 }
 0x397   : > { %v6778_v31 = vpop.permute.xlu0 %2255  ;;  %v6780_v2 = vpop.permute.xlu1 %2257 }
 0x398   : > { %8630 = vst [vmem:[#allocation3_spill] sm:$0xff] %v6780_v2  ;;  %2469 = vrot.lane.b32.xlu1 %v6783_v48, %s4221_s26  ;;  %2467 = vrot.lane.b32.xlu0 %v6786_v13, %s4221_s26  ;;  %v2407_v2 = vrot.slane %v6562_v59, 2 }
 0x39a   : > { %v6820_v62 = vsel %vm625_vm3, %v2407_v2, %v2408_v1  ;;  %v2418_v2 = vrot.slane %v6606_v43, 2  ;;  %v2417_v1 = vrot.slane %v6608_v28, 2 }
 0x39b   : > { %v6795_v60 = vpop.permute.xlu0 %2259  ;;  %v6797_v36 = vpop.permute.xlu1 %2261 }
 0x39c   : > { %8633 = vst [vmem:[#allocation59_spill] sm:$0xff] %v6797_v36  ;;  %2473 = vrot.lane.b32.xlu1 %v6800_v6, %s4221_s26  ;;  %2471 = vrot.lane.b32.xlu0 %v6803_v7, %s4221_s26  ;;  %v2412_v36 = vrot.slane %v6585_v5, 2  ;;  %v6830_v6 = vsel %vm625_vm3, %v2413_v20, %v2415_v39  ;;  %v6847_v39 = vsel %vm625_vm3, %v2418_v2, %v2420_v49 }
 0x39d   : > { %8638 = vst [vmem:[#allocation30_spill] sm:$0xff] %v6830_v6  ;;  %8640 = vst [vmem:[#allocation62_spill] sm:$0xff] %v6847_v39 }
 0x39e   : > { %v6833_v25 = vsel %vm625_vm3, %v2412_v36, %v2413_v20  ;;  %v6850_v36 = vsel %vm625_vm3, %v2417_v1, %v2418_v2  ;;  %v2423_v20 = vrot.slane %v6629_v3, 2 }
 0x39f   : > { %v6812_v48 = vpop.permute.xlu0 %2263  ;;  %v6814_v13 = vpop.permute.xlu1 %2265  ;;  %8639 = vst [vmem:[#allocation61_spill] sm:$0xff] %v6833_v25 }
 0x3a0   : > { %8636 = vst [vmem:[#allocation4_spill] sm:$0xff] %v6814_v13  ;;  %2477 = vrot.lane.b32.xlu1 %v6817_v15, %s4221_s26  ;;  %2475 = vrot.lane.b32.xlu0 %v6820_v62, %s4221_s26  ;;  %v2422_v15 = vrot.slane %v6631_v32, 2 }
 0x3a2   : > { %v6867_v2 = vsel %vm625_vm3, %v2422_v15, %v2423_v20 }
 0x3a3   : > { %v6837_v7 = vpop.permute.xlu0 %2267  ;;  %v6839_v13 = vpop.permute.xlu1 %2269  ;;  %8642 = vst [vmem:[#allocation91_spill] sm:$0xff] %v6867_v2 }
 0x3a4   : > { %2481 = vrot.lane.b32.xlu1 %v6830_v6, %s4221_s26  ;;  %2479 = vrot.lane.b32.xlu0 %v6833_v25, %s4221_s26  ;;  %v2425_v6 = vrot.slane %v6626_v23, 2 }
 0x3a6   : > { %v6864_v49 = vsel %vm625_vm3, %v2423_v20, %v2425_v6 }
 0x3a7   : > { %v6859_v25 = vpop.permute.xlu0 %2271  ;;  %v6861_v33 = vpop.permute.xlu1 %2273  ;;  %8641 = vst [vmem:[#allocation89_spill] sm:$0xff] %v6864_v49 }
 0x3a8   : > { %2485 = vrot.lane.b32.xlu1 %v6847_v39, %s4221_s26  ;;  %2483 = vrot.lane.b32.xlu0 %v6850_v36, %s4221_s26 }
 0x3ab   : > { %v6873_v1 = vpop.permute.xlu0 %2275  ;;  %v6875_v39 = vpop.permute.xlu1 %2277 }
 0x3ac   : > { %2489 = vrot.lane.b32.xlu1 %v6864_v49, %s4221_s26  ;;  %2487 = vrot.lane.b32.xlu0 %v6867_v2, %s4221_s26 }
 0x3af   : > { %v6885_v23 = vpop.permute.xlu0 %2279  ;;  %v6887_v6 = vpop.permute.xlu1 %2281 }
 0x3b0   : > { %2527 = vrot.lane.b32.xlu1 %v6312_v53, %s4222_s27  ;;  %2525 = vrot.lane.b32.xlu0 %v6315_v10, %s4222_s27  ;;  %8643 = vst [vmem:[#allocation120_spill] sm:$0xff] %v6887_v6  ;;  %v4180_v6 = vld [vmem:[#allocation2 + $0x8] sm:$0xff] }
 0x3b3   : > { %v6893_v53 = vpop.permute.xlu0 %2283  ;;  %v6895_v15 = vpop.permute.xlu1 %2285 }
 0x3b4   : > { %2531 = vrot.lane.b32.xlu1 %v6335_v12, %s4222_s27  ;;  %2529 = vrot.lane.b32.xlu0 %v6338_v27, %s4222_s27  ;;  %8644 = vst [vmem:[#allocation31_spill] sm:$0xff] %v6893_v53  ;;  %8645 = vst [vmem:[#allocation63_spill] sm:$0xff] %v6895_v15 }
 0x3b7   : > { %v6905_v10 = vpop.permute.xlu0 %2287  ;;  %v6907_v20 = vpop.permute.xlu1 %2289 }
 0x3b8   : > { %2535 = vrot.lane.b32.xlu1 %v6358_v44, %s4222_s27  ;;  %2533 = vrot.lane.b32.xlu0 %v6361_v11, %s4222_s27  ;;  %8646 = vst [vmem:[#allocation64_spill] sm:$0xff] %v6905_v10  ;;  %8647 = vst [vmem:[#allocation90_spill] sm:$0xff] %v6907_v20 }
 0x3bb   : > { %v6913_v15 = vpop.permute.xlu0 %2291  ;;  %v6915_v53 = vpop.permute.xlu1 %2293 }
 0x3bc   : > { %2539 = vrot.lane.b32.xlu1 %v6381_v16, %s4222_s27  ;;  %2537 = vrot.lane.b32.xlu0 %v6384_v57, %s4222_s27  ;;  %8648 = vst [vmem:[#allocation6_spill] sm:$0xff] %v6913_v15  ;;  %8649 = vst [vmem:[#allocation34_spill] sm:$0xff] %v6915_v53 }
 0x3bf   : > { %v6925_v20 = vpop.permute.xlu0 %2295  ;;  %v6927_v10 = vpop.permute.xlu1 %2297 }
 0x3c0   : > { %2543 = vrot.lane.b32.xlu1 %v6404_v47, %s4222_s27  ;;  %2541 = vrot.lane.b32.xlu0 %v6407_v34, %s4222_s27  ;;  %8650 = vst [vmem:[#allocation93_spill] sm:$0xff] %v6925_v20  ;;  %8651 = vst [vmem:[#allocation121_spill] sm:$0xff] %v6927_v10 }
 0x3c4   : > { %2547 = vrot.lane.b32.xlu1 %v6427_v61, %s4222_s27  ;;  %2545 = vrot.lane.b32.xlu0 %v6430_v40, %s4222_s27 }
 0x3c7   : > { %v6933_v53 = vpop.permute.xlu0 %2299  ;;  %v6935_v15 = vpop.permute.xlu1 %2301 }
 0x3c8   : > { %2551 = vrot.lane.b32.xlu1 %v6450_v54, %s4222_s27  ;;  %2549 = vrot.lane.b32.xlu0 %v6453_v26, %s4222_s27  ;;  %8652 = vst [vmem:[#allocation36_spill] sm:$0xff] %v6933_v53  ;;  %8653 = vst [vmem:[#allocation114_spill] sm:$0xff] %v6935_v15 }
 0x3cc   : > { %2555 = vrot.lane.b32.xlu1 %v6473_v46, %s4222_s27  ;;  %2553 = vrot.lane.b32.xlu0 %v6476_v21, %s4222_s27 }
 0x3ce   : > { %v6941_v49 = vpop.permute.xlu0 %2303  ;;  %v6943_v20 = vpop.permute.xlu1 %2305 }
 0x3cf   : > { %8654 = vst [vmem:[#allocation32_spill] sm:$0xff] %v6941_v49  ;;  %8655 = vst [vmem:[#allocation137_spill] sm:$0xff] %v6943_v20 }
 0x3d0   : > { %2559 = vrot.lane.b32.xlu1 %v6495_v42, %s4222_s27  ;;  %2557 = vrot.lane.b32.xlu0 %v6497_v22, %s4222_s27 }
 0x3d4   : > { %2563 = vrot.lane.b32.xlu1 %v6517_v17, %s4222_s27  ;;  %2561 = vrot.lane.b32.xlu0 %v6519_v24, %s4222_s27 }
 0x3d6   : > { %v6949_v10 = vpop.permute.xlu0 %2307  ;;  %v6951_v53 = vpop.permute.xlu1 %2309 }
 0x3d7   : > { %8656 = vst [vmem:[#allocation163_spill] sm:$0xff] %v6949_v10  ;;  %8657 = vst [vmem:[#allocation65_spill] sm:$0xff] %v6951_v53 }
 0x3d8   : > { %2567 = vrot.lane.b32.xlu1 %v6538_v35, %s4222_s27  ;;  %2565 = vrot.lane.b32.xlu0 %v6540_v63, %s4222_s27 }
 0x3dc   : > { %2571 = vrot.lane.b32.xlu1 %v6560_v55, %s4222_s27  ;;  %2569 = vrot.lane.b32.xlu0 %v6562_v59, %s4222_s27  ;;  %v3389_v55 = vld [vmem:[%s7976_s3 + $0x40] sm:$0xff] }
 0x3dd   : > { %4064 = vmatprep.subr.mxu1 %v3389_v55 }
 0x3de   : > { %v6957_v17 = vpop.permute.xlu0 %2311  ;;  %v6959_v49 = vpop.permute.xlu1 %2313  ;;  %4065 = vmatpush3.msra.mxu1 %v3389_v55  ;;  %v6994_v55 = vld [vmem:[#allocation2 + $0x180] sm:$0xff] }
 0x3df   : > { %8658 = vst [vmem:[#allocation139_spill] sm:$0xff] %v6957_v17  ;;  %8659 = vst [vmem:[#allocation5_spill] sm:$0xff] %v6959_v49 }
 0x3e0   : > { %2575 = vrot.lane.b32.xlu1 %v6583_v45, %s4222_s27  ;;  %2573 = vrot.lane.b32.xlu0 %v6585_v5, %s4222_s27  ;;  %v3388_v5 = vld [vmem:[%s7976_s3 + $0x38] sm:$0xff]  ;;  %8660 = vst [vmem:[#allocation66_spill] sm:$0xff] %v6994_v55 }
 0x3e1   : > { %4066 = vmatprep.subr.mxu1 %v3388_v5 }
 0x3e2   : > { %v6965_v35 = vpop.permute.xlu0 %2427  ;;  %v6967_v63 = vpop.permute.xlu1 %2429  ;;  %4067 = vmatpush3.msra.mxu1 %v3388_v5  ;;  %v3385_v5 = vld [vmem:[%s7976_s3 + $0x20] sm:$0xff] }
 0x3e4   : > { %2579 = vrot.lane.b32.xlu1 %v6606_v43, %s4222_s27  ;;  %2577 = vrot.lane.b32.xlu0 %v6608_v28, %s4222_s27  ;;  %v3387_v28 = vld [vmem:[%s7976_s3 + $0x30] sm:$0xff] }
 0x3e5   : > { %4068 = vmatprep.subr.mxu1 %v3387_v28 }
 0x3e6   : > { %v6976_v59 = vpop.permute.xlu0 %2431  ;;  %v6978_v45 = vpop.permute.xlu1 %2433  ;;  %4069 = vmatpush3.msra.mxu1 %v3387_v28 }
 0x3e8   : > { %2583 = vrot.lane.b32.xlu1 %v6629_v3, %s4222_s27  ;;  %2581 = vrot.lane.b32.xlu0 %v6631_v32, %s4222_s27  ;;  %v3386_v3 = vld [vmem:[%s7976_s3 + $0x28] sm:$0xff] }
 0x3e9   : > { %4070 = vmatprep.subr.mxu1 %v3386_v3 }
 0x3ea   : > { %v6990_v43 = vpop.permute.xlu0 %2435  ;;  %v6992_v49 = vpop.permute.xlu1 %2437  ;;  %4071 = vmatpush3.msra.mxu1 %v3386_v3  ;;  %v3383_v3 = vld [vmem:[%s7976_s3 + $0x10] sm:$0xff] }
 0x3eb   : > { %4072 = vmatprep.subr.mxu1 %v3385_v5 }
 0x3ec   : > { %2627 = vrot.lane.b32.xlu1 %v6329_v19, %s4223_s28  ;;  %2585 = vrot.lane.b32.xlu0 %v6994_v55, %s4222_s27  ;;  %v3384_v19 = vld [vmem:[%s7976_s3 + $0x18] sm:$0xff] }
 0x3ed   : > { %4073 = vmatpush3.msra.mxu1 %v3385_v5  ;;  %v3382_v5 = vld [vmem:[%s7976_s3 + $0x8] sm:$0xff] }
 0x3ee   : > { %v7003_v32 = vpop.permute.xlu0 %2439  ;;  %v7005_v17 = vpop.permute.xlu1 %2441  ;;  %4074 = vmatprep.subr.mxu1 %v3384_v19 }
 0x3ef   : > { %4075 = vmatpush3.msra.mxu1 %v3384_v19 }
 0x3f0   : > { %2629 = vrot.lane.b32.xlu0 %v6326_v18, %s4223_s28  ;;  %2728 = vrot.lane.b32.xlu1 %v6661_v38, %s4224_s29 }
 0x3f1   : > { %4076 = vmatprep.subr.mxu1 %v3383_v3 }
 0x3f2   : > { %v7017_v28 = vpop.permute.xlu0 %2443  ;;  %v7019_v53 = vpop.permute.xlu1 %2445  ;;  %4077 = vmatpush3.msra.mxu1 %v3383_v3 }
 0x3f3   : > { %4078 = vmatprep.subr.mxu1 %v3382_v5 }
 0x3f4   : > { %2730 = vrot.lane.b32.xlu0 %v6658_v29, %s4224_s29  ;;  %2826 = vrot.lane.b32.xlu1 %v6338_v27, %s4225_s30  ;;  %v3381_v27 = vld [vmem:[%s7976_s3] sm:$0xff] }
 0x3f5   : > { %4079 = vmatpush3.msra.mxu1 %v3382_v5 }
 0x3f6   : > { %v7028_v18 = vpop.permute.xlu0 %2447  ;;  %v7030_v38 = vpop.permute.xlu1 %2449  ;;  %4080 = vmatprep.subr.mxu1 %v3381_v27 }
 0x3f7   : > { %4081 = vmatpush3.msra.mxu1 %v3381_v27 }
 0x3f8   : > { %2828 = vrot.lane.b32.xlu0 %v6335_v12, %s4225_s30  ;;  %2928 = vrot.lane.b32.xlu1 %v6352_v0, %s4226_s6 }
 0x3fa   : > { %v7042_v29 = vpop.permute.xlu0 %2451  ;;  %v7044_v19 = vpop.permute.xlu1 %2453 }
 0x3fc   : > { %2631 = vrot.lane.b32.xlu0 %v6352_v0, %s4223_s28  ;;  %2930 = vrot.lane.b32.xlu1 %v6349_v58, %s4226_s6 }
 0x3fe   : > { %v7050_v12 = vpop.permute.xlu0 %2455  ;;  %v7052_v3 = vpop.permute.xlu1 %2457 }
 0x3ff   : > { %8661 = vst [vmem:[#allocation92_spill] sm:$0xff] %v7052_v3 }
 0x400   : > { %3029 = vrot.lane.b32.xlu0 %v6674_v56, %s4227_s10  ;;  %2633 = vrot.lane.b32.xlu1 %v6349_v58, %s4223_s28 }
 0x402   : > { %v7058_v10 = vpop.permute.xlu0 %2459  ;;  %v7060_v5 = vpop.permute.xlu1 %2461 }
 0x403   : > { %8662 = vst [vmem:[#allocation8_spill] sm:$0xff] %v7058_v10  ;;  %8663 = vst [vmem:[#allocation39_spill] sm:$0xff] %v7060_v5 }
 0x404   : > { %2732 = vrot.lane.b32.xlu0 %v6674_v56, %s4224_s29  ;;  %3031 = vrot.lane.b32.xlu1 %v6671_v30, %s4227_s10 }
 0x406   : > { %v7066_v0 = vpop.permute.xlu0 %2463  ;;  %v7068_v27 = vpop.permute.xlu1 %2465 }
 0x407   : > { %8664 = vst [vmem:[#allocation95_spill] sm:$0xff] %v7066_v0  ;;  %8665 = vst [vmem:[#allocation122_spill] sm:$0xff] %v7068_v27 }
 0x408   : > { %2734 = vrot.lane.b32.xlu0 %v6671_v30, %s4224_s29  ;;  %2830 = vrot.lane.b32.xlu1 %v6361_v11, %s4225_s30 }
 0x40a   : > { %v7074_v58 = vpop.permute.xlu0 %2467  ;;  %v7076_v20 = vpop.permute.xlu1 %2469 }
 0x40b   : > { %8666 = vst [vmem:[#allocation40_spill] sm:$0xff] %v7074_v58  ;;  %8667 = vst [vmem:[#allocation162_spill] sm:$0xff] %v7076_v20 }
 0x40c   : > { %2832 = vrot.lane.b32.xlu0 %v6358_v44, %s4225_s30  ;;  %2932 = vrot.lane.b32.xlu1 %v6375_v14, %s4226_s6 }
 0x40e   : > { %v7082_v56 = vpop.permute.xlu0 %2471  ;;  %v7084_v15 = vpop.permute.xlu1 %2473 }
 0x40f   : > { %8668 = vst [vmem:[#allocation33_spill] sm:$0xff] %v7082_v56  ;;  %8669 = vst [vmem:[#allocation138_spill] sm:$0xff] %v7084_v15 }
 0x410   : > { %2635 = vrot.lane.b32.xlu0 %v6375_v14, %s4223_s28  ;;  %2934 = vrot.lane.b32.xlu1 %v6372_v8, %s4226_s6 }
 0x412   : > { %v7090_v11 = vpop.permute.xlu0 %2475  ;;  %v7092_v30 = vpop.permute.xlu1 %2477 }
 0x413   : > { %8670 = vst [vmem:[#allocation165_spill] sm:$0xff] %v7090_v11  ;;  %8671 = vst [vmem:[#allocation67_spill] sm:$0xff] %v7092_v30 }
 0x414   : > { %3033 = vrot.lane.b32.xlu0 %v6687_v50, %s4227_s10  ;;  %2637 = vrot.lane.b32.xlu1 %v6372_v8, %s4223_s28 }
 0x416   : > { %v7098_v44 = vpop.permute.xlu0 %2479  ;;  %v7100_v56 = vpop.permute.xlu1 %2481 }
 0x417   : > { %8672 = vst [vmem:[#allocation141_spill] sm:$0xff] %v7098_v44  ;;  %8673 = vst [vmem:[#allocation7_spill] sm:$0xff] %v7100_v56 }
 0x418   : > { %2736 = vrot.lane.b32.xlu0 %v6687_v50, %s4224_s29  ;;  %3035 = vrot.lane.b32.xlu1 %v6684_v37, %s4227_s10  ;;  %v8678_v50 = vld [vmem:[#allocation49_spill] sm:$0xff] }
 0x41a   : > { %v7106_v14 = vpop.permute.xlu0 %2483  ;;  %v7108_v11 = vpop.permute.xlu1 %2485 }
 0x41b   : > { %8674 = vst [vmem:[#allocation68_spill] sm:$0xff] %v7106_v14  ;;  %8675 = vst [vmem:[#allocation94_spill] sm:$0xff] %v7108_v11 }
 0x41c   : > { %2738 = vrot.lane.b32.xlu0 %v6684_v37, %s4224_s29  ;;  %2834 = vrot.lane.b32.xlu1 %v6384_v57, %s4225_s30  ;;  %v8679_v37 = vld [vmem:[#allocation47_spill] sm:$0xff] }
 0x41e   : > { %v7114_v8 = vpop.permute.xlu0 %2487  ;;  %v7116_v44 = vpop.permute.xlu1 %2489 }
 0x41f   : > { %8676 = vst [vmem:[#allocation10_spill] sm:$0xff] %v7114_v8  ;;  %8677 = vst [vmem:[#allocation38_spill] sm:$0xff] %v7116_v44 }
 0x420   : > { %2836 = vrot.lane.b32.xlu0 %v6381_v16, %s4225_s30  ;;  %2936 = vrot.lane.b32.xlu1 %v8678_v50, %s4226_s6 }
 0x422   : > { %v7122_v56 = vpop.permute.xlu0 %2525  ;;  %v7124_v14 = vpop.permute.xlu1 %2527 }
 0x424   : > { %2639 = vrot.lane.b32.xlu0 %v8678_v50, %s4223_s28  ;;  %2938 = vrot.lane.b32.xlu1 %v8679_v37, %s4226_s6 }
 0x426   : > { %v7130_v57 = vpop.permute.xlu0 %2529  ;;  %v7132_v8 = vpop.permute.xlu1 %2531 }
 0x428   : > { %3037 = vrot.lane.b32.xlu0 %v6700_v51, %s4227_s10  ;;  %2641 = vrot.lane.b32.xlu1 %v8679_v37, %s4223_s28 }
 0x42a   : > { %v7138_v16 = vpop.permute.xlu0 %2533  ;;  %v7140_v44 = vpop.permute.xlu1 %2535 }
 0x42c   : > { %2740 = vrot.lane.b32.xlu0 %v6700_v51, %s4224_s29  ;;  %3039 = vrot.lane.b32.xlu1 %v6697_v52, %s4227_s10  ;;  %v8680_v51 = vld [vmem:[#allocation50_spill] sm:$0xff] }
 0x42e   : > { %v7146_v50 = vpop.permute.xlu0 %2537  ;;  %v7148_v11 = vpop.permute.xlu1 %2539 }
 0x430   : > { %2742 = vrot.lane.b32.xlu0 %v6697_v52, %s4224_s29  ;;  %2838 = vrot.lane.b32.xlu1 %v6407_v34, %s4225_s30  ;;  %v8681_v52 = vld [vmem:[#allocation78_spill] sm:$0xff] }
 0x432   : > { %v7154_v37 = vpop.permute.xlu0 %2541  ;;  %v7156_v30 = vpop.permute.xlu1 %2543 }
 0x434   : > { %2840 = vrot.lane.b32.xlu0 %v6404_v47, %s4225_s30  ;;  %2940 = vrot.lane.b32.xlu1 %v8680_v51, %s4226_s6 }
 0x436   : > { %v7162_v15 = vpop.permute.xlu0 %2545  ;;  %v7164_v20 = vpop.permute.xlu1 %2547 }
 0x438   : > { %2643 = vrot.lane.b32.xlu0 %v8680_v51, %s4223_s28  ;;  %2942 = vrot.lane.b32.xlu1 %v8681_v52, %s4226_s6 }
 0x43a   : > { %v7170_v34 = vpop.permute.xlu0 %2549  ;;  %v7172_v58 = vpop.permute.xlu1 %2551 }
 0x43c   : > { %3041 = vrot.lane.b32.xlu0 %v6713_v9, %s4227_s10  ;;  %2645 = vrot.lane.b32.xlu1 %v8681_v52, %s4223_s28 }
 0x43e   : > { %v7178_v47 = vpop.permute.xlu0 %2553  ;;  %v7180_v27 = vpop.permute.xlu1 %2555 }
 0x43f   : > { %8682 = vst [vmem:[#allocation97_spill] sm:$0xff] %v7178_v47  ;;  %8683 = vst [vmem:[#allocation123_spill] sm:$0xff] %v7180_v27  ;;  %v8707_v47 = vld [vmem:[#allocation57_spill] sm:$0xff] }
 0x440   : > { %2744 = vrot.lane.b32.xlu0 %v6713_v9, %s4224_s29  ;;  %3043 = vrot.lane.b32.xlu1 %v6710_v4, %s4227_s10  ;;  %v8688_v9 = vld [vmem:[#allocation106_spill] sm:$0xff] }
 0x442   : > { %v7186_v51 = vpop.permute.xlu0 %2557  ;;  %v7188_v0 = vpop.permute.xlu1 %2559 }
 0x443   : > { %8684 = vst [vmem:[#allocation157_spill] sm:$0xff] %v7186_v51  ;;  %8685 = vst [vmem:[#allocation164_spill] sm:$0xff] %v7188_v0  ;;  %v4179_v0 = vld [vmem:[#allocation2] sm:$0xff] }
 0x444   : > { %2746 = vrot.lane.b32.xlu0 %v6710_v4, %s4224_s29  ;;  %2842 = vrot.lane.b32.xlu1 %v6430_v40, %s4225_s30  ;;  %v8691_v4 = vld [vmem:[#allocation81_spill] sm:$0xff]  ;;  %v3125_v55 = vsel %vm225_vm0, %v4179_v0, %v6760_v41  ;;  %v3126_v41 = vsel %vm225_vm0, %v4180_v6, %v8707_v47 }
 0x446   : > { %v7194_v52 = vpop.permute.xlu0 %2561  ;;  %v7196_v5 = vpop.permute.xlu1 %2563 }
 0x447   : > { %8686 = vst [vmem:[#allocation35_spill] sm:$0xff] %v7194_v52  ;;  %8687 = vst [vmem:[#allocation140_spill] sm:$0xff] %v7196_v5  ;;  %v8694_v5 = vld [vmem:[#allocation84_spill] sm:$0xff] }
 0x448   : > { %2844 = vrot.lane.b32.xlu0 %v6427_v61, %s4225_s30  ;;  %2944 = vrot.lane.b32.xlu1 %v8688_v9, %s4226_s6 }
 0x44a   : > { %v7202_v10 = vpop.permute.xlu0 %2565  ;;  %v7204_v51 = vpop.permute.xlu1 %2567 }
 0x44b   : > { %8689 = vst [vmem:[#allocation167_spill] sm:$0xff] %v7202_v10  ;;  %8690 = vst [vmem:[#allocation69_spill] sm:$0xff] %v7204_v51 }
 0x44c   : > { %2647 = vrot.lane.b32.xlu0 %v8688_v9, %s4223_s28  ;;  %2946 = vrot.lane.b32.xlu1 %v8691_v4, %s4226_s6  ;;  %v8697_v9 = vld [vmem:[#allocation56_spill] sm:$0xff] }
 0x44e   : > { %v7210_v40 = vpop.permute.xlu0 %2569  ;;  %v7212_v52 = vpop.permute.xlu1 %2571 }
 0x44f   : > { %8692 = vst [vmem:[#allocation143_spill] sm:$0xff] %v7210_v40  ;;  %8693 = vst [vmem:[#allocation9_spill] sm:$0xff] %v7212_v52 }
 0x450   : > { %3045 = vrot.lane.b32.xlu0 %v8694_v5, %s4227_s10  ;;  %2649 = vrot.lane.b32.xlu1 %v8691_v4, %s4223_s28 }
 0x452   : > { %v7218_v61 = vpop.permute.xlu0 %2573  ;;  %v7220_v10 = vpop.permute.xlu1 %2575 }
 0x453   : > { %8695 = vst [vmem:[#allocation96_spill] sm:$0xff] %v7218_v61  ;;  %8696 = vst [vmem:[#allocation98_spill] sm:$0xff] %v7220_v10 }
 0x454   : > { %2748 = vrot.lane.b32.xlu0 %v8694_v5, %s4224_s29  ;;  %3047 = vrot.lane.b32.xlu1 %v8697_v9, %s4227_s10  ;;  %v8702_v5 = vld [vmem:[#allocation109_spill] sm:$0xff] }
 0x456   : > { %v7226_v51 = vpop.permute.xlu0 %2577  ;;  %v7228_v40 = vpop.permute.xlu1 %2579 }
 0x457   : > { %8698 = vst [vmem:[#allocation12_spill] sm:$0xff] %v7226_v51  ;;  %8699 = vst [vmem:[#allocation156_spill] sm:$0xff] %v7228_v40 }
 0x458   : > { %2750 = vrot.lane.b32.xlu0 %v8697_v9, %s4224_s29  ;;  %2846 = vrot.lane.b32.xlu1 %v6453_v26, %s4225_s30  ;;  %v8704_v9 = vld [vmem:[#allocation51_spill] sm:$0xff] }
 0x45a   : > { %v7234_v4 = vpop.permute.xlu0 %2581  ;;  %v7236_v61 = vpop.permute.xlu1 %2583 }
 0x45b   : > { %8700 = vst [vmem:[#allocation99_spill] sm:$0xff] %v7234_v4  ;;  %8701 = vst [vmem:[#allocation124_spill] sm:$0xff] %v7236_v61  ;;  %v8705_v4 = vld [vmem:[#allocation113_spill] sm:$0xff] }
 0x45c   : > { %2848 = vrot.lane.b32.xlu0 %v6450_v54, %s4225_s30  ;;  %2948 = vrot.lane.b32.xlu1 %v8702_v5, %s4226_s6 }
 0x45e   : > { %v7242_v10 = vpop.permute.xlu0 %2585  ;;  %v2628_v51 = vpop.permute.xlu1 %2627 }
 0x45f   : > { %8703 = vst [vmem:[#allocation44_spill] sm:$0xff] %v7242_v10  ;;  %v8706_v10 = vld [vmem:[#allocation87_spill] sm:$0xff] }
 0x460   : > { %2651 = vrot.lane.b32.xlu0 %v8702_v5, %s4223_s28  ;;  %2950 = vrot.lane.b32.xlu1 %v8704_v9, %s4226_s6 }
 0x462   : > { %v2630_v26 = vpop.permute.xlu0 %2629  ;;  %v2729_v40 = vpop.permute.xlu1 %2728 }
 0x464   : > { %3049 = vrot.lane.b32.xlu0 %v8705_v4, %s4227_s10  ;;  %2653 = vrot.lane.b32.xlu1 %v8704_v9, %s4223_s28  ;;  %v3157_v9 = vsel %vm1436_vm4, %v3125_v55, %v6965_v35 }
 0x466   : > { %v2731_v54 = vpop.permute.xlu0 %2730  ;;  %v2827_v61 = vpop.permute.xlu1 %2826 }
 0x468   : > { %2752 = vrot.lane.b32.xlu0 %v8705_v4, %s4224_s29  ;;  %3051 = vrot.lane.b32.xlu1 %v8706_v10, %s4227_s10  ;;  %v3189_v4 = vsel %vm1469_vm5, %v3157_v9, %v7122_v56  ;;  %v8710_v9 = vld [vmem:[#allocation136_spill] sm:$0xff] }
 0x469   : > { %v3221_v3 = vsel %vm1502_vm6, %v3189_v4, %v2628_v51 }
 0x46a   : > { %v2829_v5 = vpop.permute.xlu0 %2828  ;;  %v2929_v52 = vpop.permute.xlu1 %2928  ;;  %v3253_v0 = vsel %vm1535_vm7, %v3221_v3, %v2729_v40 }
 0x46b   : > { %v3285_v35 = vsel %vm1568_vm8, %v3253_v0, %v2827_v61  ;;  %v4181_v0 = vld [vmem:[#allocation2 + $0x18] sm:$0xff] }
 0x46c   : > { %2754 = vrot.lane.b32.xlu0 %v8706_v10, %s4224_s29  ;;  %2850 = vrot.lane.b32.xlu1 %v6476_v21, %s4225_s30  ;;  %v8708_v21 = vld [vmem:[#allocation52_spill] sm:$0xff]  ;;  %v3158_v10 = vsel %vm1436_vm4, %v3126_v41, %v6967_v63  ;;  %v3317_v56 = vsel %vm1601_vm9, %v3285_v35, %v2929_v52  ;;  %v8709_v63 = vld [vmem:[#allocation131_spill] sm:$0xff] }
 0x46d   : > { %v3190_v55 = vsel %vm1469_vm5, %v3158_v10, %v7124_v14 }
 0x46e   : > { %v2632_v2 = vpop.permute.xlu0 %2631  ;;  %v2931_v27 = vpop.permute.xlu1 %2930  ;;  %v3222_v3 = vsel %vm1502_vm6, %v3190_v55, %v2630_v26 }
 0x470   : > { %2852 = vrot.lane.b32.xlu0 %v6473_v46, %s4225_s30  ;;  %2952 = vrot.lane.b32.xlu1 %v8708_v21, %s4226_s6  ;;  %v3254_v46 = vsel %vm1535_vm7, %v3222_v3, %v2731_v54  ;;  %v4182_v3 = vld [vmem:[#allocation2 + $0x20] sm:$0xff] }
 0x471   : > { %v3286_v40 = vsel %vm1568_vm8, %v3254_v46, %v2829_v5  ;;  %v8711_v5 = vld [vmem:[#allocation117_spill] sm:$0xff] }
 0x472   : > { %v3030_v51 = vpop.permute.xlu0 %3029  ;;  %v2634_v6 = vpop.permute.xlu1 %2633  ;;  %v3318_v14 = vsel %vm1601_vm9, %v3286_v40, %v2931_v27 }
 0x473   : > { %v3349_v47 = vsel %vm1634_vm10, %v3317_v56, %v3030_v51 }
 0x474   : > { %2655 = vrot.lane.b32.xlu0 %v8708_v21, %s4223_s28  ;;  %2954 = vrot.lane.b32.xlu1 %v8709_v63, %s4226_s6  ;;  %v3127_v21 = vsel %vm225_vm0, %v4181_v0, %v6778_v31 }
 0x475   : > { %4082 = vmatprep.mubr.msk.f32.mxu1 %vm1683_vm11, %v3349_v47  ;;  %v3159_v10 = vsel %vm1436_vm4, %v3127_v21, %v6976_v59  ;;  %v8712_v47 = vld [vmem:[#allocation3_spill] sm:$0xff] }
 0x476   : > { %v2733_v52 = vpop.permute.xlu0 %2732  ;;  %v3032_v61 = vpop.permute.xlu1 %3031  ;;  %v3191_v35 = vsel %vm1469_vm5, %v3159_v10, %v7130_v57  ;;  %v3128_v31 = vsel %vm225_vm0, %v4182_v3, %v8712_v47  ;;  %v4183_v10 = vld [vmem:[#allocation2 + $0x30] sm:$0xff] }
 0x477   : > { %v3350_v26 = vsel %vm1634_vm10, %v3318_v14, %v3032_v61  ;;  %v3223_v51 = vsel %vm1502_vm6, %v3191_v35, %v2632_v2  ;;  %v3160_v59 = vsel %vm1436_vm4, %v3128_v31, %v6978_v45  ;;  %v8714_v45 = vld [vmem:[#allocation80_spill] sm:$0xff]  ;;  %v3129_v35 = vsel %vm225_vm0, %v4183_v10, %v6795_v60 }
 0x478   : > { %3053 = vrot.lane.b32.xlu0 %v8710_v9, %s4227_s10  ;;  %2657 = vrot.lane.b32.xlu1 %v8709_v63, %s4223_s28  ;;  %v3255_v46 = vsel %vm1535_vm7, %v3223_v51, %v2733_v52  ;;  %v3192_v2 = vsel %vm1469_vm5, %v3160_v59, %v7132_v8 }
 0x479   : > { %4083 = vmatmul.mubr.msk.f32.vlgmr.msra.gmra.mxu1 %vm1683_vm11, %v3350_v26  ;;  %v3224_v52 = vsel %vm1502_vm6, %v3192_v2, %v2634_v6 }
 0x47a   : > { %v2735_v54 = vpop.permute.xlu0 %2734  ;;  %v2831_v4 = vpop.permute.xlu1 %2830 }
 0x47b   : > { %v3287_v57 = vsel %vm1568_vm8, %v3255_v46, %v2831_v4  ;;  %v4184_v46 = vld [vmem:[#allocation2 + $0x38] sm:$0xff] }
 0x47c   : > { %2756 = vrot.lane.b32.xlu0 %v8710_v9, %s4224_s29  ;;  %3055 = vrot.lane.b32.xlu1 %v8711_v5, %s4227_s10 }
 0x47e   : > { %v2833_v27 = vpop.permute.xlu0 %2832  ;;  %v2933_v41 = vpop.permute.xlu1 %2932 }
 0x47f   : > { %v3319_v63 = vsel %vm1601_vm9, %v3287_v57, %v2933_v41  ;;  %v7358_v57 = vld [vmem:[#allocation2 + $0xf8] sm:$0xff] }
 0x480   : > { %2758 = vrot.lane.b32.xlu0 %v8711_v5, %s4224_s29  ;;  %2854 = vrot.lane.b32.xlu1 %v6497_v22, %s4225_s30  ;;  %v8713_v22 = vld [vmem:[#allocation83_spill] sm:$0xff]  ;;  %v8715_v5 = vld [vmem:[#allocation86_spill] sm:$0xff] }
 0x482   : > { %v2636_v55 = vpop.permute.xlu0 %2635  ;;  %v2935_v56 = vpop.permute.xlu1 %2934 }
 0x484   : > { %2856 = vrot.lane.b32.xlu0 %v6495_v42, %s4225_s30  ;;  %2956 = vrot.lane.b32.xlu1 %v8713_v22, %s4226_s6  ;;  %v3256_v42 = vsel %vm1535_vm7, %v3224_v52, %v2735_v54 }
 0x485   : > { %v3288_v26 = vsel %vm1568_vm8, %v3256_v42, %v2833_v27  ;;  %v8716_v27 = vld [vmem:[#allocation58_spill] sm:$0xff] }
 0x486   : > { %v3034_v40 = vpop.permute.xlu0 %3033  ;;  %v2638_v14 = vpop.permute.xlu1 %2637  ;;  %v3320_v8 = vsel %vm1601_vm9, %v3288_v26, %v2935_v56  ;;  %v3161_v56 = vsel %vm1436_vm4, %v3129_v35, %v6990_v43 }
 0x487   : > { %v3351_v61 = vsel %vm1634_vm10, %v3319_v63, %v3034_v40  ;;  %v3193_v51 = vsel %vm1469_vm5, %v3161_v56, %v7138_v16 }
 0x488   : > { %2659 = vrot.lane.b32.xlu0 %v8713_v22, %s4223_s28  ;;  %2958 = vrot.lane.b32.xlu1 %v8714_v45, %s4226_s6  ;;  %v3225_v31 = vsel %vm1502_vm6, %v3193_v51, %v2636_v55  ;;  %v8717_v22 = vld [vmem:[#allocation59_spill] sm:$0xff] }
 0x489   : > { %4085 = vmatprep.mubr.msk.f32.mxu1 %vm1683_vm11, %v3351_v61  ;;  %v3130_v60 = vsel %vm225_vm0, %v4184_v46, %v8717_v22 }
 0x48a   : > { %v2737_v9 = vpop.permute.xlu0 %2736  ;;  %v3036_v4 = vpop.permute.xlu1 %3035  ;;  %v3162_v43 = vsel %vm1436_vm4, %v3130_v60, %v6992_v49  ;;  %v8719_v49 = vld [vmem:[#allocation108_spill] sm:$0xff]  ;;  %v7406_v60 = vld [vmem:[#allocation2 + $0x110] sm:$0xff] }
 0x48b   : > { %v3352_v6 = vsel %vm1634_vm10, %v3320_v8, %v3036_v4  ;;  %v3257_v59 = vsel %vm1535_vm7, %v3225_v31, %v2737_v9  ;;  %v3194_v55 = vsel %vm1469_vm5, %v3162_v43, %v7140_v44  ;;  %v8720_v9 = vld [vmem:[#allocation119_spill] sm:$0xff] }
 0x48c   : > { %3057 = vrot.lane.b32.xlu0 %v8715_v5, %s4227_s10  ;;  %2661 = vrot.lane.b32.xlu1 %v8714_v45, %s4223_s28  ;;  %v3226_v52 = vsel %vm1502_vm6, %v3194_v55, %v2638_v14  ;;  %v4188_v31 = vld [vmem:[#allocation2 + $0x50] sm:$0xff] }
 0x48d   : > { %4086 = vmatmul.mubr.msk.f32.gmra.mxu1 %vm1683_vm11, %v3352_v6 }
 0x48e   : > { %v2739_v54 = vpop.permute.xlu0 %2738  ;;  %v2835_v41 = vpop.permute.xlu1 %2834 }
 0x48f   : > { %v3289_v16 = vsel %vm1568_vm8, %v3257_v59, %v2835_v41  ;;  %v3258_v42 = vsel %vm1535_vm7, %v3226_v52, %v2739_v54 }
 0x490   : > { %2760 = vrot.lane.b32.xlu0 %v8715_v5, %s4224_s29  ;;  %3059 = vrot.lane.b32.xlu1 %v8716_v27, %s4227_s10  ;;  %v8721_v5 = vld [vmem:[#allocation116_spill] sm:$0xff] }
 0x492   : > { %v2837_v0 = vpop.permute.xlu0 %2836  ;;  %v2937_v21 = vpop.permute.xlu1 %2936 }
 0x493   : > { %v3321_v2 = vsel %vm1601_vm9, %v3289_v16, %v2937_v21  ;;  %v3290_v45 = vsel %vm1568_vm8, %v3258_v42, %v2837_v0  ;;  %v7394_v21 = vld [vmem:[#allocation2 + $0x108] sm:$0xff] }
 0x494   : > { %2762 = vrot.lane.b32.xlu0 %v8716_v27, %s4224_s29  ;;  %2858 = vrot.lane.b32.xlu1 %v6519_v24, %s4225_s30  ;;  %v8718_v24 = vld [vmem:[#allocation112_spill] sm:$0xff]  ;;  %v4186_v27 = vld [vmem:[#allocation2 + $0x48] sm:$0xff] }
 0x495   : > { %v3131_v0 = vsel %vm225_vm0, %v4186_v27, %v6812_v48  ;;  %v8722_v48 = vld [vmem:[#allocation4_spill] sm:$0xff] }
 0x496   : > { %v2640_v3 = vpop.permute.xlu0 %2639  ;;  %v2939_v47 = vpop.permute.xlu1 %2938  ;;  %v3163_v10 = vsel %vm1436_vm4, %v3131_v0, %v7003_v32  ;;  %v3132_v46 = vsel %vm225_vm0, %v4188_v31, %v8722_v48  ;;  %v8723_v32 = vld [vmem:[#allocation53_spill] sm:$0xff] }
 0x497   : > { %v3322_v44 = vsel %vm1601_vm9, %v3290_v45, %v2939_v47  ;;  %v3195_v35 = vsel %vm1469_vm5, %v3163_v10, %v7146_v50  ;;  %v3164_v50 = vsel %vm1436_vm4, %v3132_v46, %v7005_v17  ;;  %v8724_v17 = vld [vmem:[#allocation133_spill] sm:$0xff]  ;;  %v4192_v10 = vld [vmem:[#allocation2 + $0x68] sm:$0xff] }
 0x498   : > { %2860 = vrot.lane.b32.xlu0 %v7358_v57, %s4225_s30  ;;  %2960 = vrot.lane.b32.xlu1 %v8718_v24, %s4226_s6  ;;  %v3227_v47 = vsel %vm1502_vm6, %v3195_v35, %v2640_v3  ;;  %v3196_v3 = vsel %vm1469_vm5, %v3164_v50, %v7148_v11 }
 0x49a   : > { %v3038_v63 = vpop.permute.xlu0 %3037  ;;  %v2642_v40 = vpop.permute.xlu1 %2641 }
 0x49b   : > { %v3353_v61 = vsel %vm1634_vm10, %v3321_v2, %v3038_v63  ;;  %v3228_v55 = vsel %vm1502_vm6, %v3196_v3, %v2642_v40 }
 0x49c   : > { %2663 = vrot.lane.b32.xlu0 %v8718_v24, %s4223_s28  ;;  %2962 = vrot.lane.b32.xlu1 %v8719_v49, %s4226_s6 }
 0x49d   : > { %4088 = vmatprep.mubr.msk.f32.mxu1 %vm1683_vm11, %v3353_v61 }
 0x49e   : > { %v2741_v26 = vpop.permute.xlu0 %2740  ;;  %v3040_v8 = vpop.permute.xlu1 %3039 }
 0x49f   : > { %v3354_v14 = vsel %vm1634_vm10, %v3322_v44, %v3040_v8  ;;  %v3259_v22 = vsel %vm1535_vm7, %v3227_v47, %v2741_v26  ;;  %v8726_v26 = vld [vmem:[#allocation60_spill] sm:$0xff] }
 0x4a0   : > { %3061 = vrot.lane.b32.xlu0 %v8720_v9, %s4227_s10  ;;  %2665 = vrot.lane.b32.xlu1 %v8719_v49, %s4223_s28  ;;  %v8725_v49 = vld [vmem:[#allocation88_spill] sm:$0xff] }
 0x4a1   : > { %4089 = vmatmul.mubr.msk.f32.gmra.mxu1 %vm1683_vm11, %v3354_v14 }
 0x4a2   : > { %v2743_v4 = vpop.permute.xlu0 %2742  ;;  %v2839_v6 = vpop.permute.xlu1 %2838 }
 0x4a3   : > { %v3291_v59 = vsel %vm1568_vm8, %v3259_v22, %v2839_v6  ;;  %v3260_v63 = vsel %vm1535_vm7, %v3228_v55, %v2743_v4  ;;  %v7442_v6 = vld [vmem:[#allocation2 + $0x120] sm:$0xff]  ;;  %v8729_v55 = vld [vmem:[#allocation118_spill] sm:$0xff] }
 0x4a4   : > { %2764 = vrot.lane.b32.xlu0 %v8720_v9, %s4224_s29  ;;  %3063 = vrot.lane.b32.xlu1 %v8721_v5, %s4227_s10  ;;  %v4190_v9 = vld [vmem:[#allocation2 + $0x60] sm:$0xff] }
 0x4a5   : > { %v3133_v4 = vsel %vm225_vm0, %v4190_v9, %v6837_v7  ;;  %v3134_v7 = vsel %vm225_vm0, %v4192_v10, %v6839_v13 }
 0x4a6   : > { %v2841_v54 = vpop.permute.xlu0 %2840  ;;  %v2941_v41 = vpop.permute.xlu1 %2940 }
 0x4a7   : > { %v3323_v24 = vsel %vm1601_vm9, %v3291_v59, %v2941_v41  ;;  %v3292_v52 = vsel %vm1568_vm8, %v3260_v63, %v2841_v54 }
 0x4a8   : > { %2766 = vrot.lane.b32.xlu0 %v8721_v5, %s4224_s29  ;;  %2862 = vrot.lane.b32.xlu1 %v7394_v21, %s4225_s30  ;;  %v3165_v5 = vsel %vm1436_vm4, %v3133_v4, %v7017_v28  ;;  %v8727_v28 = vld [vmem:[#allocation54_spill] sm:$0xff] }
 0x4a9   : > { %v3197_v54 = vsel %vm1469_vm5, %v3165_v5, %v7154_v37  ;;  %v3166_v37 = vsel %vm1436_vm4, %v3134_v7, %v7019_v53  ;;  %v8728_v53 = vld [vmem:[#allocation135_spill] sm:$0xff] }
 0x4aa   : > { %v2644_v56 = vpop.permute.xlu0 %2643  ;;  %v2943_v51 = vpop.permute.xlu1 %2942 }
 0x4ab   : > { %v3324_v11 = vsel %vm1601_vm9, %v3292_v52, %v2943_v51  ;;  %v3229_v0 = vsel %vm1502_vm6, %v3197_v54, %v2644_v56  ;;  %v7454_v51 = vld [vmem:[#allocation2 + $0x128] sm:$0xff]  ;;  %v3198_v56 = vsel %vm1469_vm5, %v3166_v37, %v7156_v30 }
 0x4ac   : > { %2864 = vrot.lane.b32.xlu0 %v7406_v60, %s4225_s30  ;;  %2964 = vrot.lane.b32.xlu1 %v8723_v32, %s4226_s6 }
 0x4ae   : > { %v3042_v43 = vpop.permute.xlu0 %3041  ;;  %v2646_v16 = vpop.permute.xlu1 %2645 }
 0x4af   : > { %v3355_v2 = vsel %vm1634_vm10, %v3323_v24, %v3042_v43  ;;  %v3230_v46 = vsel %vm1502_vm6, %v3198_v56, %v2646_v16 }
 0x4b0   : > { %2667 = vrot.lane.b32.xlu0 %v8723_v32, %s4223_s28  ;;  %2966 = vrot.lane.b32.xlu1 %v8724_v17, %s4226_s6 }
 0x4b1   : > { %4091 = vmatprep.mubr.msk.f32.mxu1 %vm1683_vm11, %v3355_v2 }
 0x4b2   : > { %v2745_v61 = vpop.permute.xlu0 %2744  ;;  %v3044_v42 = vpop.permute.xlu1 %3043 }
 0x4b3   : > { %v3356_v40 = vsel %vm1634_vm10, %v3324_v11, %v3044_v42  ;;  %v3261_v35 = vsel %vm1535_vm7, %v3229_v0, %v2745_v61  ;;  %v7490_v11 = vld [vmem:[#allocation2 + $0x138] sm:$0xff] }
 0x4b4   : > { %3065 = vrot.lane.b32.xlu0 %v8725_v49, %s4227_s10  ;;  %2669 = vrot.lane.b32.xlu1 %v8724_v17, %s4223_s28  ;;  %v4194_v17 = vld [vmem:[#allocation2 + $0x78] sm:$0xff] }
 0x4b5   : > { %4092 = vmatmul.mubr.msk.f32.gmra.mxu1 %vm1683_vm11, %v3356_v40  ;;  %v3135_v52 = vsel %vm225_vm0, %v4194_v17, %v6859_v25 }
 0x4b6   : > { %v2747_v45 = vpop.permute.xlu0 %2746  ;;  %v2843_v44 = vpop.permute.xlu1 %2842 }
 0x4b7   : > { %v3293_v47 = vsel %vm1568_vm8, %v3261_v35, %v2843_v44  ;;  %v3262_v32 = vsel %vm1535_vm7, %v3230_v46, %v2747_v45  ;;  %v4196_v45 = vld [vmem:[#allocation2 + $0x80] sm:$0xff]  ;;  %v7538_v46 = vld [vmem:[#allocation2 + $0x150] sm:$0xff] }
 0x4b8   : > { %2768 = vrot.lane.b32.xlu0 %v8725_v49, %s4224_s29  ;;  %3067 = vrot.lane.b32.xlu1 %v8726_v26, %s4227_s10  ;;  %v3136_v25 = vsel %vm225_vm0, %v4196_v45, %v6861_v33  ;;  %v8732_v35 = vld [vmem:[#allocation61_spill] sm:$0xff] }
 0x4ba   : > { %v2845_v8 = vpop.permute.xlu0 %2844  ;;  %v2945_v14 = vpop.permute.xlu1 %2944 }
 0x4bb   : > { %v3325_v13 = vsel %vm1601_vm9, %v3293_v47, %v2945_v14  ;;  %v3294_v50 = vsel %vm1568_vm8, %v3262_v32, %v2845_v8  ;;  %v8733_v47 = vld [vmem:[#allocation30_spill] sm:$0xff] }
 0x4bc   : > { %2770 = vrot.lane.b32.xlu0 %v8726_v26, %s4224_s29  ;;  %2866 = vrot.lane.b32.xlu1 %v7442_v6, %s4225_s30  ;;  %v7502_v26 = vld [vmem:[#allocation2 + $0x140] sm:$0xff] }
 0x4be   : > { %v2648_v41 = vpop.permute.xlu0 %2647  ;;  %v2947_v27 = vpop.permute.xlu1 %2946 }
 0x4bf   : > { %v3326_v30 = vsel %vm1601_vm9, %v3294_v50, %v2947_v27 }
 0x4c0   : > { %2868 = vrot.lane.b32.xlu0 %v7454_v51, %s4225_s30  ;;  %2968 = vrot.lane.b32.xlu1 %v8727_v28, %s4226_s6 }
 0x4c2   : > { %v3046_v31 = vpop.permute.xlu0 %3045  ;;  %v2650_v48 = vpop.permute.xlu1 %2649 }
 0x4c3   : > { %v3357_v22 = vsel %vm1634_vm10, %v3325_v13, %v3046_v31  ;;  %v4198_v31 = vld [vmem:[#allocation2 + $0x90] sm:$0xff] }
 0x4c4   : > { %2671 = vrot.lane.b32.xlu0 %v8727_v28, %s4223_s28  ;;  %2970 = vrot.lane.b32.xlu1 %v8728_v53, %s4226_s6 }
 0x4c5   : > { %4094 = vmatprep.mubr.msk.f32.mxu1 %vm1683_vm11, %v3357_v22 }
 0x4c6   : > { %v2749_v59 = vpop.permute.xlu0 %2748  ;;  %v3048_v3 = vpop.permute.xlu1 %3047 }
 0x4c7   : > { %v3358_v24 = vsel %vm1634_vm10, %v3326_v30, %v3048_v3 }
 0x4c8   : > { %3069 = vrot.lane.b32.xlu0 %v6820_v62, %s4227_s10  ;;  %2673 = vrot.lane.b32.xlu1 %v8728_v53, %s4223_s28 }
 0x4c9   : > { %4095 = vmatmul.mubr.msk.f32.gmra.mxu1 %vm1683_vm11, %v3358_v24  ;;  %v7550_v24 = vld [vmem:[#allocation2 + $0x158] sm:$0xff] }
 0x4ca   : > { %v2751_v43 = vpop.permute.xlu0 %2750  ;;  %v2847_v16 = vpop.permute.xlu1 %2846 }
 0x4cc   : > { %2772 = vrot.lane.b32.xlu0 %v6820_v62, %s4224_s29  ;;  %3071 = vrot.lane.b32.xlu1 %v8729_v55, %s4227_s10  ;;  %v3167_v62 = vsel %vm1436_vm4, %v3135_v52, %v7028_v18  ;;  %v8730_v18 = vld [vmem:[#allocation85_spill] sm:$0xff] }
 0x4cd   : > { %v3199_v61 = vsel %vm1469_vm5, %v3167_v62, %v7162_v15  ;;  %v3168_v15 = vsel %vm1436_vm4, %v3136_v25, %v7030_v38  ;;  %v8731_v38 = vld [vmem:[#allocation82_spill] sm:$0xff] }
 0x4ce   : > { %v2849_v2 = vpop.permute.xlu0 %2848  ;;  %v2949_v63 = vpop.permute.xlu1 %2948  ;;  %v3231_v49 = vsel %vm1502_vm6, %v3199_v61, %v2648_v41  ;;  %v3200_v14 = vsel %vm1469_vm5, %v3168_v15, %v7164_v20  ;;  %v8736_v25 = vld [vmem:[#allocation62_spill] sm:$0xff] }
 0x4cf   : > { %v3263_v44 = vsel %vm1535_vm7, %v3231_v49, %v2749_v59  ;;  %v3232_v5 = vsel %vm1502_vm6, %v3200_v14, %v2650_v48  ;;  %v3137_v48 = vsel %vm225_vm0, %v4198_v31, %v6873_v1  ;;  %v4200_v59 = vld [vmem:[#allocation2 + $0x98] sm:$0xff]  ;;  %v4202_v15 = vld [vmem:[#allocation2 + $0xa8] sm:$0xff] }
 0x4d0   : > { %2774 = vrot.lane.b32.xlu0 %v8729_v55, %s4224_s29  ;;  %2870 = vrot.lane.b32.xlu1 %v7490_v11, %s4225_s30  ;;  %v3295_v8 = vsel %vm1568_vm8, %v3263_v44, %v2847_v16  ;;  %v3264_v41 = vsel %vm1535_vm7, %v3232_v5, %v2751_v43  ;;  %v3169_v22 = vsel %vm1436_vm4, %v3137_v48, %v7042_v29  ;;  %v8734_v29 = vld [vmem:[#allocation115_spill] sm:$0xff]  ;;  %v7586_v14 = vld [vmem:[#allocation2 + $0x168] sm:$0xff] }
 0x4d1   : > { %v3327_v33 = vsel %vm1601_vm9, %v3295_v8, %v2949_v63  ;;  %v3296_v27 = vsel %vm1568_vm8, %v3264_v41, %v2849_v2  ;;  %v3201_v32 = vsel %vm1469_vm5, %v3169_v22, %v7170_v34  ;;  %v3138_v1 = vsel %vm225_vm0, %v4200_v59, %v6875_v39  ;;  %v4204_v41 = vld [vmem:[#allocation2 + $0xb0] sm:$0xff]  ;;  %v8742_v22 = vld [vmem:[#allocation134_spill] sm:$0xff] }
 0x4d2   : > { %v2652_v42 = vpop.permute.xlu0 %2651  ;;  %v2951_v40 = vpop.permute.xlu1 %2950  ;;  %v3170_v34 = vsel %vm1436_vm4, %v3138_v1, %v7044_v19  ;;  %v8735_v19 = vld [vmem:[#allocation111_spill] sm:$0xff]  ;;  %v3139_v8 = vsel %vm225_vm0, %v4202_v15, %v6885_v23  ;;  %v8738_v23 = vld [vmem:[#allocation120_spill] sm:$0xff] }
 0x4d3   : > { %v3328_v20 = vsel %vm1601_vm9, %v3296_v27, %v2951_v40  ;;  %v3233_v30 = vsel %vm1502_vm6, %v3201_v32, %v2652_v42  ;;  %v3202_v16 = vsel %vm1469_vm5, %v3170_v34, %v7172_v58  ;;  %v8743_v1 = vld [vmem:[#allocation91_spill] sm:$0xff]  ;;  %v8744_v34 = vld [vmem:[#allocation89_spill] sm:$0xff] }
 0x4d4   : > { %2872 = vrot.lane.b32.xlu0 %v7502_v26, %s4225_s30  ;;  %2972 = vrot.lane.b32.xlu1 %v8730_v18, %s4226_s6 }
 0x4d6   : > { %v3050_v9 = vpop.permute.xlu0 %3049  ;;  %v2654_v4 = vpop.permute.xlu1 %2653 }
 0x4d7   : > { %v3359_v54 = vsel %vm1634_vm10, %v3327_v33, %v3050_v9  ;;  %v3234_v63 = vsel %vm1502_vm6, %v3202_v16, %v2654_v4  ;;  %v8737_v33 = vld [vmem:[#allocation97_spill] sm:$0xff] }
 0x4d8   : > { %2675 = vrot.lane.b32.xlu0 %v8730_v18, %s4223_s28  ;;  %2974 = vrot.lane.b32.xlu1 %v8731_v38, %s4226_s6 }
 0x4d9   : > { %4097 = vmatprep.mubr.msk.f32.mxu1 %vm1683_vm11, %v3359_v54 }
 0x4da   : > { %v2753_v0 = vpop.permute.xlu0 %2752  ;;  %v3052_v10 = vpop.permute.xlu1 %3051 }
 0x4db   : > { %v3360_v7 = vsel %vm1634_vm10, %v3328_v20, %v3052_v10  ;;  %v3265_v3 = vsel %vm1535_vm7, %v3233_v30, %v2753_v0  ;;  %v7598_v20 = vld [vmem:[#allocation2 + $0x170] sm:$0xff]  ;;  %v8740_v0 = vld [vmem:[#allocation92_spill] sm:$0xff] }
 0x4dc   : > { %3073 = vrot.lane.b32.xlu0 %v8732_v35, %s4227_s10  ;;  %2677 = vrot.lane.b32.xlu1 %v8731_v38, %s4223_s28  ;;  %v3140_v38 = vsel %vm225_vm0, %v4204_v41, %v8738_v23 }
 0x4dd   : > { %4098 = vmatmul.mubr.msk.f32.gmra.mxu1 %vm1683_vm11, %v3360_v7  ;;  %v3172_v10 = vsel %vm1436_vm4, %v3140_v38, %v8740_v0  ;;  %v2119_v38 = vld [vmem:[#allocation2 + $0x190] sm:$0x3] }
 0x4de   : > { %v2755_v28 = vpop.permute.xlu0 %2754  ;;  %v2851_v37 = vpop.permute.xlu1 %2850 }
 0x4df   : > { %v3297_v43 = vsel %vm1568_vm8, %v3265_v3, %v2851_v37  ;;  %v3266_v52 = vsel %vm1535_vm7, %v3234_v63, %v2755_v28 }
 0x4e0   : > { %2776 = vrot.lane.b32.xlu0 %v8732_v35, %s4224_s29  ;;  %3075 = vrot.lane.b32.xlu1 %v8733_v47, %s4227_s10  ;;  %v8741_v35 = vld [vmem:[#allocation123_spill] sm:$0xff] }
 0x4e1   : > { %v3204_v28 = vsel %vm1469_vm5, %v3172_v10, %v8741_v35 }
 0x4e2   : > { %v2853_v56 = vpop.permute.xlu0 %2852  ;;  %v2953_v13 = vpop.permute.xlu1 %2952 }
 0x4e3   : > { %v3329_v39 = vsel %vm1601_vm9, %v3297_v43, %v2953_v13  ;;  %v3298_v62 = vsel %vm1568_vm8, %v3266_v52, %v2853_v56  ;;  %v2118_v43 = vld [vmem:[#allocation2 + $0x188] sm:$0xff]  ;;  %v8746_v52 = vld [vmem:[#allocation31_spill] sm:$0xff] }
 0x4e4   : > { %2778 = vrot.lane.b32.xlu0 %v8733_v47, %s4224_s29  ;;  %2874 = vrot.lane.b32.xlu1 %v7538_v46, %s4225_s30  ;;  %v2623_v63 = vrot.slane %v2118_v43, 1  ;;  %v2724_v0 = vrot.slane %v2118_v43, 2 }
 0x4e6   : > { %v2656_v53 = vpop.permute.xlu0 %2655  ;;  %v2955_v50 = vpop.permute.xlu1 %2954 }
 0x4e7   : > { %v3330_v58 = vsel %vm1601_vm9, %v3298_v62, %v2955_v50  ;;  %v8747_v62 = vld [vmem:[#allocation8_spill] sm:$0xff] }
 0x4e8   : > { %2876 = vrot.lane.b32.xlu0 %v7550_v24, %s4225_s30  ;;  %2976 = vrot.lane.b32.xlu1 %v8734_v29, %s4226_s6 }
 0x4ea   : > { %v3054_v55 = vpop.permute.xlu0 %3053  ;;  %v2658_v2 = vpop.permute.xlu1 %2657 }
 0x4eb   : > { %v3361_v17 = vsel %vm1634_vm10, %v3329_v39, %v3054_v55  ;;  %v3236_v13 = vsel %vm1502_vm6, %v3204_v28, %v2658_v2  ;;  %v8745_v55 = vld [vmem:[#allocation66_spill] sm:$0xff]  ;;  %v2625_v28 = vrot.slane %v2119_v38, 1 }
 0x4ec   : > { %2679 = vrot.lane.b32.xlu0 %v8734_v29, %s4223_s28  ;;  %2978 = vrot.lane.b32.xlu1 %v8735_v19, %s4226_s6  ;;  %v2622_v2 = vrot.slane %v8745_v55, 1 }
 0x4ed   : > { %4100 = vmatprep.mubr.msk.f32.mxu1 %vm1683_vm11, %v3361_v17  ;;  %v4206_v17 = vld [vmem:[#allocation2 + $0xc0] sm:$0xff] }
 0x4ee   : > { %v2757_v61 = vpop.permute.xlu0 %2756  ;;  %v3056_v42 = vpop.permute.xlu1 %3055 }
 0x4ef   : > { %v3362_v40 = vsel %vm1634_vm10, %v3330_v58, %v3056_v42 }
 0x4f0   : > { %3077 = vrot.lane.b32.xlu0 %v6850_v36, %s4227_s10  ;;  %2681 = vrot.lane.b32.xlu1 %v8735_v19, %s4223_s28  ;;  %v3141_v19 = vsel %vm225_vm0, %v4206_v17, %v8746_v52  ;;  %v8754_v52 = vld [vmem:[#allocation35_spill] sm:$0xff] }
 0x4f1   : > { %4101 = vmatmul.mubr.msk.f32.gmra.mxu1 %vm1683_vm11, %v3362_v40  ;;  %v3173_v58 = vsel %vm1436_vm4, %v3141_v19, %v8747_v62 }
 0x4f2   : > { %v2759_v49 = vpop.permute.xlu0 %2758  ;;  %v2855_v45 = vpop.permute.xlu1 %2854 }
 0x4f3   : > { %v3268_v48 = vsel %vm1535_vm7, %v3236_v13, %v2759_v49 }
 0x4f4   : > { %2780 = vrot.lane.b32.xlu0 %v6850_v36, %s4224_s29  ;;  %3079 = vrot.lane.b32.xlu1 %v8736_v25, %s4227_s10  ;;  %v3171_v36 = vsel %vm1436_vm4, %v3139_v8, %v7050_v12  ;;  %v8739_v12 = vld [vmem:[#allocation55_spill] sm:$0xff] }
 0x4f5   : > { %v3203_v9 = vsel %vm1469_vm5, %v3171_v36, %v8737_v33  ;;  %v8750_v36 = vld [vmem:[#allocation39_spill] sm:$0xff] }
 0x4f6   : > { %v2857_v44 = vpop.permute.xlu0 %2856  ;;  %v2957_v18 = vpop.permute.xlu1 %2956  ;;  %v3235_v54 = vsel %vm1502_vm6, %v3203_v9, %v2656_v53 }
 0x4f7   : > { %v3267_v27 = vsel %vm1535_vm7, %v3235_v54, %v2757_v61  ;;  %v3300_v32 = vsel %vm1568_vm8, %v3268_v48, %v2857_v44  ;;  %v8748_v61 = vld [vmem:[#allocation157_spill] sm:$0xff]  ;;  %v4207_v44 = vld [vmem:[#allocation2 + $0xc8] sm:$0xff] }
 0x4f8   : > { %2782 = vrot.lane.b32.xlu0 %v8736_v25, %s4224_s29  ;;  %2878 = vrot.lane.b32.xlu1 %v7586_v14, %s4225_s30  ;;  %v3299_v7 = vsel %vm1568_vm8, %v3267_v27, %v2855_v45  ;;  %v3205_v42 = vsel %vm1469_vm5, %v3173_v58, %v8748_v61  ;;  %v2624_v25 = vsel %vm448_vm2, %v2622_v2, %v2623_v63  ;;  %v2723_v27 = vrot.slane %v8745_v55, 2  ;;  %v4209_v61 = vld [vmem:[#allocation2 + $0xe0] sm:$0xff] }
 0x4f9   : > { %v3331_v37 = vsel %vm1601_vm9, %v3299_v7, %v2957_v18  ;;  %v8749_v18 = vld [vmem:[#allocation63_spill] sm:$0xff] }
 0x4fa   : > { %v2660_v4 = vpop.permute.xlu0 %2659  ;;  %v2959_v5 = vpop.permute.xlu1 %2958  ;;  %v3142_v15 = vsel %vm225_vm0, %v4207_v44, %v8749_v18  ;;  %v2725_v48 = vsel %vm625_vm3, %v2723_v27, %v2724_v0 }
 0x4fb   : > { %v3332_v53 = vsel %vm1601_vm9, %v3300_v32, %v2959_v5  ;;  %v3237_v45 = vsel %vm1502_vm6, %v3205_v42, %v2660_v4  ;;  %v3174_v33 = vsel %vm1436_vm4, %v3142_v15, %v8750_v36  ;;  %v8751_v5 = vld [vmem:[#allocation164_spill] sm:$0xff]  ;;  %v8755_v42 = vld [vmem:[#allocation90_spill] sm:$0xff] }
 0x4fc   : > { %2880 = vrot.lane.b32.xlu0 %v7598_v20, %s4225_s30  ;;  %2980 = vrot.lane.b32.xlu1 %v8739_v12, %s4226_s6  ;;  %v3206_v4 = vsel %vm1469_vm5, %v3174_v33, %v8751_v5 }
 0x4fe   : > { %v3058_v47 = vpop.permute.xlu0 %3057  ;;  %v2662_v56 = vpop.permute.xlu1 %2661 }
 0x4ff   : > { %v3363_v31 = vsel %vm1634_vm10, %v3331_v37, %v3058_v47 }
 0x500   : > { %2683 = vrot.lane.b32.xlu0 %v8739_v12, %s4223_s28  ;;  %2982 = vrot.lane.b32.xlu1 %v8742_v22, %s4226_s6  ;;  %v3238_v12 = vsel %vm1502_vm6, %v3206_v4, %v2662_v56  ;;  %v8757_v4 = vld [vmem:[#allocation140_spill] sm:$0xff] }
 0x501   : > { %4103 = vmatprep.mubr.msk.f32.mxu1 %vm1683_vm11, %v3363_v31  ;;  %v2626_v31 = vsel %vm448_vm2, %v2623_v63, %v2625_v28 }
 0x502   : > { %v2761_v50 = vpop.permute.xlu0 %2760  ;;  %v3060_v30 = vpop.permute.xlu1 %3059 }
 0x503   : > { %v3364_v59 = vsel %vm1634_vm10, %v3332_v53, %v3060_v30  ;;  %v3269_v8 = vsel %vm1535_vm7, %v3237_v45, %v2761_v50  ;;  %v2726_v53 = vrot.slane %v2119_v38, 2 }
 0x504   : > { %3081 = vrot.lane.b32.xlu0 %v8743_v1, %s4227_s10  ;;  %2685 = vrot.lane.b32.xlu1 %v8742_v22, %s4223_s28 }
 0x505   : > { %4104 = vmatmul.mubr.msk.f32.gmra.mxu1 %vm1683_vm11, %v3364_v59  ;;  %v2120_v59 = vld [vmem:[#allocation2 + $0x198] sm:$0xff] }
 0x506   : > { %v2763_v3 = vpop.permute.xlu0 %2762  ;;  %v2859_v29 = vpop.permute.xlu1 %2858  ;;  %v2923_v2 = vrot.slane %v2120_v59, 1  ;;  %v3024_v15 = vrot.slane %v2120_v59, 2 }
 0x507   : > { %v3301_v9 = vsel %vm1568_vm8, %v3269_v8, %v2859_v29  ;;  %v3270_v7 = vsel %vm1535_vm7, %v3238_v12, %v2763_v3  ;;  %v2122_v3 = vld [vmem:[#allocation2 + $0x1a8] sm:$0x3]  ;;  %v2727_v29 = vsel %vm625_vm3, %v2724_v0, %v2726_v53 }
 0x508   : > { %2784 = vrot.lane.b32.xlu0 %v8743_v1, %s4224_s29  ;;  %3083 = vrot.lane.b32.xlu1 %v8744_v34, %s4227_s10  ;;  %v2121_v1 = vld [vmem:[#allocation2 + $0x1a0] sm:$0xff]  ;;  %v2926_v17 = vrot.slane %v2122_v3, 1  ;;  %v3027_v5 = vrot.slane %v2122_v3, 2 }
 0x509   : > { %v2924_v63 = vrot.slane %v2121_v1, 1  ;;  %v3025_v8 = vrot.slane %v2121_v1, 2 }
 0x50a   : > { %v2861_v16 = vpop.permute.xlu0 %2860  ;;  %v2961_v39 = vpop.permute.xlu1 %2960 }
 0x50b   : > { %v3333_v54 = vsel %vm1601_vm9, %v3301_v9, %v2961_v39  ;;  %v3302_v35 = vsel %vm1568_vm8, %v3270_v7, %v2861_v16  ;;  %v8753_v39 = vld [vmem:[#allocation95_spill] sm:$0xff]  ;;  %v2925_v33 = vsel %vm448_vm2, %v2923_v2, %v2924_v63  ;;  %v2927_v9 = vsel %vm448_vm2, %v2924_v63, %v2926_v17  ;;  %v8762_v2 = vld [vmem:[#allocation162_spill] sm:$0xff] }
 0x50c   : > { %2786 = vrot.lane.b32.xlu0 %v8744_v34, %s4224_s29  ;;  %2882 = vrot.lane.b32.xlu1 %v8745_v55, %s4225_s30  ;;  %v4208_v34 = vld [vmem:[#allocation2 + $0xd8] sm:$0xff]  ;;  %v3026_v7 = vsel %vm625_vm3, %v3024_v15, %v3025_v8 }
 0x50e   : > { %v2664_v40 = vpop.permute.xlu0 %2663  ;;  %v2963_v49 = vpop.permute.xlu1 %2962 }
 0x50f   : > { %v3334_v37 = vsel %vm1601_vm9, %v3302_v35, %v2963_v49  ;;  %v3144_v49 = vsel %vm225_vm0, %v4209_v61, %v8755_v42  ;;  %v3028_v35 = vsel %vm625_vm3, %v3025_v8, %v3027_v5 }
 0x510   : > { %2884 = vrot.lane.b32.xlu0 %v2118_v43, %s4225_s30  ;;  %2984 = vrot.lane.b32.xlu1 %v2624_v25, %s4226_s6 }
 0x512   : > { %v3062_v41 = vpop.permute.xlu0 %3061  ;;  %v2666_v23 = vpop.permute.xlu1 %2665 }
 0x513   : > { %v3365_v10 = vsel %vm1634_vm10, %v3333_v54, %v3062_v41 }
 0x514   : > { %2587 = vrot.lane.b32.xlu0 %v2118_v43, %s4222_s27  ;;  %2687 = vrot.lane.b32.xlu1 %v2624_v25, %s4223_s28  ;;  %v8752_v43 = vld [vmem:[#allocation64_spill] sm:$0xff]  ;;  %v8756_v25 = vld [vmem:[#allocation122_spill] sm:$0xff] }
 0x515   : > { %4106 = vmatprep.mubr.msk.f32.mxu1 %vm1683_vm11, %v3365_v10  ;;  %v3143_v16 = vsel %vm225_vm0, %v4208_v34, %v8752_v43  ;;  %v3176_v44 = vsel %vm1436_vm4, %v3144_v49, %v8756_v25  ;;  %v7718_v43 = vld [vmem:[%s7977_s4] ss:$0 sm:$0xff] }
 0x516   : > { %v2765_v47 = vpop.permute.xlu0 %2764  ;;  %v3064_v13 = vpop.permute.xlu1 %3063  ;;  %v3175_v55 = vsel %vm1436_vm4, %v3143_v16, %v8753_v39  ;;  %v8761_v16 = vld [vmem:[#allocation34_spill] sm:$0xff] }
 0x517   : > { %v3366_v56 = vsel %vm1634_vm10, %v3334_v37, %v3064_v13  ;;  %v3207_v19 = vsel %vm1469_vm5, %v3175_v55, %v8754_v52  ;;  %v3146_v39 = vsel %vm225_vm0, %v7358_v57, %v8761_v16 }
 0x518   : > { %2986 = vrot.lane.b32.xlu0 %v2626_v31, %s4226_s6  ;;  %3085 = vrot.lane.b32.xlu1 %v2725_v48, %s4227_s10  ;;  %v3239_v45 = vsel %vm1502_vm6, %v3207_v19, %v2664_v40  ;;  %v3208_v40 = vsel %vm1469_vm5, %v3176_v44, %v8757_v4  ;;  %v3178_v63 = vsel %vm1436_vm4, %v3146_v39, %v8762_v2  ;;  %v8763_v19 = vld [vmem:[#allocation69_spill] sm:$0xff] }
 0x519   : > { %4107 = vmatmul.mubr.msk.f32.gmra.mxu1 %vm1683_vm11, %v3366_v56  ;;  %v3271_v18 = vsel %vm1535_vm7, %v3239_v45, %v2765_v47  ;;  %v3240_v27 = vsel %vm1502_vm6, %v3208_v40, %v2666_v23 }
 0x51a   : > { %v2767_v22 = vpop.permute.xlu0 %2766  ;;  %v2863_v32 = vpop.permute.xlu1 %2862 }
 0x51b   : > { %v3303_v36 = vsel %vm1568_vm8, %v3271_v18, %v2863_v32  ;;  %v3272_v0 = vsel %vm1535_vm7, %v3240_v27, %v2767_v22  ;;  %v4210_v22 = vld [vmem:[#allocation2 + $0xf0] sm:$0xff]  ;;  %v8758_v32 = vld [vmem:[#allocation6_spill] sm:$0xff]  ;;  %v8764_v27 = vld [vmem:[#allocation93_spill] sm:$0xff] }
 0x51c   : > { %2689 = vrot.lane.b32.xlu0 %v2626_v31, %s4223_s28  ;;  %2788 = vrot.lane.b32.xlu1 %v2725_v48, %s4224_s29  ;;  %v3145_v53 = vsel %vm225_vm0, %v4210_v22, %v8758_v32  ;;  %v8769_v32 = vld [vmem:[#allocation9_spill] sm:$0xff] }
 0x51e   : > { %v2865_v50 = vpop.permute.xlu0 %2864  ;;  %v2965_v30 = vpop.permute.xlu1 %2964 }
 0x51f   : > { %v3335_v54 = vsel %vm1601_vm9, %v3303_v36, %v2965_v30  ;;  %v3304_v10 = vsel %vm1568_vm8, %v3272_v0, %v2865_v50  ;;  %v8759_v50 = vld [vmem:[#allocation40_spill] sm:$0xff]  ;;  %v8765_v0 = vld [vmem:[#allocation33_spill] sm:$0xff] }
 0x520   : > { %3087 = vrot.lane.b32.xlu0 %v2727_v29, %s4227_s10  ;;  %2790 = vrot.lane.b32.xlu1 %v2727_v29, %s4224_s29  ;;  %v3177_v30 = vsel %vm1436_vm4, %v3145_v53, %v8759_v50 }
 0x522   : > { %v2668_v62 = vpop.permute.xlu0 %2667  ;;  %v2967_v58 = vpop.permute.xlu1 %2966 }
 0x523   : > { %v3336_v28 = vsel %vm1601_vm9, %v3304_v10, %v2967_v58 }
 0x524   : > { %2886 = vrot.lane.b32.xlu0 %v2120_v59, %s4225_s30  ;;  %2888 = vrot.lane.b32.xlu1 %v2121_v1, %s4225_s30  ;;  %v8760_v59 = vld [vmem:[#allocation167_spill] sm:$0xff] }
 0x525   : > { %v3209_v1 = vsel %vm1469_vm5, %v3177_v30, %v8760_v59 }
 0x526   : > { %v3066_v41 = vpop.permute.xlu0 %3065  ;;  %v2670_v38 = vpop.permute.xlu1 %2669  ;;  %v3241_v34 = vsel %vm1502_vm6, %v3209_v1, %v2668_v62  ;;  %v3210_v62 = vsel %vm1469_vm5, %v3178_v63, %v8763_v19 }
 0x527   : > { %v3367_v12 = vsel %vm1634_vm10, %v3335_v54, %v3066_v41  ;;  %v3242_v45 = vsel %vm1502_vm6, %v3210_v62, %v2670_v38 }
 0x528   : > { %2988 = vrot.lane.b32.xlu0 %v2925_v33, %s4226_s6  ;;  %2990 = vrot.lane.b32.xlu1 %v2927_v9, %s4226_s6  ;;  %s7737_s6 = scalar_lea.vmem %s7978_s5, %s3914_s21 }
 0x529   : > { %4109 = vmatprep.mubr.msk.f32.mxu1 %vm1683_vm11, %v3367_v12  ;;  %v3147_v12 = vsel %vm225_vm0, %v7394_v21, %v8764_v27 }
 0x52a   : > { %v2769_v37 = vpop.permute.xlu0 %2768  ;;  %v3068_v23 = vpop.permute.xlu1 %3067  ;;  %v3179_v10 = vsel %vm1436_vm4, %v3147_v12, %v8765_v0 }
 0x52b   : > { %v3368_v47 = vsel %vm1634_vm10, %v3336_v28, %v3068_v23  ;;  %v3273_v55 = vsel %vm1535_vm7, %v3241_v34, %v2769_v37 }
 0x52c   : > { %3089 = vrot.lane.b32.xlu0 %v3026_v7, %s4227_s10  ;;  %3091 = vrot.lane.b32.xlu1 %v3028_v35, %s4227_s10  ;;  %v8766_v7 = vld [vmem:[#allocation143_spill] sm:$0xff] }
 0x52d   : > { %4110 = vmatmul.mubr.msk.f32.gmra.mxu1 %vm1683_vm11, %v3368_v47  ;;  %v3211_v35 = vsel %vm1469_vm5, %v3179_v10, %v8766_v7  ;;  %v8767_v47 = vld [vmem:[#allocation121_spill] sm:$0xff] }
 0x52e   : > { %v2771_v13 = vpop.permute.xlu0 %2770  ;;  %v2867_v56 = vpop.permute.xlu1 %2866 }
 0x52f   : > { %v3305_v17 = vsel %vm1568_vm8, %v3273_v55, %v2867_v56  ;;  %v3274_v44 = vsel %vm1535_vm7, %v3242_v45, %v2771_v13  ;;  %v3148_v13 = vsel %vm225_vm0, %v7406_v60, %v8767_v47 }
 0x532   : > { %v2869_v31 = vpop.permute.xlu0 %2868  ;;  %v2969_v48 = vpop.permute.xlu1 %2968 }
 0x533   : > { %v3337_v58 = vsel %vm1601_vm9, %v3305_v17, %v2969_v48  ;;  %v3306_v8 = vsel %vm1568_vm8, %v3274_v44, %v2869_v31  ;;  %v8768_v31 = vld [vmem:[#allocation138_spill] sm:$0xff]  ;;  %v8772_v44 = vld [vmem:[#allocation96_spill] sm:$0xff] }
 0x534   : > { %v3180_v48 = vsel %vm1436_vm4, %v3148_v13, %v8768_v31 }
 0x535   : > { %v3212_v53 = vsel %vm1469_vm5, %v3180_v48, %v8769_v32 }
 0x536   : > { %v2672_v3 = vpop.permute.xlu0 %2671  ;;  %v2971_v29 = vpop.permute.xlu1 %2970 }
 0x537   : > { %v3338_v36 = vsel %vm1601_vm9, %v3306_v8, %v2971_v29  ;;  %v3243_v23 = vsel %vm1502_vm6, %v3211_v35, %v2672_v3 }
 0x539   : > { %v4084_v52 = vpop.f32.mrf.mxu1 }
 0x53a   : > { %v3565_v61 = vadd.f32 %v4084_v52, %v7718_v43  ;;  %v3070_v42 = vpop.permute.xlu0 %3069  ;;  %v2674_v49 = vpop.permute.xlu1 %2673 }
 0x53b   : > { %v3369_v57 = vsel %vm1634_vm10, %v3337_v58, %v3070_v42  ;;  %v3559_v25 = vpop.f32.mrf.mxu1  ;;  %v3244_v60 = vsel %vm1502_vm6, %v3212_v53, %v2674_v49  ;;  %v8770_v49 = vld [vmem:[#allocation36_spill] sm:$0xff] }
 0x53c   : > { %v3719_v18 = vmax.f32 %v3565_v61, 0.0  ;;  %v3560_v15 = vadd.f32 %v7718_v43, %v3559_v25  ;;  %4112 = vmatprep.mubr.msk.f32.mxu1 %vm1683_vm11, %v3369_v57  ;;  %v3149_v45 = vsel %vm225_vm0, %v7442_v6, %v8770_v49  ;;  %v8771_v57 = vld [vmem:[#allocation165_spill] sm:$0xff] }
 0x53d   : > { %v3181_v25 = vsel %vm1436_vm4, %v3149_v45, %v8771_v57 }
 0x53e   : > { %3751 = vst.msk [vmem:[%s7737_s6 + $0x8] sm:$0xff] %vm225_vm0, %v3719_v18  ;;  %v3718_v33 = vmax.f32 %v3560_v15, 0.0  ;;  %v2773_v9 = vpop.permute.xlu0 %2772  ;;  %v3072_v5 = vpop.permute.xlu1 %3071  ;;  %v3213_v18 = vsel %vm1469_vm5, %v3181_v25, %v8772_v44 }
 0x53f   : > { %v3370_v4 = vsel %vm1634_vm10, %v3338_v36, %v3072_v5  ;;  %v3275_v56 = vsel %vm1535_vm7, %v3243_v23, %v2773_v9 }
 0x540   : > { %3750 = vst.msk [vmem:[%s7737_s6] sm:$0xff] %vm225_vm0, %v3718_v33  ;;  %4113 = vmatmul.mubr.msk.f32.gmra.mxu1 %vm1683_vm11, %v3370_v4  ;;  %v8773_v33 = vld [vmem:[#allocation114_spill] sm:$0xff]  ;;  %v8774_v4 = vld [vmem:[#allocation67_spill] sm:$0xff] }
 0x541   : > { %v3150_v9 = vsel %vm225_vm0, %v7454_v51, %v8773_v33 }
 0x542   : > { %v2775_v40 = vpop.permute.xlu0 %2774  ;;  %v2871_v54 = vpop.permute.xlu1 %2870 }
 0x543   : > { %v3307_v21 = vsel %vm1568_vm8, %v3275_v56, %v2871_v54  ;;  %v3276_v34 = vsel %vm1535_vm7, %v3244_v60, %v2775_v40  ;;  %v3182_v40 = vsel %vm1436_vm4, %v3150_v9, %v8774_v4 }
 0x546   : > { %v2873_v41 = vpop.permute.xlu0 %2872  ;;  %v2973_v38 = vpop.permute.xlu1 %2972 }
 0x547   : > { %v3339_v50 = vsel %vm1601_vm9, %v3307_v21, %v2973_v38  ;;  %v3308_v55 = vsel %vm1568_vm8, %v3276_v34, %v2873_v41  ;;  %v8775_v41 = vld [vmem:[#allocation98_spill] sm:$0xff] }
 0x548   : > { %v3214_v38 = vsel %vm1469_vm5, %v3182_v40, %v8775_v41 }
 0x54a   : > { %v2676_v28 = vpop.permute.xlu0 %2675  ;;  %v2975_v37 = vpop.permute.xlu1 %2974 }
 0x54b   : > { %v3340_v2 = vsel %vm1601_vm9, %v3308_v55, %v2975_v37  ;;  %v3245_v36 = vsel %vm1502_vm6, %v3213_v18, %v2676_v28  ;;  %v8779_v55 = vld [vmem:[#allocation137_spill] sm:$0xff] }
 0x54d   : > { %v4087_v22 = vpop.f32.mrf.mxu1 }
 0x54e   : > { %v3575_v30 = vadd.f32 %v4087_v22, %v7718_v43  ;;  %v3074_v59 = vpop.permute.xlu0 %3073  ;;  %v2678_v1 = vpop.permute.xlu1 %2677 }
 0x54f   : > { %v3371_v3 = vsel %vm1634_vm10, %v3339_v50, %v3074_v59  ;;  %v3569_v29 = vpop.f32.mrf.mxu1  ;;  %v3246_v51 = vsel %vm1502_vm6, %v3214_v38, %v2678_v1  ;;  %v8777_v1 = vld [vmem:[#allocation141_spill] sm:$0xff]  ;;  %v8782_v38 = vld [vmem:[#allocation163_spill] sm:$0xff] }
 0x550   : > { %v3721_v16 = vmax.f32 %v3575_v30, 0.0  ;;  %v3570_v39 = vadd.f32 %v7718_v43, %v3569_v29  ;;  %4115 = vmatprep.mubr.msk.f32.mxu1 %vm1683_vm11, %v3371_v3  ;;  %v8776_v30 = vld [vmem:[#allocation32_spill] sm:$0xff] }
 0x551   : > { %v3151_v59 = vsel %vm225_vm0, %v7490_v11, %v8776_v30  ;;  %v8778_v3 = vld [vmem:[#allocation12_spill] sm:$0xff]  ;;  %v8786_v30 = vld [vmem:[#allocation94_spill] sm:$0xff] }
 0x552   : > { %3753 = vst.msk [vmem:[%s7737_s6 + $0x18] sm:$0xff] %vm225_vm0, %v3721_v16  ;;  %v3720_v63 = vmax.f32 %v3570_v39, 0.0  ;;  %v2777_v17 = vpop.permute.xlu0 %2776  ;;  %v3076_v52 = vpop.permute.xlu1 %3075  ;;  %v3183_v60 = vsel %vm1436_vm4, %v3151_v59, %v8777_v1  ;;  %v8787_v1 = vld [vmem:[#allocation124_spill] sm:$0xff] }
 0x553   : > { %v3372_v19 = vsel %vm1634_vm10, %v3340_v2, %v3076_v52  ;;  %v3277_v5 = vsel %vm1535_vm7, %v3245_v36, %v2777_v17  ;;  %v3215_v29 = vsel %vm1469_vm5, %v3183_v60, %v8778_v3  ;;  %v3152_v2 = vsel %vm225_vm0, %v7502_v26, %v8779_v55  ;;  %v8780_v17 = vld [vmem:[#allocation7_spill] sm:$0xff] }
 0x554   : > { %3752 = vst.msk [vmem:[%s7737_s6 + $0x10] sm:$0xff] %vm225_vm0, %v3720_v63  ;;  %4116 = vmatmul.mubr.msk.f32.gmra.mxu1 %vm1683_vm11, %v3372_v19  ;;  %v3184_v52 = vsel %vm1436_vm4, %v3152_v2, %v8780_v17 }
 0x556   : > { %v2779_v62 = vpop.permute.xlu0 %2778  ;;  %v2875_v58 = vpop.permute.xlu1 %2874 }
 0x557   : > { %v3309_v6 = vsel %vm1568_vm8, %v3277_v5, %v2875_v58  ;;  %v3278_v28 = vsel %vm1535_vm7, %v3246_v51, %v2779_v62  ;;  %v8781_v62 = vld [vmem:[#allocation156_spill] sm:$0xff] }
 0x558   : > { %v3216_v58 = vsel %vm1469_vm5, %v3184_v52, %v8781_v62 }
 0x55a   : > { %v2877_v61 = vpop.permute.xlu0 %2876  ;;  %v2977_v42 = vpop.permute.xlu1 %2976 }
 0x55b   : > { %v3341_v27 = vsel %vm1601_vm9, %v3309_v6, %v2977_v42  ;;  %v3310_v47 = vsel %vm1568_vm8, %v3278_v28, %v2877_v61 }
 0x55e   : > { %v2680_v15 = vpop.permute.xlu0 %2679  ;;  %v2979_v8 = vpop.permute.xlu1 %2978 }
 0x55f   : > { %v3342_v13 = vsel %vm1601_vm9, %v3310_v47, %v2979_v8  ;;  %v3247_v39 = vsel %vm1502_vm6, %v3215_v29, %v2680_v15 }
 0x561   : > { %v4090_v54 = vpop.f32.mrf.mxu1 }
 0x562   : > { %v3585_v12 = vadd.f32 %v4090_v54, %v7718_v43  ;;  %v3078_v0 = vpop.permute.xlu0 %3077  ;;  %v2682_v10 = vpop.permute.xlu1 %2681 }
 0x563   : > { %v3373_v7 = vsel %vm1634_vm10, %v3341_v27, %v3078_v0  ;;  %v3579_v35 = vpop.f32.mrf.mxu1  ;;  %v3248_v26 = vsel %vm1502_vm6, %v3216_v58, %v2682_v10  ;;  %v3153_v27 = vsel %vm225_vm0, %v7538_v46, %v8782_v38  ;;  %v8784_v10 = vld [vmem:[#allocation99_spill] sm:$0xff]  ;;  %v8789_v58 = vld [vmem:[#allocation5_spill] sm:$0xff] }
 0x564   : > { %v3723_v37 = vmax.f32 %v3585_v12, 0.0  ;;  %v3580_v23 = vadd.f32 %v7718_v43, %v3579_v35  ;;  %4118 = vmatprep.mubr.msk.f32.mxu1 %vm1683_vm11, %v3373_v7  ;;  %v8783_v12 = vld [vmem:[#allocation68_spill] sm:$0xff] }
 0x565   : > { %v3185_v0 = vsel %vm1436_vm4, %v3153_v27, %v8783_v12 }
 0x566   : > { %3755 = vst.msk [vmem:[%s7737_s6 + $0x28] sm:$0xff] %vm225_vm0, %v3723_v37  ;;  %v3722_v56 = vmax.f32 %v3580_v23, 0.0  ;;  %v2781_v31 = vpop.permute.xlu0 %2780  ;;  %v3080_v48 = vpop.permute.xlu1 %3079  ;;  %v3217_v51 = vsel %vm1469_vm5, %v3185_v0, %v8784_v10 }
 0x567   : > { %v3374_v21 = vsel %vm1634_vm10, %v3342_v13, %v3080_v48  ;;  %v3279_v63 = vsel %vm1535_vm7, %v3247_v39, %v2781_v31 }
 0x568   : > { %3754 = vst.msk [vmem:[%s7737_s6 + $0x20] sm:$0xff] %vm225_vm0, %v3722_v56  ;;  %4119 = vmatmul.mubr.msk.f32.gmra.mxu1 %vm1683_vm11, %v3374_v21 }
 0x56a   : > { %v2783_v22 = vpop.permute.xlu0 %2782  ;;  %v2879_v32 = vpop.permute.xlu1 %2878 }
 0x56b   : > { %v3311_v11 = vsel %vm1568_vm8, %v3279_v63, %v2879_v32  ;;  %v3280_v44 = vsel %vm1535_vm7, %v3248_v26, %v2783_v22  ;;  %v8785_v22 = vld [vmem:[#allocation65_spill] sm:$0xff] }
 0x56c   : > { %v3154_v32 = vsel %vm225_vm0, %v7550_v24, %v8785_v22 }
 0x56d   : > { %v3186_v59 = vsel %vm1436_vm4, %v3154_v32, %v8786_v30 }
 0x56e   : > { %v2881_v53 = vpop.permute.xlu0 %2880  ;;  %v2981_v50 = vpop.permute.xlu1 %2980  ;;  %v3218_v60 = vsel %vm1469_vm5, %v3186_v59, %v8787_v1 }
 0x56f   : > { %v3343_v61 = vsel %vm1601_vm9, %v3311_v11, %v2981_v50  ;;  %v3312_v8 = vsel %vm1568_vm8, %v3280_v44, %v2881_v53 }
 0x572   : > { %v2684_v34 = vpop.permute.xlu0 %2683  ;;  %v2983_v16 = vpop.permute.xlu1 %2982 }
 0x573   : > { %v3344_v36 = vsel %vm1601_vm9, %v3312_v8, %v2983_v16  ;;  %v3249_v28 = vsel %vm1502_vm6, %v3217_v51, %v2684_v34 }
 0x575   : > { %v4093_v19 = vpop.f32.mrf.mxu1 }
 0x576   : > { %v3595_v42 = vadd.f32 %v4093_v19, %v7718_v43  ;;  %v3082_v49 = vpop.permute.xlu0 %3081  ;;  %v2686_v45 = vpop.permute.xlu1 %2685  ;;  %v8788_v19 = vld [vmem:[#allocation139_spill] sm:$0xff] }
 0x577   : > { %v3375_v57 = vsel %vm1634_vm10, %v3343_v61, %v3082_v49  ;;  %v3589_v25 = vpop.f32.mrf.mxu1  ;;  %v3250_v16 = vsel %vm1502_vm6, %v3218_v60, %v2686_v45  ;;  %v3155_v62 = vsel %vm225_vm0, %v7586_v14, %v8788_v19  ;;  %v3156_v61 = vsel %vm225_vm0, %v7598_v20, %v8789_v58  ;;  %v8791_v45 = vld [vmem:[#allocation38_spill] sm:$0xff] }
 0x578   : > { %v3725_v18 = vmax.f32 %v3595_v42, 0.0  ;;  %v3590_v15 = vadd.f32 %v7718_v43, %v3589_v25  ;;  %4121 = vmatprep.mubr.msk.f32.mxu1 %vm1683_vm11, %v3375_v57  ;;  %v8790_v42 = vld [vmem:[#allocation10_spill] sm:$0xff]  ;;  %v3188_v26 = vsel %vm1436_vm4, %v3156_v61, %v8791_v45  ;;  %v8792_v57 = vld [vmem:[#allocation44_spill] sm:$0xff] }
 0x579   : > { %v3187_v49 = vsel %vm1436_vm4, %v3155_v62, %v8790_v42 }
 0x57a   : > { %3757 = vst.msk [vmem:[%s7737_s6 + $0x38] sm:$0xff] %vm225_vm0, %v3725_v18  ;;  %v3724_v33 = vmax.f32 %v3590_v15, 0.0  ;;  %v2785_v9 = vpop.permute.xlu0 %2784  ;;  %v3084_v5 = vpop.permute.xlu1 %3083  ;;  %v3219_v25 = vsel %vm1469_vm5, %v3187_v49, %v8792_v57 }
 0x57b   : > { %v3376_v4 = vsel %vm1634_vm10, %v3344_v36, %v3084_v5  ;;  %v3281_v37 = vsel %vm1535_vm7, %v3249_v28, %v2785_v9 }
 0x57c   : > { %3756 = vst.msk [vmem:[%s7737_s6 + $0x30] sm:$0xff] %vm225_vm0, %v3724_v33  ;;  %4122 = vmatmul.mubr.msk.f32.gmra.mxu1 %vm1683_vm11, %v3376_v4 }
 0x57e   : > { %v2787_v40 = vpop.permute.xlu0 %2786  ;;  %v2883_v6 = vpop.permute.xlu1 %2882 }
 0x57f   : > { %v3313_v23 = vsel %vm1568_vm8, %v3281_v37, %v2883_v6  ;;  %v3282_v24 = vsel %vm1535_vm7, %v3250_v16, %v2787_v40 }
 0x582   : > { %v2885_v54 = vpop.permute.xlu0 %2884  ;;  %v2985_v41 = vpop.permute.xlu1 %2984 }
 0x583   : > { %v3345_v13 = vsel %vm1601_vm9, %v3313_v23, %v2985_v41  ;;  %v3314_v39 = vsel %vm1568_vm8, %v3282_v24, %v2885_v54 }
 0x586   : > { %v2588_v7 = vpop.permute.xlu0 %2587  ;;  %v2688_v35 = vpop.permute.xlu1 %2687 }
 0x587   : > { %v3220_v44 = vsel %vm1469_vm5, %v3188_v26, %v2588_v7  ;;  %v3251_v8 = vsel %vm1502_vm6, %v3219_v25, %v2688_v35 }
 0x589   : > { %v4096_v47 = vpop.f32.mrf.mxu1 }
 0x58a   : > { %v3605_v46 = vadd.f32 %v4096_v47, %v7718_v43  ;;  %v2987_v56 = vpop.permute.xlu0 %2986  ;;  %v3086_v31 = vpop.permute.xlu1 %3085 }
 0x58b   : > { %v3599_v48 = vpop.f32.mrf.mxu1  ;;  %v3377_v21 = vsel %vm1634_vm10, %v3345_v13, %v3086_v31  ;;  %v3346_v55 = vsel %vm1601_vm9, %v3314_v39, %v2987_v56 }
 0x58c   : > { %v3727_v53 = vmax.f32 %v3605_v46, 0.0  ;;  %v3600_v50 = vadd.f32 %v7718_v43, %v3599_v48  ;;  %4124 = vmatprep.mubr.msk.f32.mxu1 %vm1683_vm11, %v3377_v21 }
 0x58e   : > { %3759 = vst.msk [vmem:[%s7737_s6 + $0x48] sm:$0xff] %vm225_vm0, %v3727_v53  ;;  %v3726_v3 = vmax.f32 %v3600_v50, 0.0  ;;  %v2690_v29 = vpop.permute.xlu0 %2689  ;;  %v2789_v34 = vpop.permute.xlu1 %2788 }
 0x58f   : > { %v3252_v14 = vsel %vm1502_vm6, %v3220_v44, %v2690_v29  ;;  %v3283_v36 = vsel %vm1535_vm7, %v3251_v8, %v2789_v34 }
 0x590   : > { %3758 = vst.msk [vmem:[%s7737_s6 + $0x40] sm:$0xff] %vm225_vm0, %v3726_v3 }
 0x592   : > { %v3088_v2 = vpop.permute.xlu0 %3087  ;;  %v2791_v63 = vpop.permute.xlu1 %2790 }
 0x593   : > { %v3378_v17 = vsel %vm1634_vm10, %v3346_v55, %v3088_v2  ;;  %v3284_v20 = vsel %vm1535_vm7, %v3252_v14, %v2791_v63 }
 0x594   : > { %4125 = vmatmul.mubr.msk.f32.gmra.mxu1 %vm1683_vm11, %v3378_v17 }
 0x596   : > { %v2887_v52 = vpop.permute.xlu0 %2886  ;;  %v2889_v11 = vpop.permute.xlu1 %2888 }
 0x597   : > { %v3315_v33 = vsel %vm1568_vm8, %v3283_v36, %v2887_v52  ;;  %v3316_v9 = vsel %vm1568_vm8, %v3284_v20, %v2889_v11 }
 0x59a   : > { %v2989_v18 = vpop.permute.xlu0 %2988  ;;  %v2991_v15 = vpop.permute.xlu1 %2990 }
 0x59b   : > { %v3347_v4 = vsel %vm1601_vm9, %v3315_v33, %v2989_v18  ;;  %v3348_v40 = vsel %vm1601_vm9, %v3316_v9, %v2991_v15 }
 0x59d   : > { %v4099_v5 = vpop.f32.mrf.mxu1 }
 0x59e   : > { %v3615_v6 = vadd.f32 %v4099_v5, %v7718_v43  ;;  %v3090_v54 = vpop.permute.xlu0 %3089  ;;  %v3092_v41 = vpop.permute.xlu1 %3091 }
 0x59f   : > { %v3379_v38 = vsel %vm1634_vm10, %v3347_v4, %v3090_v54  ;;  %v3609_v27 = vpop.f32.mrf.mxu1  ;;  %v3380_v12 = vsel %vm1634_vm10, %v3348_v40, %v3092_v41 }
 0x5a0   : > { %v3729_v0 = vmax.f32 %v3615_v6, 0.0  ;;  %v3610_v10 = vadd.f32 %v7718_v43, %v3609_v27  ;;  %4127 = vmatprep.mubr.msk.f32.mxu1 %vm1683_vm11, %v3379_v38 }
 0x5a1   : > { %4128 = vmatmul.mubr.msk.f32.gmra.mxu1 %vm1683_vm11, %v3380_v12 }
 0x5a2   : > { %3761 = vst.msk [vmem:[%s7737_s6 + $0x58] sm:$0xff] %vm225_vm0, %v3729_v0  ;;  %v3728_v51 = vmax.f32 %v3610_v10, 0.0 }
 0x5a4   : > { %3760 = vst.msk [vmem:[%s7737_s6 + $0x50] sm:$0xff] %vm225_vm0, %v3728_v51 }
 0x5b1   : > { %v4102_v7 = vpop.f32.mrf.mxu1 }
 0x5b2   : > { %v3625_v35 = vadd.f32 %v4102_v7, %v7718_v43 }
 0x5b3   : > { %v3619_v28 = vpop.f32.mrf.mxu1 }
 0x5b4   : > { %v3731_v37 = vmax.f32 %v3625_v35, 0.0  ;;  %v3620_v23 = vadd.f32 %v7718_v43, %v3619_v28 }
 0x5b6   : > { %3763 = vst.msk [vmem:[%s7737_s6 + $0x68] sm:$0xff] %vm225_vm0, %v3731_v37  ;;  %v3730_v47 = vmax.f32 %v3620_v23, 0.0 }
 0x5b8   : > { %3762 = vst.msk [vmem:[%s7737_s6 + $0x60] sm:$0xff] %vm225_vm0, %v3730_v47 }
 0x5c5   : > { %v4105_v13 = vpop.f32.mrf.mxu1 }
 0x5c6   : > { %v3635_v46 = vadd.f32 %v4105_v13, %v7718_v43 }
 0x5c7   : > { %v3629_v56 = vpop.f32.mrf.mxu1 }
 0x5c8   : > { %v3733_v31 = vmax.f32 %v3635_v46, 0.0  ;;  %v3630_v48 = vadd.f32 %v7718_v43, %v3629_v56 }
 0x5ca   : > { %3765 = vst.msk [vmem:[%s7737_s6 + $0x78] sm:$0xff] %vm225_vm0, %v3733_v31  ;;  %v3732_v21 = vmax.f32 %v3630_v48, 0.0 }
 0x5cc   : > { %3764 = vst.msk [vmem:[%s7737_s6 + $0x70] sm:$0xff] %vm225_vm0, %v3732_v21 }
 0x5d9   : > { %v4108_v22 = vpop.f32.mrf.mxu1 }
 0x5da   : > { %v3645_v32 = vadd.f32 %v4108_v22, %v7718_v43 }
 0x5db   : > { %v3639_v53 = vpop.f32.mrf.mxu1 }
 0x5dc   : > { %v3735_v50 = vmax.f32 %v3645_v32, 0.0  ;;  %v3640_v30 = vadd.f32 %v7718_v43, %v3639_v53 }
 0x5de   : > { %3767 = vst.msk [vmem:[%s7737_s6 + $0x88] sm:$0xff] %vm225_vm0, %v3735_v50  ;;  %v3734_v59 = vmax.f32 %v3640_v30, 0.0 }
 0x5e0   : > { %3766 = vst.msk [vmem:[%s7737_s6 + $0x80] sm:$0xff] %vm225_vm0, %v3734_v59 }
 0x5ed   : > { %v4111_v1 = vpop.f32.mrf.mxu1 }
 0x5ee   : > { %v3655_v60 = vadd.f32 %v4111_v1, %v7718_v43 }
 0x5ef   : > { %v3649_v3 = vpop.f32.mrf.mxu1 }
 0x5f0   : > { %v3737_v29 = vmax.f32 %v3655_v60, 0.0  ;;  %v3650_v34 = vadd.f32 %v7718_v43, %v3649_v3 }
 0x5f2   : > { %3769 = vst.msk [vmem:[%s7737_s6 + $0x98] sm:$0xff] %vm225_vm0, %v3737_v29  ;;  %v3736_v16 = vmax.f32 %v3650_v34, 0.0 }
 0x5f4   : > { %3768 = vst.msk [vmem:[%s7737_s6 + $0x90] sm:$0xff] %vm225_vm0, %v3736_v16 }
 0x600   : > { %v4114_v24 = vpop.f32.mrf.mxu1 }
 0x601   : > { %v3665_v39 = vadd.f32 %v4114_v24, %v7718_v43 }
 0x602   : > { %v3659_v55 = vpop.f32.mrf.mxu1 }
 0x603   : > { %v3739_v2 = vmax.f32 %v3665_v39, 0.0  ;;  %v3660_v63 = vadd.f32 %v7718_v43, %v3659_v55 }
 0x605   : > { %3771 = vst.msk [vmem:[%s7737_s6 + $0xa8] sm:$0xff] %vm225_vm0, %v3739_v2  ;;  %v3738_v17 = vmax.f32 %v3660_v63, 0.0 }
 0x607   : > { %3770 = vst.msk [vmem:[%s7737_s6 + $0xa0] sm:$0xff] %vm225_vm0, %v3738_v17 }
 0x614   : > { %v4117_v52 = vpop.f32.mrf.mxu1 }
 0x615   : > { %v3675_v11 = vadd.f32 %v4117_v52, %v7718_v43 }
 0x616   : > { %v3669_v19 = vpop.f32.mrf.mxu1 }
 0x617   : > { %v3741_v62 = vmax.f32 %v3675_v11, 0.0  ;;  %v3670_v58 = vadd.f32 %v7718_v43, %v3669_v19 }
 0x619   : > { %3773 = vst.msk [vmem:[%s7737_s6 + $0xb8] sm:$0xff] %vm225_vm0, %v3741_v62  ;;  %v3740_v61 = vmax.f32 %v3670_v58, 0.0 }
 0x61b   : > { %3772 = vst.msk [vmem:[%s7737_s6 + $0xb0] sm:$0xff] %vm225_vm0, %v3740_v61 }
 0x628   : > { %v4120_v42 = vpop.f32.mrf.mxu1 }
 0x629   : > { %v3685_v49 = vadd.f32 %v4120_v42, %v7718_v43 }
 0x62a   : > { %v3679_v45 = vpop.f32.mrf.mxu1 }
 0x62b   : > { %v3743_v26 = vmax.f32 %v3685_v49, 0.0  ;;  %v3680_v57 = vadd.f32 %v7718_v43, %v3679_v45 }
 0x62d   : > { %3775 = vst.msk [vmem:[%s7737_s6 + $0xc8] sm:$0xff] %vm225_vm0, %v3743_v26  ;;  %v3742_v25 = vmax.f32 %v3680_v57, 0.0 }
 0x62f   : > { %3774 = vst.msk [vmem:[%s7737_s6 + $0xc0] sm:$0xff] %vm225_vm0, %v3742_v25 }
 0x63c   : > { %v4123_v44 = vpop.f32.mrf.mxu1 }
 0x63d   : > { %v3695_v18 = vadd.f32 %v4123_v44, %v7718_v43 }
 0x63e   : > { %v3689_v15 = vpop.f32.mrf.mxu1 }
 0x63f   : > { %v3745_v8 = vmax.f32 %v3695_v18, 0.0  ;;  %v3690_v14 = vadd.f32 %v7718_v43, %v3689_v15 }
 0x641   : > { %3777 = vst.msk [vmem:[%s7737_s6 + $0xd8] sm:$0xff] %vm225_vm0, %v3745_v8  ;;  %v3744_v36 = vmax.f32 %v3690_v14, 0.0 }
 0x643   : > { %3776 = vst.msk [vmem:[%s7737_s6 + $0xd0] sm:$0xff] %vm225_vm0, %v3744_v36 }
 0x654   : > { %v4126_v20 = vpop.f32.mrf.mxu1 }
 0x655   : > { %v3705_v33 = vadd.f32 %v4126_v20, %v7718_v43 }
 0x656   : > { %v3699_v9 = vpop.f32.mrf.mxu1 }
 0x657   : > { %v3747_v5 = vmax.f32 %v3705_v33, 0.0  ;;  %v3700_v4 = vadd.f32 %v7718_v43, %v3699_v9 }
 0x659   : > { %3779 = vst.msk [vmem:[%s7737_s6 + $0xe8] sm:$0xff] %vm225_vm0, %v3747_v5  ;;  %v3746_v40 = vmax.f32 %v3700_v4, 0.0 }
 0x65b   : > { %3778 = vst.msk [vmem:[%s7737_s6 + $0xe0] sm:$0xff] %vm225_vm0, %v3746_v40 }
 0x661   : > { %v4129_v6 = vpop.f32.mrf.mxu1 }
 0x662   : > { %v3715_v54 = vadd.f32 %v4129_v6, %v7718_v43 }
 0x663   : > { %v3709_v41 = vpop.f32.mrf.mxu1 }
 0x664   : > { %v3749_v38 = vmax.f32 %v3715_v54, 0.0  ;;  %v3710_v27 = vadd.f32 %v7718_v43, %v3709_v41 }
 0x666   : > { %3781 = vst.msk [vmem:[%s7737_s6 + $0xf8] sm:$0xff] %vm225_vm0, %v3749_v38  ;;  %v3748_v12 = vmax.f32 %v3710_v27, 0.0 }
 0x668   : > { %3780 = vst.msk [vmem:[%s7737_s6 + $0xf0] sm:$0xff] %vm225_vm0, %v3748_v12 }
 0x669 PF: > { %s15_s18 = sadd.s32 1, %s4217_s18  }
 0x66a   : > { %p12_p4 = scmp.ge.s32.totalorder %s15_s18, 4  }
 0x66c   :  { %14 = sbr.rel (!%p12_p4) target bundleno = 1 (0x1), region = 71 }

</bundles_post_ra>
